<compile_context>
chip_gen: v5e
topology: v5e:2x2
jax: 0.10.0
libtpu: 0.0.40
codegen_flags: <defaults>
</compile_context>

<pallas_src>
import math
from functools import partial

import jax
import jax.numpy as jnp
from jax.experimental import pallas as pl
from jax.experimental.pallas import tpu as pltpu


def _softplus(x):
    # numerically stable softplus = log(1 + exp(x)); stays in x.dtype
    return jnp.maximum(x, 0.0) + jnp.log1p(jnp.exp(-jnp.abs(x)))


def _bf16_elementwise_ok():
    """bf16 VPU/EUP exist on v6e and later; fall back to f32 on v5e and older."""
    try:
        kind = jax.devices()[0].device_kind.lower()
    except Exception:
        return False
    if "tpu" not in kind:
        return False
    return not any(old in kind for old in ("v2", "v3", "v4", "v5"))


def vae_forward_kernel(
    x_ref, eps_ref,
    w1_ref, b1_ref,
    wenc_ref, benc_ref,      # fused fc21||fc22: (hidden, 2*latent), (1, 2*latent)
    w3s_ref, b3_ref,         # stacked [w3; w3]: (2*latent, hidden), (1, hidden)
    wdec_ref, bdec_ref,      # fused fc4||fc5:   (hidden, 2*input_dim), (1, 2*input_dim)
    dec_ref, mulv_ref,
    *, latent, input_dim, act_dtype,
):
    # encode (log_data=False): x = log1p(x), in f32
    x = jnp.log1p(x_ref[...])

    # fc1 + softplus (bf16 MXU inputs, f32 accumulate, bias add in f32)
    a1 = jnp.dot(x.astype(jnp.bfloat16), w1_ref[...],
                 preferred_element_type=jnp.float32) + b1_ref[...]
    h1 = _softplus(a1.astype(act_dtype))

    # fused fc21 || fc22 -> (TB, 2*latent), lane-dense (2*latent == 128)
    mulv = jnp.dot(h1.astype(jnp.bfloat16), wenc_ref[...],
                   preferred_element_type=jnp.float32) + benc_ref[...]
    mulv_ref[...] = mulv

    # reparameterize without sub-vreg slices:
    #   lanes [0, latent)      -> mu
    #   lanes [latent, 2*lat)  -> eps * exp(0.5 * logvar)
    # zslab @ [w3; w3] == (mu + eps*std) @ w3
    lane = jax.lax.broadcasted_iota(jnp.int32, mulv.shape, 1)
    is_mu = lane < latent
    zslab = jnp.where(is_mu, mulv, eps_ref[...] * jnp.exp(0.5 * mulv))

    # fc3 + softplus (K = 2*latent = 128 -> better MXU K-fill)
    a3 = jnp.dot(zslab.astype(jnp.bfloat16), w3s_ref[...],
                 preferred_element_type=jnp.float32) + b3_ref[...]
    h3 = _softplus(a3.astype(act_dtype))

    # fused fc4 || fc5 -> (TB, 2*input_dim)
    dec = jnp.dot(h3.astype(jnp.bfloat16), wdec_ref[...],
                  preferred_element_type=jnp.float32) + bdec_ref[...]

    # exp on the fc4 half via 128-aligned half-slab stores (input_dim % 128 == 0)
    dec_ref[:, :input_dim] = jnp.exp(dec[:, :input_dim])
    dec_ref[:, input_dim:] = dec[:, input_dim:]


def _bytes(shape, dtype):
    return math.prod(shape) * jnp.dtype(dtype).itemsize


def vae_forward(x, eps, params, *, tb=256, bf16_elementwise=None):
    """x: (B, input_dim) f32 counts, eps: (B, latent) f32 noise.

    params: PyTorch-Linear-equivalent weights stored as (in, out), biases (1, out).
    Returns (de_mean, de_dropout, mu, logvar).
    """
    B, input_dim = x.shape
    latent = eps.shape[-1]
    hidden = params["w1"].shape[1]

    if bf16_elementwise is None:
        bf16_elementwise = _bf16_elementwise_ok()
    act_dtype = jnp.bfloat16 if bf16_elementwise else jnp.float32

    # ---- fuse / stack the heads once per call, outside the kernel ----
    wenc = jnp.concatenate([params["w21"], params["w22"]], axis=1)  # (hidden, 2*latent)
    benc = jnp.concatenate([params["b21"], params["b22"]], axis=1)  # (1, 2*latent)
    w3s = jnp.concatenate([params["w3"], params["w3"]], axis=0)     # (2*latent, hidden)
    wdec = jnp.concatenate([params["w4"], params["w5"]], axis=1)    # (hidden, 2*input)
    bdec = jnp.concatenate([params["b4"], params["b5"]], axis=1)    # (1, 2*input)

    # bf16 weights for the MXU; biases stay f32 (added after f32 accumulation)
    w1 = params["w1"].astype(jnp.bfloat16)
    wenc = wenc.astype(jnp.bfloat16)
    w3s = w3s.astype(jnp.bfloat16)
    wdec = wdec.astype(jnp.bfloat16)
    b1, b3 = params["b1"], params["b3"]

    # lane-dense eps slab: [0 | eps] -> (B, 2*latent), second half aligns with logvar lanes
    eps_slab = jnp.concatenate([jnp.zeros_like(eps), eps], axis=1)

    # ---- batch tiling: multiple of 8, and keep >= 2 grid steps when possible ----
    tb = max(8, min(int(tb), B))
    tb = ((tb + 7) // 8) * 8
    if B >= 16:
        half = ((pl.cdiv(B, 2) + 7) // 8) * 8   # >=2 grid steps -> both v7x TCs
        tb = min(tb, half)
    n_blocks = pl.cdiv(B, tb)
    Bp = n_blocks * tb
    if Bp != B:
        x = jnp.pad(x, ((0, Bp - B), (0, 0)))            # log1p(0)=0, harmless
        eps_slab = jnp.pad(eps_slab, ((0, Bp - B), (0, 0)))

    act_spec = lambda d: pl.BlockSpec((tb, d), lambda i: (i, 0))
    res_spec = lambda s: pl.BlockSpec(s, lambda i: (0, 0))   # resident across grid

    in_specs = [
        act_spec(input_dim),                 # x
        act_spec(2 * latent),                # eps slab (lane-dense: 2*latent lanes)
        res_spec((input_dim, hidden)),       # w1
        res_spec((1, hidden)),               # b1
        res_spec((hidden, 2 * latent)),      # wenc
        res_spec((1, 2 * latent)),           # benc
        res_spec((2 * latent, hidden)),      # w3 stacked
        res_spec((1, hidden)),               # b3
        res_spec((hidden, 2 * input_dim)),   # wdec
        res_spec((1, 2 * input_dim)),        # bdec
    ]
    out_specs = (
        act_spec(2 * input_dim),             # exp(fc4) || fc5
        act_spec(2 * latent),                # mu || logvar
    )
    out_shape = (
        jax.ShapeDtypeStruct((Bp, 2 * input_dim), jnp.float32),
        jax.ShapeDtypeStruct((Bp, 2 * latent), jnp.float32),
    )

    # ---- VMEM budget derived from the actual tile footprint (v7x-safe) ----
    act_bytes = 2 * (                                  # double-buffered streams
        _bytes((tb, input_dim), jnp.float32)           # x
        + _bytes((tb, 2 * latent), jnp.float32)        # eps slab
        + _bytes((tb, 2 * input_dim), jnp.float32)     # dec out
        + _bytes((tb, 2 * latent), jnp.float32)        # mulv out
    )
    wgt_bytes = 2 * (                                  # resident blocks (dbl-buffered)
        _bytes((input_dim, hidden), jnp.bfloat16)
        + _bytes((hidden, 2 * latent), jnp.bfloat16)
        + _bytes((2 * latent, hidden), jnp.bfloat16)
        + _bytes((hidden, 2 * input_dim), jnp.bfloat16)
        + 2 * _bytes((1, hidden), jnp.float32)
        + _bytes((1, 2 * latent), jnp.float32)
        + _bytes((1, 2 * input_dim), jnp.float32)
    )
    vmem_limit = min(max(2 * (act_bytes + wgt_bytes), 16 << 20) + (8 << 20), 56 << 20)

    # advisory cost estimate (helps XLA schedule around the custom call)
    flops = 2 * Bp * (input_dim * hidden + hidden * 2 * latent
                      + 2 * latent * hidden + hidden * 2 * input_dim)
    transcendentals = Bp * (2 * input_dim + 4 * hidden + 2 * latent)
    bytes_accessed = (
        x.size * 4 + eps_slab.size * 4
        + (w1.size + wenc.size + w3s.size + wdec.size) * 2
        + (b1.size + benc.size + b3.size + bdec.size) * 4
        + Bp * (2 * input_dim + 2 * latent) * 4
    )

    kernel = partial(vae_forward_kernel,
                     latent=latent, input_dim=input_dim, act_dtype=act_dtype)

    dec, mulv = pl.pallas_call(
        kernel,
        out_shape=out_shape,
        grid=(n_blocks,),
        in_specs=in_specs,
        out_specs=out_specs,
        compiler_params=pltpu.CompilerParams(
            dimension_semantics=("parallel",),       # batch axis -> megacore
            vmem_limit_bytes=int(vmem_limit),
        ),
        cost_estimate=pl.CostEstimate(
            flops=flops,
            transcendentals=transcendentals,
            bytes_accessed=bytes_accessed,
        ),
    )(x, eps_slab, w1, b1, wenc, benc, w3s, b3, wdec, bdec)

    de_mean = dec[:B, :input_dim]
    de_dropout = dec[:B, input_dim:]
    mu = mulv[:B, :latent]
    logvar = mulv[:B, latent:]
    return de_mean, de_dropout, mu, logvar


def make_params(key, input_dim, hidden_dim, latent_dim):
    """Deterministic synthetic parameters (PyTorch Linear shapes, stored as (in, out))."""
    keys = jax.random.split(key, 12)
    scale = 0.05

    def lin(kw, kb, din, dout):
        w = scale * jax.random.normal(kw, (din, dout), jnp.float32)
        b = scale * jax.random.normal(kb, (1, dout), jnp.float32)
        return w, b

    w1, b1 = lin(keys[0], keys[1], input_dim, hidden_dim)
    w21, b21 = lin(keys[2], keys[3], hidden_dim, latent_dim)
    w22, b22 = lin(keys[4], keys[5], hidden_dim, latent_dim)
    w3, b3 = lin(keys[6], keys[7], latent_dim, hidden_dim)
    w4, b4 = lin(keys[8], keys[9], hidden_dim, input_dim)
    w5, b5 = lin(keys[10], keys[11], hidden_dim, input_dim)
    return dict(
        w1=w1, b1=b1, w21=w21, b21=b21, w22=w22, b22=b22,
        w3=w3, b3=b3, w4=w4, b4=b4, w5=w5, b5=b5,
    )


def vae_forward_ref(x, eps, p):
    """Pure-JAX f32 reference mirroring the PyTorch forward."""
    xl = jnp.log1p(x)
    h1 = jax.nn.softplus(xl @ p["w1"] + p["b1"])
    mu = h1 @ p["w21"] + p["b21"]
    logvar = h1 @ p["w22"] + p["b22"]
    z = mu + eps * jnp.exp(0.5 * logvar)
    h3 = jax.nn.softplus(z @ p["w3"] + p["b3"])
    de_mean = jnp.exp(h3 @ p["w4"] + p["b4"])
    de_dropout = h3 @ p["w5"] + p["b5"]
    return de_mean, de_dropout, mu, logvar


if __name__ == "__main__":
    # MXU-friendly shapes: B=512 with TB=256 -> 2 grid steps of full-height tiles.
    B, INPUT_DIM, HIDDEN_DIM, LATENT_DIM = 512, 256, 128, 64
    TB = 256

    key = jax.random.PRNGKey(0)
    k_x, k_eps, k_params = jax.random.split(key, 3)

    # Count-like non-negative input data (Poisson-ish via exp of normals).
    x = jnp.exp(jax.random.normal(k_x, (B, INPUT_DIM), jnp.float32))
    eps = jax.random.normal(k_eps, (B, LATENT_DIM), jnp.float32)
    params = make_params(k_params, INPUT_DIM, HIDDEN_DIM, LATENT_DIM)

    de_mean, de_dropout, mu, logvar = jax.block_until_ready(
        vae_forward(x, eps, params, tb=TB)
    )

    # Sanity check against a pure-JAX f32 reference (bf16 dots -> looser tol).
    rm, rd, rmu, rlv = vae_forward_ref(x, eps, params)
    assert jnp.allclose(mu, rmu, atol=3e-2, rtol=3e-2)
    assert jnp.allclose(logvar, rlv, atol=3e-2, rtol=3e-2)
    assert jnp.allclose(de_dropout, rd, atol=3e-2, rtol=3e-2)
    assert jnp.allclose(de_mean, rm, atol=3e-2, rtol=3e-2)

    print("KERNEL_OK")
</pallas_src>

<mosaic_0001>
module attributes {stable_mosaic.version = 11 : i64} {
  func.func @vae_forward_kernel(%arg0: i32, %arg1: memref<256x256xf32, #tpu.memory_space<vmem>>, %arg2: memref<256x128xf32, #tpu.memory_space<vmem>>, %arg3: memref<256x128xbf16, #tpu.memory_space<vmem>>, %arg4: memref<1x128xf32, #tpu.memory_space<vmem>>, %arg5: memref<128x128xbf16, #tpu.memory_space<vmem>>, %arg6: memref<1x128xf32, #tpu.memory_space<vmem>>, %arg7: memref<128x128xbf16, #tpu.memory_space<vmem>>, %arg8: memref<1x128xf32, #tpu.memory_space<vmem>>, %arg9: memref<128x512xbf16, #tpu.memory_space<vmem>>, %arg10: memref<1x512xf32, #tpu.memory_space<vmem>>, %arg11: memref<256x512xf32, #tpu.memory_space<vmem>>, %arg12: memref<256x128xf32, #tpu.memory_space<vmem>>) attributes {dimension_semantics = [#tpu.dimension_semantics<parallel>], iteration_bounds = array<i64: 2>, scalar_prefetch = 0 : i64, scratch_operands = 0 : i64, tpu.core_type = #tpu.core_type<tc>, window_params = [{transform_indices = @transform_0, window_bounds = array<i64: 256, 256>}, {transform_indices = @transform_1, window_bounds = array<i64: 256, 128>}, {pipeline_mode = #tpu.pipeline_mode<synchronous>, transform_indices = @transform_2, window_bounds = array<i64: 256, 128>}, {pipeline_mode = #tpu.pipeline_mode<synchronous>, transform_indices = @transform_3, window_bounds = array<i64: 1, 128>}, {pipeline_mode = #tpu.pipeline_mode<synchronous>, transform_indices = @transform_4, window_bounds = array<i64: 128, 128>}, {pipeline_mode = #tpu.pipeline_mode<synchronous>, transform_indices = @transform_5, window_bounds = array<i64: 1, 128>}, {pipeline_mode = #tpu.pipeline_mode<synchronous>, transform_indices = @transform_6, window_bounds = array<i64: 128, 128>}, {pipeline_mode = #tpu.pipeline_mode<synchronous>, transform_indices = @transform_7, window_bounds = array<i64: 1, 128>}, {pipeline_mode = #tpu.pipeline_mode<synchronous>, transform_indices = @transform_8, window_bounds = array<i64: 128, 512>}, {pipeline_mode = #tpu.pipeline_mode<synchronous>, transform_indices = @transform_9, window_bounds = array<i64: 1, 512>}, {transform_indices = @transform_10, window_bounds = array<i64: 256, 512>}, {transform_indices = @transform_11, window_bounds = array<i64: 256, 128>}]} {
    %c0 = arith.constant 0 : index
    %c0_0 = arith.constant 0 : index
    %0 = vector.load %arg1[%c0, %c0_0] : memref<256x256xf32, #tpu.memory_space<vmem>>, vector<256x256xf32>
    %1 = math.log1p %0 : vector<256x256xf32>
    %2 = arith.truncf %1 : vector<256x256xf32> to vector<256x256xbf16>
    %c0_1 = arith.constant 0 : index
    %c0_2 = arith.constant 0 : index
    %3 = vector.load %arg3[%c0_1, %c0_2] : memref<256x128xbf16, #tpu.memory_space<vmem>>, vector<256x128xbf16>
    %cst = arith.constant dense<0.000000e+00> : vector<256x128xf32>
    %4 = tpu.matmul %2, %3, %cst {dimension_numbers = #tpu.dot_dimension_numbers<[1], [0], [0], [1], [0, 0, 1, 1], [], []>} : vector<256x256xbf16>, vector<256x128xbf16>, vector<256x128xf32> -> vector<256x128xf32>
    %c0_3 = arith.constant 0 : index
    %c0_4 = arith.constant 0 : index
    %5 = vector.load %arg4[%c0_3, %c0_4] : memref<1x128xf32, #tpu.memory_space<vmem>>, vector<1x128xf32>
    %6 = vector.broadcast %5 : vector<1x128xf32> to vector<256x128xf32>
    %7 = arith.addf %4, %6 : vector<256x128xf32>
    %cst_5 = arith.constant 0.000000e+00 : f32
    %8 = vector.broadcast %cst_5 : f32 to vector<256x128xf32>
    %9 = arith.maximumf %7, %8 : vector<256x128xf32>
    %10 = math.absf %7 : vector<256x128xf32>
    %cst_6 = arith.constant 0.000000e+00 : f32
    %11 = vector.broadcast %cst_6 : f32 to vector<256x128xf32>
    %12 = arith.subf %11, %10 : vector<256x128xf32>
    %13 = math.exp %12 : vector<256x128xf32>
    %14 = math.log1p %13 : vector<256x128xf32>
    %15 = arith.addf %9, %14 : vector<256x128xf32>
    %16 = arith.truncf %15 : vector<256x128xf32> to vector<256x128xbf16>
    %c0_7 = arith.constant 0 : index
    %c0_8 = arith.constant 0 : index
    %17 = vector.load %arg5[%c0_7, %c0_8] : memref<128x128xbf16, #tpu.memory_space<vmem>>, vector<128x128xbf16>
    %cst_9 = arith.constant dense<0.000000e+00> : vector<256x128xf32>
    %18 = tpu.matmul %16, %17, %cst_9 {dimension_numbers = #tpu.dot_dimension_numbers<[1], [0], [0], [1], [0, 0, 1, 1], [], []>} : vector<256x128xbf16>, vector<128x128xbf16>, vector<256x128xf32> -> vector<256x128xf32>
    %c0_10 = arith.constant 0 : index
    %c0_11 = arith.constant 0 : index
    %19 = vector.load %arg6[%c0_10, %c0_11] : memref<1x128xf32, #tpu.memory_space<vmem>>, vector<1x128xf32>
    %20 = vector.broadcast %19 : vector<1x128xf32> to vector<256x128xf32>
    %21 = arith.addf %18, %20 : vector<256x128xf32>
    %c0_12 = arith.constant 0 : index
    %c0_13 = arith.constant 0 : index
    %22 = vector.load %arg12[%c0_12, %c0_13] : memref<256x128xf32, #tpu.memory_space<vmem>>, vector<256x128xf32>
    tpu.vector_store %arg12[%c0_12, %c0_13], %21 {strides = array<i32>} : memref<256x128xf32, #tpu.memory_space<vmem>>, vector<256x128xf32>,
    %23 = tpu.iota {dimensions = array<i32: 1>} : vector<256x128xi32>
    %c64_i32 = arith.constant 64 : i32
    %24 = vector.broadcast %c64_i32 : i32 to vector<256x128xi32>
    %25 = arith.cmpi slt, %23, %24 : vector<256x128xi32>
    %c0_14 = arith.constant 0 : index
    %c0_15 = arith.constant 0 : index
    %26 = vector.load %arg2[%c0_14, %c0_15] : memref<256x128xf32, #tpu.memory_space<vmem>>, vector<256x128xf32>
    %cst_16 = arith.constant 5.000000e-01 : f32
    %27 = vector.broadcast %cst_16 : f32 to vector<256x128xf32>
    %28 = arith.mulf %27, %21 : vector<256x128xf32>
    %29 = math.exp %28 : vector<256x128xf32>
    %30 = arith.mulf %26, %29 : vector<256x128xf32>
    %31 = arith.select %25, %21, %30 : vector<256x128xi1>, vector<256x128xf32>
    %32 = arith.truncf %31 : vector<256x128xf32> to vector<256x128xbf16>
    %c0_17 = arith.constant 0 : index
    %c0_18 = arith.constant 0 : index
    %33 = vector.load %arg7[%c0_17, %c0_18] : memref<128x128xbf16, #tpu.memory_space<vmem>>, vector<128x128xbf16>
    %cst_19 = arith.constant dense<0.000000e+00> : vector<256x128xf32>
    %34 = tpu.matmul %32, %33, %cst_19 {dimension_numbers = #tpu.dot_dimension_numbers<[1], [0], [0], [1], [0, 0, 1, 1], [], []>} : vector<256x128xbf16>, vector<128x128xbf16>, vector<256x128xf32> -> vector<256x128xf32>
    %c0_20 = arith.constant 0 : index
    %c0_21 = arith.constant 0 : index
    %35 = vector.load %arg8[%c0_20, %c0_21] : memref<1x128xf32, #tpu.memory_space<vmem>>, vector<1x128xf32>
    %36 = vector.broadcast %35 : vector<1x128xf32> to vector<256x128xf32>
    %37 = arith.addf %34, %36 : vector<256x128xf32>
    %cst_22 = arith.constant 0.000000e+00 : f32
    %38 = vector.broadcast %cst_22 : f32 to vector<256x128xf32>
    %39 = arith.maximumf %37, %38 : vector<256x128xf32>
    %40 = math.absf %37 : vector<256x128xf32>
    %cst_23 = arith.constant 0.000000e+00 : f32
    %41 = vector.broadcast %cst_23 : f32 to vector<256x128xf32>
    %42 = arith.subf %41, %40 : vector<256x128xf32>
    %43 = math.exp %42 : vector<256x128xf32>
    %44 = math.log1p %43 : vector<256x128xf32>
    %45 = arith.addf %39, %44 : vector<256x128xf32>
    %46 = arith.truncf %45 : vector<256x128xf32> to vector<256x128xbf16>
    %c0_24 = arith.constant 0 : index
    %c0_25 = arith.constant 0 : index
    %47 = vector.load %arg9[%c0_24, %c0_25] : memref<128x512xbf16, #tpu.memory_space<vmem>>, vector<128x512xbf16>
    %cst_26 = arith.constant dense<0.000000e+00> : vector<256x512xf32>
    %48 = tpu.matmul %46, %47, %cst_26 {dimension_numbers = #tpu.dot_dimension_numbers<[1], [0], [0], [1], [0, 0, 1, 1], [], []>} : vector<256x128xbf16>, vector<128x512xbf16>, vector<256x512xf32> -> vector<256x512xf32>
    %c0_27 = arith.constant 0 : index
    %c0_28 = arith.constant 0 : index
    %49 = vector.load %arg10[%c0_27, %c0_28] : memref<1x512xf32, #tpu.memory_space<vmem>>, vector<1x512xf32>
    %50 = vector.broadcast %49 : vector<1x512xf32> to vector<256x512xf32>
    %51 = arith.addf %48, %50 : vector<256x512xf32>
    %52 = vector.extract_strided_slice %51 {offsets = [0, 0], sizes = [256, 256], strides = [1, 1]} : vector<256x512xf32> to vector<256x256xf32>
    %53 = math.exp %52 : vector<256x256xf32>
    %c0_29 = arith.constant 0 : index
    %c0_30 = arith.constant 0 : index
    %54 = vector.load %arg11[%c0_29, %c0_30] : memref<256x512xf32, #tpu.memory_space<vmem>>, vector<256x256xf32>
    tpu.vector_store %arg11[%c0_29, %c0_30], %53 {strides = array<i32>} : memref<256x512xf32, #tpu.memory_space<vmem>>, vector<256x256xf32>,
    %55 = vector.extract_strided_slice %51 {offsets = [0, 256], sizes = [256, 256], strides = [1, 1]} : vector<256x512xf32> to vector<256x256xf32>
    %c0_31 = arith.constant 0 : index
    %c256 = arith.constant 256 : index
    %56 = vector.load %arg11[%c0_31, %c256] : memref<256x512xf32, #tpu.memory_space<vmem>>, vector<256x256xf32>
    tpu.vector_store %arg11[%c0_31, %c256], %55 {strides = array<i32>} : memref<256x512xf32, #tpu.memory_space<vmem>>, vector<256x256xf32>,
    return
  }
  func.func @transform_0(%arg0: i32) -> (i32, i32) {
    %c0_i32 = arith.constant 0 : i32
    %c0_i32_0 = arith.constant 0 : i32
    return %arg0, %c0_i32 : i32, i32
  }
  func.func @transform_1(%arg0: i32) -> (i32, i32) {
    %c0_i32 = arith.constant 0 : i32
    %c0_i32_0 = arith.constant 0 : i32
    return %arg0, %c0_i32 : i32, i32
  }
  func.func @transform_2(%arg0: i32) -> (i32, i32) {
    %c0_i32 = arith.constant 0 : i32
    %c0_i32_0 = arith.constant 0 : i32
    %c0_i32_1 = arith.constant 0 : i32
    return %c0_i32, %c0_i32_0 : i32, i32
  }
  func.func @transform_3(%arg0: i32) -> (i32, i32) {
    %c0_i32 = arith.constant 0 : i32
    %c0_i32_0 = arith.constant 0 : i32
    %c0_i32_1 = arith.constant 0 : i32
    return %c0_i32, %c0_i32_0 : i32, i32
  }
  func.func @transform_4(%arg0: i32) -> (i32, i32) {
    %c0_i32 = arith.constant 0 : i32
    %c0_i32_0 = arith.constant 0 : i32
    %c0_i32_1 = arith.constant 0 : i32
    return %c0_i32, %c0_i32_0 : i32, i32
  }
  func.func @transform_5(%arg0: i32) -> (i32, i32) {
    %c0_i32 = arith.constant 0 : i32
    %c0_i32_0 = arith.constant 0 : i32
    %c0_i32_1 = arith.constant 0 : i32
    return %c0_i32, %c0_i32_0 : i32, i32
  }
  func.func @transform_6(%arg0: i32) -> (i32, i32) {
    %c0_i32 = arith.constant 0 : i32
    %c0_i32_0 = arith.constant 0 : i32
    %c0_i32_1 = arith.constant 0 : i32
    return %c0_i32, %c0_i32_0 : i32, i32
  }
  func.func @transform_7(%arg0: i32) -> (i32, i32) {
    %c0_i32 = arith.constant 0 : i32
    %c0_i32_0 = arith.constant 0 : i32
    %c0_i32_1 = arith.constant 0 : i32
    return %c0_i32, %c0_i32_0 : i32, i32
  }
  func.func @transform_8(%arg0: i32) -> (i32, i32) {
    %c0_i32 = arith.constant 0 : i32
    %c0_i32_0 = arith.constant 0 : i32
    %c0_i32_1 = arith.constant 0 : i32
    return %c0_i32, %c0_i32_0 : i32, i32
  }
  func.func @transform_9(%arg0: i32) -> (i32, i32) {
    %c0_i32 = arith.constant 0 : i32
    %c0_i32_0 = arith.constant 0 : i32
    %c0_i32_1 = arith.constant 0 : i32
    return %c0_i32, %c0_i32_0 : i32, i32
  }
  func.func @transform_10(%arg0: i32) -> (i32, i32) {
    %c0_i32 = arith.constant 0 : i32
    %c0_i32_0 = arith.constant 0 : i32
    return %arg0, %c0_i32 : i32, i32
  }
  func.func @transform_11(%arg0: i32) -> (i32, i32) {
    %c0_i32 = arith.constant 0 : i32
    %c0_i32_0 = arith.constant 0 : i32
    return %arg0, %c0_i32 : i32, i32
  }
}

</mosaic_0001>

<bundles_post_ra>
// kernel: tpu_custom_call.1
= control target key start
LH: loop header
LB: loop body
LE: loop exit
PB: predicated region body
PF: predicated region fallthrough
CT: control target
= control target key end

     0   :  { %s7682_s0 = inlined_call_operand.hbm [shape: f32[512,256], index: 0, kind: input, shape index: {}]   ;;  %s7683_s1 = inlined_call_operand.hbm [shape: f32[512,128], index: 1, kind: input, shape index: {}]   ;;  %s7684_s2 = inlined_call_operand.hbm [shape: bf16[256,128], index: 2, kind: input, shape index: {}]   ;;  %s7685_s3 = inlined_call_operand.vmem [shape: f32[1,128], index: 3, kind: input, shape index: {}]   ;;  %s7686_s4 = inlined_call_operand.hbm [shape: bf16[128,128], index: 4, kind: input, shape index: {}]   ;;  %s7687_s5 = inlined_call_operand.vmem [shape: f32[1,128], index: 5, kind: input, shape index: {}]   ;;  %s7688_s6 = inlined_call_operand.hbm [shape: bf16[128,128], index: 6, kind: input, shape index: {}]   ;;  %s7689_s7 = inlined_call_operand.vmem [shape: f32[1,128], index: 7, kind: input, shape index: {}]   ;;  %s7690_s8 = inlined_call_operand.hbm [shape: bf16[128,512], index: 8, kind: input, shape index: {}]   ;;  %s7691_s9 = inlined_call_operand.vmem [shape: f32[1,512], index: 9, kind: input, shape index: {}]   ;;  %s7692_s10 = inlined_call_operand.hbm [shape: f32[512,512], index: 10, kind: output, shape index: {0}]   ;;  %s7693_s11 = inlined_call_operand.hbm [shape: f32[512,128], index: 11, kind: output, shape index: {1}]  }
   0x1   :  { %7702 = sst [smem:[#allocation28_spill]] %s7684_s2 }
   0x2   :  { %7703 = sst [smem:[#allocation29_spill]] %s7686_s4 }
   0x3   :  { %7704 = sst [smem:[#allocation30_spill]] %s7688_s6 }
   0x4   :  { %7705 = sst [smem:[#allocation31_spill]] %s7690_s8 }
   0x5   :  { %7706 = sst [smem:[#allocation32_spill]] %s7692_s10 }
   0x6   :  { %17 = vsyncpa [#allocation3], 0 }
   0x7   :  { %19 = vsyncpa [#allocation3 + $0x1], 0 }
   0x8   :  { %20 = vsyncpa [#allocation6], 0 }
   0x9   :  { %22 = vsyncpa [#allocation6 + $0x1], 0 }
   0xa   :  { %23 = vsyncpa [#allocation9], 0 }
   0xb   :  { %24 = vsyncpa [#allocation12], 0 }
   0xc   :  { %25 = vsyncpa [#allocation4], 0 }
   0xd   :  { %27 = vsyncpa [#allocation4 + $0x1], 0 }
   0xe   :  { %28 = vsyncpa [#allocation15], 0 }
   0xf   :  { %30 = vsyncpa [#allocation15 + $0x1], 0  ;;  %s5500_s17 = smov 0   ;;  %s5502_s18 = smov 0  }
  0x10   :  { %s5504_s19 = smov 0   ;;  %s5506_s20 = smov 0  }
  0x11 LB: > { %7707 = sst [smem:[#allocation23_spill]] %s5412_s17  ;;  %s5521_s21 = sadd.s32 4294967295, %s5424_s20   ;;  %s5424_s20 = sphi %s5506_s20, %s7884_s20   ;;  %s5420_s19 = sphi %s5504_s19, %s7886_s19   ;;  %s5416_s18 = sphi %s5502_s18, %s7888_s18   ;;  %s5412_s17 = sphi %s5500_s17, %s7887_s17  }
  0x12   : > { %7708 = sst [smem:[#allocation24_spill]] %s5420_s19  ;;  %s4082_s22 = sadd.s32 4294967294, %s5424_s20  }
  0x13   : > { %p56_p0 = scmp.ne.s32.totalorder %s5416_s18, %s5412_s17  ;;  %p57_p1 = scmp.eq.s32.totalorder %s5521_s21, 0 }
  0x14   : > { %p274_p2 = scmp.eq.s32.totalorder %s5521_s21, 1  ;;  %p280_p3 = scmp.eq.s32.totalorder %s4082_s22, 1 }
  0x15   : > { %p5530_p4 = por %p57_p1, %p56_p0  ;;  %p4083_p5 = scmp.ge.s32.totalorder %s5424_s20, 1 }
  0x16   : > { %p5535_p6 = por %p280_p3, %p56_p0  ;;  %p313_p7 = scmp.lt.s32.totalorder %s5424_s20, 3 }
  0x17   : > { %s7712_s2 = sld [smem:[#allocation28_spill]]  ;;  %s5426_s29 = smov [#allocation7]  }
  0x18   : > { %s7710_s24 = scalar_select %p5535_p6, 1, 0 }
  0x19   : > { %p5543_p8 = pnand %p4083_p5, %p313_p7  ;;  %s326_s30 = sshll.u32 %s5426_s29, 4  ;;  %s327_s30 = int_to_ptr.vmem [resolvable:$true] %s326_s30 }
  0x1a   : > { %7711 = sst [smem:[#allocation25_spill]] %s7710_s24  ;;  %s5427_s16 = smov 64  }
  0x1b   : > { %p4464_p9 = pneg %p5543_p8  ;;  %s7715_s4 = sld [smem:[#allocation29_spill]] }
  0x1c   : > { %s5428_s22 = smov 4   ;;  %s5429_s25 = smov [#allocation8]  }
  0x1d   : > { %s324_s27 = sshll.u32 %s7712_s2, 4  ;;  %p5551_p10 = pnand %p4464_p9, %p57_p1  ;;  %s325_s27 = int_to_ptr.hbm [resolvable:$true] %s324_s27 }
  0x1e   : > { %s343_s26 = sshll.u32 %s5429_s25, 4  ;;  %s7716_s6 = sld [smem:[#allocation30_spill]]  ;;  %s344_s26 = int_to_ptr.vmem [resolvable:$true] %s343_s26 }
  0x1f   : > { %4467 = dma.hbm_to_vmem [thread:$0]  (!%p5551_p10), %s325_s27, 2048, %s327_s30, [#allocation6], %s5427_s16, %s5427_s16, %s5428_s22  }
  0x20   : > { %s7717_s8 = sld [smem:[#allocation31_spill]]  ;;  %s5430_s27 = smov [#allocation10]  }
  0x21   : > { %s341_s15 = sshll.u32 %s7715_s4, 4  ;;  %s360_s30 = sshll.u32 %s5430_s27, 4  ;;  %s342_s15 = int_to_ptr.hbm [resolvable:$true] %s341_s15  ;;  %s361_s30 = int_to_ptr.vmem [resolvable:$true] %s360_s30 }
  0x22   : > { %4470 = dma.hbm_to_vmem [thread:$0]  (!%p5551_p10), %s342_s15, 1024, %s344_s26, [#allocation9], %s5427_s16, %s5427_s16, %s5428_s22  }
  0x23   : > { %s5431_s2 = smov [#allocation11]   ;;  %s7695_s25 = smov 256  }
  0x24   : > { %s358_s24 = sshll.u32 %s7716_s6, 4  ;;  %s377_s15 = sshll.u32 %s5431_s2, 4  ;;  %s359_s24 = int_to_ptr.hbm [resolvable:$true] %s358_s24  ;;  %s378_s15 = int_to_ptr.vmem [resolvable:$true] %s377_s15 }
  0x25   : > { %4473 = dma.hbm_to_vmem [thread:$0]  (!%p5551_p10), %s359_s24, 1024, %s361_s30, [#allocation9], %s5427_s16, %s5427_s16, %s5428_s22  }
  0x26   : > { %s375_s4 = sshll.u32 %s7717_s8, 4  ;;  %s7696_s26 = smov 16   ;;  %s376_s4 = int_to_ptr.hbm [resolvable:$true] %s375_s4 }
  0x27   : > { %4476 = dma.hbm_to_vmem [thread:$0]  (!%p5551_p10), %s376_s4, 4096, %s378_s15, [#allocation12], %s7695_s25, %s7695_s25, %s7696_s26  }
  0x28   : > { %s5577_s29 = sadd.s32 1, %s5424_s20   ;;  %s43_s14 = sadd.s32 1, %s5420_s19 }
  0x29   : > { %7718 = sst [smem:[#allocation26_spill]] %s5577_s29  ;;  %s40_s13 = ssub.s32 %s5424_s20, %s5577_s29 }
  0x2a   : > { %p41_p12 = scmp.eq.s32.totalorder %s40_s13, 0  ;;  %p50_p13 = scmp.ne.s32.totalorder %s5420_s19, %s5416_s18 }
  0x2b   : > { %p51_p0 = scmp.eq.s32.totalorder %s5424_s20, 0  ;;  %p4495_p7 = scmp.lt.s32.totalorder %s5424_s20, 2 }
  0x2c   : > { %s5586_s24 = scalar_select %p41_p12, %s5420_s19, %s43_s14  }
  0x2d   : > { %p52_p3 = por %p51_p0, %p50_p13  ;;  %p5590_p5 = por %p274_p2, %p50_p13 }
  0x2e   : > { %7719 = sst [smem:[#allocation27_spill]] %s5586_s24  ;;  %s5596_s12 = sand.u32 1, %s5420_s19  }
  0x2f   : > { %s4089_s4 = sshll.u32 %s5596_s12, 9  ;;  %s4371_s22 = sshll.u32 %s5424_s20, 9 }
  0x30   : > { %s404_s2 = scalar_lea.hbm %s7682_s0, %s4371_s22  ;;  %s398_s15 = scalar_lea.vmem [#allocation2], %s4089_s4 }
  0x31   : > { %s407_s13 = sshll.u32 %s398_s15, 4  ;;  %s405_s14 = sshll.u32 %s404_s2, 4  ;;  %s408_s13 = int_to_ptr.vmem [resolvable:$true] %s407_s13  ;;  %s406_s14 = int_to_ptr.hbm [resolvable:$true] %s405_s14 }
  0x32   : > { %p5603_p2 = pnand %p4495_p7, %p52_p3  ;;  %s417_s26 = sand.u32 1, %s5424_s20  }
  0x33   : > { %s4093_s6 = sshll.u32 %s5596_s12, 8  ;;  %s395_s8 = scalar_lea.sflag [#allocation3], %s5596_s12 }
  0x34   : > { %s5250_s24 = sshra.s32 %s406_s14, 4  ;;  %p5254_p10 = pneg %p5603_p2  ;;  %s5251_s24 = int_to_ptr.hbm [resolvable:$true] %s5250_s24 }
  0x35   : > { %s5252_s19 = scalar_lea.hbm %s5251_s24, 512  ;;  %s5257_s27 = scalar_lea.hbm %s7682_s0, 1024 }
  0x36   : > { %p5253_p9 = scmp.ne.s32.totalorder %s5251_s24, %s5252_s19  ;;  %p5258_p0 = scmp.lt.s32.totalorder %s5251_s24, %s7682_s0 }
  0x37   : > { %p5259_p3 = scmp.lt.s32.totalorder %s5257_s27, %s5252_s19 }
  0x38   : > { %p5255_p12 = pnand %p5254_p10, %p5253_p9 }
  0x39   : > { %p5260_p7 = por %p5259_p3, %p5258_p0 }
  0x3a   : > { %p5256_p13 = pneg %p5255_p12 }
  0x3c   : > { %p5261_p11 = pnand %p5260_p7, %p5256_p13 }
  0x3e   : > { %5264 = shalt.err (!%p5261_p11)
}
  0x3f   : > { %s7722_s12 = smov 16   ;;  %s7723_s15 = smov 256  }
  0x40   : > { %4480 = dma.hbm_to_vmem [thread:$0]  (!%p5603_p2), %s406_s14, 8192, %s408_s13, %s395_s8, %s7723_s15, %s7723_s15, %s7722_s12  }
  0x41   : > { %s4372_s29 = sshll.u32 %s5424_s20, 8  ;;  %s421_s10 = scalar_lea.vmem [#allocation5], %s4093_s6 }
  0x42   : > { %s426_s22 = scalar_lea.hbm %s7683_s1, %s4372_s29  ;;  %s429_s30 = sshll.u32 %s421_s10, 4  ;;  %s430_s30 = int_to_ptr.vmem [resolvable:$true] %s429_s30 }
  0x43   : > { %s427_s24 = sshll.u32 %s426_s22, 4  ;;  %s418_s19 = scalar_lea.sflag [#allocation6], %s417_s26  ;;  %s428_s24 = int_to_ptr.hbm [resolvable:$true] %s427_s24 }
  0x44   : > { %s5280_s27 = sshra.s32 %s428_s24, 4  ;;  %s5287_s14 = scalar_lea.hbm %s7683_s1, 512  ;;  %s5281_s27 = int_to_ptr.hbm [resolvable:$true] %s5280_s27 }
  0x45   : > { %s5282_s2 = scalar_lea.hbm %s5281_s27, 256  ;;  %p5288_p13 = scmp.lt.s32.totalorder %s5281_s27, %s7683_s1 }
  0x46   : > { %p5283_p11 = scmp.ne.s32.totalorder %s5281_s27, %s5282_s2  ;;  %p5289_p0 = scmp.lt.s32.totalorder %s5287_s14, %s5282_s2 }
  0x48   : > { %p5285_p9 = pnand %p5283_p11, %p5254_p10  ;;  %p5290_p3 = por %p5289_p0, %p5288_p13 }
  0x4a   : > { %p5286_p12 = pneg %p5285_p9 }
  0x4c   : > { %p5291_p7 = pnand %p5290_p3, %p5286_p12 }
  0x4e   : > { %5294 = shalt.err (!%p5291_p7)
}
  0x4f   : > { %s5434_s6 = smov 128   ;;  %s5435_s10 = smov 8  }
  0x50   : > { %4483 = dma.hbm_to_vmem [thread:$0]  (!%p5603_p2), %s428_s24, 4096, %s430_s30, %s418_s19, %s5434_s6, %s5434_s6, %s5435_s10  }
  0x51   : > { %441 = sbr.rel (%p5543_p8) target bundleno = 1098 (0x44a), region = 60  ;;  %s5644_s26 = sand.u32 (!%p5543_p8), 1, %s5416_s18  }
  0x52   : > { %s4097_s12 = sshll.u32 (!%p5543_p8), %s5644_s26, 9  ;;  %s444_s15 = scalar_lea.sflag (!%p5543_p8), [#allocation3], %s5644_s26 }
  0x53   : > { %s5648_s4 = scalar_lea.vmem (!%p5543_p8), [#allocation2], %s4097_s12 }
  0x56   : > { %5383 = dma.done.wait (%p5530_p4), %s444_s15, 8192  }
  0x57   : > { %5385 = vsyncadd (%p5530_p4), %s444_s15, 4294959104  ;;  %s453_s28 = sand.u32 1, %s5521_s21   ;;  %s4098_s25 = sshll.u32 %s5644_s26, 8 }
  0x58   : > { %s454_s22 = scalar_lea.sflag [#allocation6], %s453_s28  ;;  %s5658_s30 = scalar_lea.vmem [#allocation5], %s4098_s25 }
  0x59   : > { %5387 = dma.done.wait (%p5530_p4), %s454_s22, 4096  }
  0x5a   : > { %5389 = vsyncadd (%p5530_p4), %s454_s22, 4294963200 }
  0x5b   : > { %5391 = dma.done.wait (%p57_p1), [#allocation6], 2048  }
  0x5c   : > { %5393 = vsyncadd (%p57_p1), [#allocation6], 4294965248 }
  0x5d   : > { %5395 = dma.done.wait (%p57_p1), [#allocation9], 2048  }
  0x5e   : > { %5397 = vsyncadd (%p57_p1), [#allocation9], 4294965248 }
  0x5f   : > { %5399 = dma.done.wait (%p57_p1), [#allocation12], 4096  }
  0x60   : > { %5401 = vsyncadd (%p57_p1), [#allocation12], 4294963200  ;;  %v4380_v0 = vld [vmem:[#allocation7 + $0x38] sm:$0xff]  ;;  %v4379_v2 = vld [vmem:[#allocation7 + $0x30] sm:$0xff]  ;;  %s6543_s13 = scalar_lea.vmem [#allocation14], %s4098_s25  ;;  %s4103_s22 = sshll.u32 %s5644_s26, 10 }
  0x61   : > { %v4388_v1 = vld [vmem:[#allocation7 + $0x78] sm:$0xff]  ;;  %1335 = vmatpush.bf16.msra.mxu0 %v4380_v0  ;;  %v4387_v3 = vld [vmem:[#allocation7 + $0x70] sm:$0xff]  ;;  %v531_v4 = vld [vmem:[%s5648_s4] sm:$0xff]  ;;  %s4439_s23 = sshll.u32 %s5521_s21, 8  ;;  %s3912_s2 = sshll.u32 %s6543_s13, 4  ;;  %s7572_s2 = int_to_ptr.vmem [resolvable:$true] %s3912_s2 }
  0x62   : > { %1424 = vmatpush.bf16.msra.mxu1 %v4388_v1  ;;  %v533_v5 = vld [vmem:[%s5648_s4 + $0x10] sm:$0xff]  ;;  %v4378_v6 = vld [vmem:[#allocation7 + $0x28] sm:$0xff]  ;;  %v595_v8 = vadd.f32 1.0, %v531_v4  ;;  %v534_v11 = vld [vmem:[%s5648_s4 + $0x18] sm:$0xff]  ;;  %v598_v16 = vmul.f32 -0.5, %v531_v4  ;;  %s3911_s27 = scalar_lea.hbm %s7693_s11, %s4439_s23  ;;  %s5330_s10 = scalar_lea.hbm %s7693_s11, 512 }
  0x63   : > { %v4386_v7 = vld [vmem:[#allocation7 + $0x68] sm:$0xff]  ;;  %v613_v10 = vadd.f32 1.0, %v533_v5  ;;  %v4377_v13 = vld [vmem:[#allocation7 + $0x20] sm:$0xff]  ;;  %v622_v15 = vadd.f32 1.0, %v534_v11  ;;  %v616_v17 = vmul.f32 -0.5, %v533_v5  ;;  %v4376_v19 = vld [vmem:[#allocation7 + $0x18] sm:$0xff] }
  0x64   : > { %v532_v9 = vld [vmem:[%s5648_s4 + $0x8] sm:$0xff]  ;;  %v4385_v14 = vld [vmem:[#allocation7 + $0x60] sm:$0xff]  ;;  %4550 = vlog2.f32 %v595_v8  ;;  %v4384_v20 = vld [vmem:[#allocation7 + $0x58] sm:$0xff]  ;;  %v625_v21 = vmul.f32 -0.5, %v534_v11  ;;  %v599_v23 = vadd.f32 1.0, %v598_v16  ;;  %s3914_s8 = sshll.u32 %s3911_s27, 4  ;;  %s3915_s8 = int_to_ptr.hbm [resolvable:$true] %s3914_s8 }
  0x65   : > { %1336 = vmatpush.bf16.msra.mxu0 %v4379_v2  ;;  %v604_v12 = vadd.f32 1.0, %v532_v9  ;;  %4552 = vlog2.f32 %v613_v10  ;;  %v607_v18 = vmul.f32 -0.5, %v532_v9  ;;  %v601_v24 = vand.u32 2147483647, %v531_v4  ;;  %v4375_v30 = vld [vmem:[#allocation7 + $0x10] sm:$0xff]  ;;  %v5681_v33 = vld [vmem:[%s5648_s4 + $0x20] sm:$0xff] }
  0x66   : > { %1425 = vmatpush.bf16.msra.mxu1 %v4387_v3  ;;  %v619_v25 = vand.u32 2147483647, %v533_v5  ;;  %v617_v27 = vadd.f32 1.0, %v616_v17  ;;  %v4383_v31 = vld [vmem:[#allocation7 + $0x50] sm:$0xff]  ;;  %v626_v32 = vadd.f32 1.0, %v625_v21  ;;  %v4374_v37 = vld [vmem:[#allocation7 + $0x8] sm:$0xff]  ;;  %v600_v38 = vmul.f32 %v599_v23, %v531_v4 }
  0x67   : > { %4554 = vlog2.f32 %v604_v12  ;;  %v608_v28 = vadd.f32 1.0, %v607_v18  ;;  %v610_v35 = vand.u32 2147483647, %v532_v9  ;;  %v628_v36 = vand.u32 2147483647, %v534_v11  ;;  %v537_v41 = vld [vmem:[%s5648_s4 + $0x30] sm:$0xff] }
  0x68   : > { %4556 = vlog2.f32 %v622_v15  ;;  %vm5683_vm0 = vcmp.lt.f32.partialorder %v601_v24, 0.0004427343  ;;  %vm5687_vm1 = vcmp.lt.f32.partialorder %v619_v25, 0.0004427343  ;;  %v4382_v42 = vld [vmem:[#allocation7 + $0x48] sm:$0xff]  ;;  %v618_v44 = vmul.f32 %v617_v27, %v533_v5  ;;  %v538_v48 = vld [vmem:[%s5648_s4 + $0x38] sm:$0xff] }
  0x69   : > { %1337 = vmatpush.bf16.msra.mxu0 %v4378_v6  ;;  %v609_v45 = vmul.f32 %v608_v28, %v532_v9  ;;  %v631_v46 = vadd.f32 1.0, %v5681_v33  ;;  %v536_v47 = vld [vmem:[%s5648_s4 + $0x28] sm:$0xff]  ;;  %v627_v52 = vmul.f32 %v626_v32, %v534_v11  ;;  %vm5695_vm2 = vcmp.lt.f32.partialorder %v610_v35, 0.0004427343  ;;  %v4373_v59 = vld [vmem:[#allocation7] sm:$0xff]  ;;  %v542_v28 = vld [vmem:[%s5648_s4 + $0x58] sm:$0xff] }
  0x6a   : > { %1426 = vmatpush.bf16.msra.mxu1 %v4386_v7  ;;  %v4551_v22 = vpop.eup %4550  ;;  %vm5699_vm3 = vcmp.lt.f32.partialorder %v628_v36, 0.0004427343  ;;  %v649_v55 = vadd.f32 1.0, %v537_v41  ;;  %v640_v56 = vadd.f32 1.0, %v536_v47  ;;  %v658_v58 = vadd.f32 1.0, %v538_v48  ;;  %v4381_v60 = vld [vmem:[#allocation7 + $0x40] sm:$0xff] }
  0x6b   : > { %v4553_v26 = vpop.eup %4552  ;;  %v597_v43 = vmul.f32 0.6931472, %v4551_v22  ;;  %4558 = vlog2.f32 %v631_v46  ;;  %v634_v0 = vmul.f32 -0.5, %v5681_v33  ;;  %v652_v1 = vmul.f32 -0.5, %v537_v41  ;;  %v539_v15 = vld [vmem:[%s5648_s4 + $0x40] sm:$0xff]  ;;  %v541_v22 = vld [vmem:[%s5648_s4 + $0x50] sm:$0xff] }
  0x6c   : > { %v615_v49 = vmul.f32 0.6931472, %v4553_v26  ;;  %4560 = vlog2.f32 %v649_v55  ;;  %v643_v4 = vmul.f32 -0.5, %v536_v47  ;;  %v661_v5 = vmul.f32 -0.5, %v538_v48  ;;  %v540_v27 = vld [vmem:[%s5648_s4 + $0x48] sm:$0xff]  ;;  %s5324_s14 = sshra.s32 %s3915_s8, 4  ;;  %s5325_s14 = int_to_ptr.hbm [resolvable:$true] %s5324_s14 }
  0x6d   : > { %1338 = vmatpush.bf16.msra.mxu0 %v4377_v13  ;;  %v4555_v29 = vpop.eup %4554  ;;  %v603_v57 = vsel %vm5683_vm0, %v600_v38, %v597_v43  ;;  %4562 = vlog2.f32 %v640_v56  ;;  %v635_v7 = vadd.f32 1.0, %v634_v0  ;;  %v637_v8 = vand.u32 2147483647, %v5681_v33  ;;  %s5326_s17 = scalar_lea.hbm %s5325_s14, 256  ;;  %p5331_p2 = scmp.lt.s32.totalorder %s5325_s14, %s7693_s11 }
  0x6e   : > { %1427 = vmatpush.bf16.msra.mxu1 %v4385_v14  ;;  %v4557_v34 = vpop.eup %4556  ;;  %v606_v50 = vmul.f32 0.6931472, %v4555_v29  ;;  %v621_v61 = vsel %vm5687_vm1, %v618_v44, %v615_v49  ;;  %4564 = vlog2.f32 %v658_v58  ;;  %v655_v9 = vand.u32 2147483647, %v537_v41  ;;  %v543_v58 = vld [vmem:[%s5648_s4 + $0x60] sm:$0xff]  ;;  %p5327_p1 = scmp.ne.s32.totalorder %s5325_s14, %s5326_s17  ;;  %p5332_p10 = scmp.lt.s32.totalorder %s5330_s10, %s5326_s17 }
  0x6f   : > { %v624_v51 = vmul.f32 0.6931472, %v4557_v34  ;;  %v1171_v2 = vpack.c.bf16 %v621_v61, %v603_v57  ;;  %v653_v11 = vadd.f32 1.0, %v652_v1  ;;  %v644_v12 = vadd.f32 1.0, %v643_v4 }
  0x70   : > { %v612_v62 = vsel %vm5695_vm2, %v609_v45, %v606_v50  ;;  %v662_v14 = vadd.f32 1.0, %v661_v5  ;;  %v646_v17 = vand.u32 2147483647, %v536_v47  ;;  %v664_v18 = vand.u32 2147483647, %v538_v48  ;;  %p5328_p4 = pnand %p5327_p1, %p5590_p5  ;;  %p5333_p11 = por %p5332_p10, %p5331_p2 }
  0x71   : > { %1339 = vmatpush.bf16.msra.mxu0 %v4376_v19  ;;  %v630_v63 = vsel %vm5699_vm3, %v627_v52, %v624_v51  ;;  %v4559_v6 = vpop.eup %4558  ;;  %v636_v19 = vmul.f32 %v635_v7, %v5681_v33  ;;  %vm5715_vm4 = vcmp.lt.f32.partialorder %v637_v8, 0.0004427343  ;;  %vm5719_vm5 = vcmp.lt.f32.partialorder %v655_v9, 0.0004427343  ;;  %v546_v8 = vld [vmem:[%s5648_s4 + $0x78] sm:$0xff] }
  0x72   : > { %1428 = vmatpush.bf16.msra.mxu1 %v4384_v20  ;;  %v1172_v3 = vpack.c.bf16 %v630_v63, %v612_v62  ;;  %v4561_v10 = vpop.eup %4560  ;;  %v633_v23 = vmul.f32 0.6931472, %v4559_v6  ;;  %v654_v24 = vmul.f32 %v653_v11, %v537_v41  ;;  %v645_v25 = vmul.f32 %v644_v12, %v536_v47  ;;  %v545_v62 = vld [vmem:[%s5648_s4 + $0x70] sm:$0xff]  ;;  %p5329_p8 = pneg %p5328_p4 }
  0x73   : > { %v4563_v13 = vpop.eup %4562  ;;  %v667_v26 = vadd.f32 1.0, %v539_v15  ;;  %v651_v29 = vmul.f32 0.6931472, %v4561_v10  ;;  %v663_v32 = vmul.f32 %v662_v14, %v538_v48  ;;  %vm647_vm6 = vcmp.lt.f32.partialorder %v646_v17, 0.0004427343 }
  0x74   : > { %v4565_v16 = vpop.eup %4564  ;;  %vm665_vm7 = vcmp.lt.f32.partialorder %v664_v18, 0.0004427343  ;;  %v685_v33 = vadd.f32 1.0, %v541_v22  ;;  %v676_v34 = vadd.f32 1.0, %v540_v27  ;;  %v639_v35 = vsel %vm5715_vm4, %v636_v19, %v633_v23  ;;  %p5334_p9 = pnand %p5333_p11, %p5329_p8 }
  0x75   : > { %1340 = vmatpush.bf16.msra.mxu0 %v4375_v30  ;;  %v642_v30 = vmul.f32 0.6931472, %v4563_v13  ;;  %v694_v36 = vadd.f32 1.0, %v542_v28  ;;  %4566 = vlog2.f32 %v667_v26  ;;  %v670_v40 = vmul.f32 -0.5, %v539_v15 }
  0x76   : > { %1429 = vmatpush.bf16.msra.mxu1 %v4383_v31  ;;  %v660_v31 = vmul.f32 0.6931472, %v4565_v16  ;;  %4568 = vlog2.f32 %v685_v33  ;;  %v688_v41 = vmul.f32 -0.5, %v541_v22  ;;  %v679_v44 = vmul.f32 -0.5, %v540_v27 }
  0x77   : > { %v648_v38 = vsel %vm647_vm6, %v645_v25, %v642_v30  ;;  %4570 = vlog2.f32 %v676_v34  ;;  %v697_v45 = vmul.f32 -0.5, %v542_v28  ;;  %v671_v47 = vadd.f32 1.0, %v670_v40  ;;  %v547_v34 = vld [vmem:[%s5648_s4 + $0x80] sm:$0xff] }
  0x78   : > { %v666_v39 = vsel %vm665_vm7, %v663_v32, %v660_v31  ;;  %4572 = vlog2.f32 %v694_v36  ;;  %v673_v48 = vand.u32 2147483647, %v539_v15  ;;  %v691_v49 = vand.u32 2147483647, %v541_v22 }
  0x79   : > { %1341 = vmatpush.bf16.msra.mxu0 %v4374_v37  ;;  %v657_v37 = vsel %vm5719_vm5, %v654_v24, %v651_v29  ;;  %v1174_v43 = vpack.c.bf16 %v666_v39, %v648_v38  ;;  %v689_v51 = vadd.f32 1.0, %v688_v41  ;;  %v680_v52 = vadd.f32 1.0, %v679_v44  ;;  %v549_v38 = vld [vmem:[%s5648_s4 + $0x90] sm:$0xff] }
  0x7a   : > { %1430 = vmatpush.bf16.msra.mxu1 %v4382_v42  ;;  %v1173_v42 = vpack.c.bf16 %v657_v37, %v639_v35  ;;  %v698_v54 = vadd.f32 1.0, %v697_v45  ;;  %v682_v56 = vand.u32 2147483647, %v540_v27  ;;  %v700_v57 = vand.u32 2147483647, %v542_v28 }
  0x7b   : > { %v4567_v46 = vpop.eup %4566  ;;  %vm5731_vm8 = vcmp.lt.f32.partialorder %v673_v48, 0.0004427343  ;;  %vm5735_vm9 = vcmp.lt.f32.partialorder %v691_v49, 0.0004427343  ;;  %v690_v1 = vmul.f32 %v689_v51, %v541_v22  ;;  %v703_v7 = vadd.f32 1.0, %v543_v58  ;;  %v550_v48 = vld [vmem:[%s5648_s4 + $0x98] sm:$0xff] }
  0x7c   : > { %v4569_v50 = vpop.eup %4568  ;;  %v669_v63 = vmul.f32 0.6931472, %v4567_v46  ;;  %v699_v6 = vmul.f32 %v698_v54, %v542_v28  ;;  %vm683_vm10 = vcmp.lt.f32.partialorder %v682_v56, 0.0004427343  ;;  %vm701_vm11 = vcmp.lt.f32.partialorder %v700_v57, 0.0004427343 }
  0x7d   : > { %1342 = vmatpush.bf16.msra.mxu0 %v4373_v59  ;;  %v4571_v53 = vpop.eup %4570  ;;  %v672_v59 = vmul.f32 %v671_v47, %v539_v15  ;;  %v687_v0 = vmul.f32 0.6931472, %v4569_v50  ;;  %v721_v9 = vadd.f32 1.0, %v545_v62  ;;  %v730_v12 = vadd.f32 1.0, %v546_v8 }
  0x7e   : > { %1431 = vmatpush.bf16.msra.mxu1 %v4381_v60  ;;  %v4573_v55 = vpop.eup %4572  ;;  %v678_v4 = vmul.f32 0.6931472, %v4571_v53  ;;  %4574 = vlog2.f32 %v703_v7  ;;  %v706_v16 = vmul.f32 -0.5, %v543_v58  ;;  %v724_v17 = vmul.f32 -0.5, %v545_v62 }
  0x7f   : > { %v696_v5 = vmul.f32 0.6931472, %v4573_v55  ;;  %v675_v11 = vsel %vm5731_vm8, %v672_v59, %v669_v63  ;;  %v693_v13 = vsel %vm5735_vm9, %v690_v1, %v687_v0  ;;  %4576 = vlog2.f32 %v721_v9 }
  0x80   : > { %1343 = vmatmul.bf16.vlgmr.msra.gmra.mxu0 %v1171_v2  ;;  %v681_v2 = vmul.f32 %v680_v52, %v540_v27  ;;  %v1175_v18 = vpack.c.bf16 %v693_v13, %v675_v11  ;;  %v733_v21 = vmul.f32 -0.5, %v546_v8  ;;  %v707_v23 = vadd.f32 1.0, %v706_v16 }
  0x81   : > { %1432 = vmatmul.bf16.vlgmr.msra.gmra.mxu1 %v1172_v3  ;;  %v544_v3 = vld [vmem:[%s5648_s4 + $0x68] sm:$0xff]  ;;  %v702_v15 = vsel %vm701_vm11, %v699_v6, %v696_v5  ;;  %v709_v24 = vand.u32 2147483647, %v543_v58  ;;  %v727_v25 = vand.u32 2147483647, %v545_v62  ;;  %v725_v27 = vadd.f32 1.0, %v724_v17 }
  0x82   : > { %v712_v10 = vadd.f32 1.0, %v544_v3  ;;  %v684_v14 = vsel %vm683_vm10, %v681_v2, %v678_v4  ;;  %v715_v20 = vmul.f32 -0.5, %v544_v3  ;;  %v734_v30 = vadd.f32 1.0, %v733_v21 }
  0x83   : > { %v1176_v19 = vpack.c.bf16 %v702_v15, %v684_v14  ;;  %v718_v32 = vand.u32 2147483647, %v544_v3  ;;  %v736_v33 = vand.u32 2147483647, %v546_v8  ;;  %v708_v35 = vmul.f32 %v707_v23, %v543_v58  ;;  %v553_v14 = vld [vmem:[%s5648_s4 + $0xb0] sm:$0xff] }
  0x84   : > { %4578 = vlog2.f32 %v712_v10  ;;  %v4575_v22 = vpop.eup %4574  ;;  %v716_v28 = vadd.f32 1.0, %v715_v20  ;;  %vm5747_vm12 = vcmp.lt.f32.partialorder %v709_v24, 0.0004427343  ;;  %vm5751_vm13 = vcmp.lt.f32.partialorder %v727_v25, 0.0004427343  ;;  %v551_v10 = vld [vmem:[%s5648_s4 + $0xa0] sm:$0xff] }
  0x85   : > { %4580 = vlog2.f32 %v730_v12  ;;  %v4577_v26 = vpop.eup %4576  ;;  %v705_v39 = vmul.f32 0.6931472, %v4575_v22  ;;  %v726_v41 = vmul.f32 %v725_v27, %v545_v62  ;;  %v735_v46 = vmul.f32 %v734_v30, %v546_v8  ;;  %v554_v24 = vld [vmem:[%s5648_s4 + $0xb8] sm:$0xff] }
  0x86   : > { %v723_v40 = vmul.f32 0.6931472, %v4577_v26  ;;  %v739_v47 = vadd.f32 1.0, %v547_v34  ;;  %vm719_vm14 = vcmp.lt.f32.partialorder %v718_v32, 0.0004427343  ;;  %v757_v49 = vadd.f32 1.0, %v549_v38 }
  0x87   : > { %vm737_vm15 = vcmp.lt.f32.partialorder %v736_v33, 0.0004427343  ;;  %v711_v51 = vsel %vm5747_vm12, %v708_v35, %v705_v39  ;;  %v766_v53 = vadd.f32 1.0, %v550_v48  ;;  %v742_v57 = vmul.f32 -0.5, %v547_v34 }
  0x88   : > { %v729_v52 = vsel %vm5751_vm13, %v726_v41, %v723_v40  ;;  %4582 = vlog2.f32 %v739_v47  ;;  %v760_v59 = vmul.f32 -0.5, %v549_v38  ;;  %v769_v61 = vmul.f32 -0.5, %v550_v48 }
  0x89   : > { %4584 = vlog2.f32 %v757_v49  ;;  %v1177_v56 = vpack.c.bf16 %v729_v52, %v711_v51  ;;  %v743_v63 = vadd.f32 1.0, %v742_v57  ;;  %v745_v0 = vand.u32 2147483647, %v547_v34 }
  0x8a   : > { %v4579_v29 = vpop.eup %4578  ;;  %v763_v1 = vand.u32 2147483647, %v549_v38  ;;  %v770_v6 = vadd.f32 1.0, %v769_v61  ;;  %v772_v9 = vand.u32 2147483647, %v550_v48  ;;  %v775_v23 = vadd.f32 1.0, %v551_v10 }
  0x8b   : > { %v4581_v31 = vpop.eup %4580  ;;  %v714_v44 = vmul.f32 0.6931472, %v4579_v29  ;;  %v744_v11 = vmul.f32 %v743_v63, %v547_v34  ;;  %vm5763_vm0 = vcmp.lt.f32.partialorder %v745_v0, 0.0004427343  ;;  %v793_v25 = vadd.f32 1.0, %v553_v14  ;;  %v558_v0 = vld [vmem:[%s5648_s4 + $0xd8] sm:$0xff] }
  0x8c   : > { %v732_v45 = vmul.f32 0.6931472, %v4581_v31  ;;  %vm5767_vm1 = vcmp.lt.f32.partialorder %v763_v1, 0.0004427343  ;;  %v771_v22 = vmul.f32 %v770_v6, %v550_v48  ;;  %vm773_vm3 = vcmp.lt.f32.partialorder %v772_v9, 0.0004427343 }
  0x8d   : > { %v802_v29 = vadd.f32 1.0, %v554_v24  ;;  %v778_v33 = vmul.f32 -0.5, %v551_v10  ;;  %v796_v35 = vmul.f32 -0.5, %v553_v14  ;;  %v805_v37 = vmul.f32 -0.5, %v554_v24 }
  0x8e   : > { %v738_v55 = vsel %vm737_vm15, %v735_v46, %v732_v45  ;;  %v4583_v62 = vpop.eup %4582  ;;  %v781_v40 = vand.u32 2147483647, %v551_v10  ;;  %v799_v41 = vand.u32 2147483647, %v553_v14  ;;  %v808_v49 = vand.u32 2147483647, %v554_v24 }
  0x8f   : > { %v4585_v2 = vpop.eup %4584  ;;  %v741_v15 = vmul.f32 0.6931472, %v4583_v62  ;;  %v779_v39 = vadd.f32 1.0, %v778_v33  ;;  %v806_v46 = vadd.f32 1.0, %v805_v37  ;;  %v841_v13 = vmul.f32 -0.5, %v558_v0 }
  0x90   : > { %1348 = vmatmul.bf16.gmra.mxu0 %v1173_v42  ;;  %v717_v42 = vmul.f32 %v716_v28, %v544_v3  ;;  %v761_v3 = vadd.f32 1.0, %v760_v59  ;;  %v759_v16 = vmul.f32 0.6931472, %v4585_v2  ;;  %vm5779_vm4 = vcmp.lt.f32.partialorder %v781_v40, 0.0004427343  ;;  %v556_v59 = vld [vmem:[%s5648_s4 + $0xc8] sm:$0xff] }
  0x91   : > { %1437 = vmatmul.bf16.gmra.mxu1 %v1174_v43  ;;  %v548_v43 = vld [vmem:[%s5648_s4 + $0x88] sm:$0xff]  ;;  %v747_v27 = vsel %vm5763_vm0, %v744_v11, %v741_v15  ;;  %v780_v51 = vmul.f32 %v779_v39, %v551_v10  ;;  %vm5783_vm5 = vcmp.lt.f32.partialorder %v799_v41, 0.0004427343  ;;  %v807_v62 = vmul.f32 %v806_v46, %v554_v24  ;;  %v562_v40 = vld [vmem:[%s5648_s4 + $0xf8] sm:$0xff] }
  0x92   : > { %v748_v50 = vadd.f32 1.0, %v548_v43  ;;  %v720_v54 = vsel %vm719_vm14, %v717_v42, %v714_v44  ;;  %v751_v60 = vmul.f32 -0.5, %v548_v43  ;;  %v754_v8 = vand.u32 2147483647, %v548_v43 }
  0x93   : > { %v1178_v58 = vpack.c.bf16 %v738_v55, %v720_v54  ;;  %v762_v17 = vmul.f32 %v761_v3, %v549_v38  ;;  %v557_v54 = vld [vmem:[%s5648_s4 + $0xd0] sm:$0xff]  ;;  %vm809_vm7 = vcmp.lt.f32.partialorder %v808_v49, 0.0004427343  ;;  %v820_v2 = vadd.f32 1.0, %v556_v59 }
  0x94   : > { %4586 = vlog2.f32 %v748_v50  ;;  %v752_v4 = vadd.f32 1.0, %v751_v60  ;;  %vm755_vm2 = vcmp.lt.f32.partialorder %v754_v8, 0.0004427343  ;;  %v555_v50 = vld [vmem:[%s5648_s4 + $0xc0] sm:$0xff]  ;;  %v829_v1 = vadd.f32 1.0, %v557_v54 }
  0x95   : > { %4588 = vlog2.f32 %v766_v53  ;;  %v765_v28 = vsel %vm5767_vm1, %v762_v17, %v759_v16  ;;  %v811_v63 = vadd.f32 1.0, %v555_v50  ;;  %v814_v9 = vmul.f32 -0.5, %v555_v50 }
  0x96   : > { %4590 = vlog2.f32 %v775_v23  ;;  %v1179_v32 = vpack.c.bf16 %v765_v28, %v747_v27  ;;  %v832_v11 = vmul.f32 -0.5, %v557_v54  ;;  %v823_v12 = vmul.f32 -0.5, %v556_v59 }
  0x97   : > { %4592 = vlog2.f32 %v793_v25  ;;  %v815_v15 = vadd.f32 1.0, %v814_v9  ;;  %v817_v16 = vand.u32 2147483647, %v555_v50  ;;  %v835_v17 = vand.u32 2147483647, %v557_v54 }
  0x98   : > { %v826_v24 = vand.u32 2147483647, %v556_v59  ;;  %v844_v25 = vand.u32 2147483647, %v558_v0  ;;  %v877_v53 = vmul.f32 -0.5, %v562_v40 }
  0x99   : > { %v816_v27 = vmul.f32 %v815_v15, %v555_v50  ;;  %vm5795_vm8 = vcmp.lt.f32.partialorder %v817_v16, 0.0004427343  ;;  %vm5799_vm9 = vcmp.lt.f32.partialorder %v835_v17, 0.0004427343  ;;  %v880_v9 = vand.u32 2147483647, %v562_v40 }
  0x9a   : > { %v4587_v5 = vpop.eup %4586  ;;  %vm827_vm10 = vcmp.lt.f32.partialorder %v826_v24, 0.0004427343  ;;  %vm845_vm11 = vcmp.lt.f32.partialorder %v844_v25, 0.0004427343  ;;  %v4396_v24 = vld [vmem:[#allocation8 + $0x38] sm:$0xff] }
  0x9b   : > { %v4589_v7 = vpop.eup %4588  ;;  %v750_v20 = vmul.f32 0.6931472, %v4587_v5  ;;  %v838_v5 = vadd.f32 1.0, %v558_v0  ;;  %vm5838_vm15 = vcmp.lt.f32.partialorder %v880_v9, 0.0004427343  ;;  %2077 = vmatpush.bf16.msra.mxu2 %v4396_v24 }
  0x9c   : > { %v768_v21 = vmul.f32 0.6931472, %v4589_v7  ;;  %v4591_v38 = vpop.eup %4590 }
  0x9d   : > { %v4593_v42 = vpop.eup %4592  ;;  %v777_v55 = vmul.f32 0.6931472, %v4591_v38 }
  0x9e   : > { %v774_v31 = vsel %vm773_vm3, %v771_v22, %v768_v21  ;;  %v842_v22 = vadd.f32 1.0, %v841_v13 }
  0x9f   : > { %v783_v3 = vsel %vm5779_vm4, %v780_v51, %v777_v55  ;;  %v5811_v55 = vld [vmem:[%s5648_s4 + $0x100] sm:$0xff] }
  0xa0   : > { %1353 = vmatmul.bf16.gmra.mxu0 %v1175_v18  ;;  %v753_v18 = vmul.f32 %v752_v4, %v548_v43  ;;  %v797_v43 = vadd.f32 1.0, %v796_v35  ;;  %v560_v35 = vld [vmem:[%s5648_s4 + $0xe8] sm:$0xff]  ;;  %v843_v38 = vmul.f32 %v842_v22, %v558_v0  ;;  %v878_v0 = vadd.f32 1.0, %v877_v53 }
  0xa1   : > { %1442 = vmatmul.bf16.gmra.mxu1 %v1176_v19  ;;  %v552_v19 = vld [vmem:[%s5648_s4 + $0xa8] sm:$0xff]  ;;  %v859_v52 = vmul.f32 -0.5, %v560_v35  ;;  %v886_v22 = vmul.f32 -0.5, %v5811_v55 }
  0xa2   : > { %v784_v26 = vadd.f32 1.0, %v552_v19  ;;  %v756_v30 = vsel %vm755_vm2, %v753_v18, %v750_v20  ;;  %v787_v36 = vmul.f32 -0.5, %v552_v19  ;;  %v790_v48 = vand.u32 2147483647, %v552_v19 }
  0xa3   : > { %v1180_v34 = vpack.c.bf16 %v774_v31, %v756_v30  ;;  %v798_v57 = vmul.f32 %v797_v43, %v553_v14  ;;  %v824_v20 = vadd.f32 1.0, %v823_v12  ;;  %v561_v30 = vld [vmem:[%s5648_s4 + $0xf0] sm:$0xff]  ;;  %v879_v17 = vmul.f32 %v878_v0, %v562_v40 }
  0xa4   : > { %4594 = vlog2.f32 %v784_v26  ;;  %v788_v44 = vadd.f32 1.0, %v787_v36  ;;  %vm791_vm6 = vcmp.lt.f32.partialorder %v790_v48, 0.0004427343  ;;  %v559_v26 = vld [vmem:[%s5648_s4 + $0xe0] sm:$0xff]  ;;  %v865_v41 = vadd.f32 1.0, %v561_v30 }
  0xa5   : > { %4596 = vlog2.f32 %v802_v29  ;;  %v847_v39 = vadd.f32 1.0, %v559_v26  ;;  %v850_v49 = vmul.f32 -0.5, %v559_v26  ;;  %v868_v50 = vmul.f32 -0.5, %v561_v30 }
  0xa6   : > { %4598 = vlog2.f32 %v811_v63  ;;  %v860_v63 = vadd.f32 1.0, %v859_v52 }
  0xa7   : > { %4600 = vlog2.f32 %v829_v1  ;;  %v883_v1 = vadd.f32 1.0, %v5811_v55 }
  0xa8   : > { %4602 = vlog2.f32 %v820_v2  ;;  %v5821_v2 = vld [vmem:[%s5648_s4 + $0x118] sm:$0xff]  ;;  %v861_v16 = vmul.f32 %v860_v63, %v560_v35 }
  0xa9   : > { %4604 = vlog2.f32 %v838_v5  ;;  %v862_v5 = vand.u32 2147483647, %v560_v35 }
  0xaa   : > { %v4595_v45 = vpop.eup %4594  ;;  %4606 = vlog2.f32 %v847_v39 }
  0xab   : > { %v4597_v47 = vpop.eup %4596  ;;  %v786_v60 = vmul.f32 0.6931472, %v4595_v45  ;;  %v874_v45 = vadd.f32 1.0, %v562_v40  ;;  %4608 = vlog2.f32 %v865_v41  ;;  %vm5834_vm14 = vcmp.lt.f32.partialorder %v862_v5, 0.0004427343  ;;  %v5895_v5 = vld [vmem:[%s5648_s4 + $0x140] sm:$0xff] }
  0xac   : > { %v804_v61 = vmul.f32 0.6931472, %v4597_v47  ;;  %v4599_v14 = vpop.eup %4598 }
  0xad   : > { %v4601_v18 = vpop.eup %4600  ;;  %v813_v31 = vmul.f32 0.6931472, %v4599_v14  ;;  %v910_v14 = vadd.f32 1.0, %v5821_v2 }
  0xae   : > { %v810_v7 = vsel %vm809_vm7, %v807_v62, %v804_v61  ;;  %v4603_v21 = vpop.eup %4602  ;;  %v5817_v61 = vld [vmem:[%s5648_s4 + $0x108] sm:$0xff] }
  0xaf   : > { %v4605_v23 = vpop.eup %4604  ;;  %v822_v36 = vmul.f32 0.6931472, %v4603_v21  ;;  %v819_v43 = vsel %vm5795_vm8, %v816_v27, %v813_v31  ;;  %v895_v25 = vmul.f32 -0.5, %v5817_v61 }
  0xb0   : > { %1358 = vmatmul.bf16.gmra.mxu0 %v1177_v56  ;;  %v795_v56 = vmul.f32 0.6931472, %v4593_v42  ;;  %v840_v37 = vmul.f32 0.6931472, %v4605_v23  ;;  %v856_v42 = vadd.f32 1.0, %v560_v35  ;;  %v4395_v35 = vld [vmem:[#allocation8 + $0x30] sm:$0xff] }
  0xb1   : > { %1447 = vmatmul.bf16.gmra.mxu1 %v1178_v58  ;;  %v789_v58 = vmul.f32 %v788_v44, %v552_v19  ;;  %v833_v19 = vadd.f32 1.0, %v832_v11  ;;  %v896_v39 = vadd.f32 1.0, %v895_v25  ;;  %2078 = vmatpush.bf16.msra.mxu2 %v4395_v35  ;;  %v958_v35 = vmul.f32 -0.5, %v5895_v5 }
  0xb2   : > { %v801_v4 = vsel %vm5783_vm5, %v798_v57, %v795_v56  ;;  %v846_v47 = vsel %vm845_vm11, %v843_v38, %v840_v37  ;;  %4610 = vlog2.f32 %v856_v42  ;;  %v871_v56 = vand.u32 2147483647, %v561_v30  ;;  %v5814_v57 = vld [vmem:[%s5648_s4 + $0x110] sm:$0xff] }
  0xb3   : > { %v792_v6 = vsel %vm791_vm6, %v789_v58, %v786_v60  ;;  %v1181_v8 = vpack.c.bf16 %v801_v4, %v783_v3  ;;  %v834_v33 = vmul.f32 %v833_v19, %v557_v54  ;;  %4612 = vlog2.f32 %v874_v45  ;;  %v4607_v58 = vpop.eup %4606  ;;  %v4393_v4 = vld [vmem:[#allocation8 + $0x20] sm:$0xff] }
  0xb4   : > { %v1182_v10 = vpack.c.bf16 %v810_v7, %v792_v6  ;;  %v853_v54 = vand.u32 2147483647, %v559_v26  ;;  %v869_v60 = vadd.f32 1.0, %v868_v50  ;;  %v4609_v62 = vpop.eup %4608  ;;  %v901_v6 = vadd.f32 1.0, %v5814_v57 }
  0xb5   : > { %vm5828_vm13 = vcmp.lt.f32.partialorder %v871_v56, 0.0004427343  ;;  %v849_v11 = vmul.f32 0.6931472, %v4607_v58  ;;  %v867_v15 = vmul.f32 0.6931472, %v4609_v62  ;;  %4614 = vlog2.f32 %v883_v1 }
  0xb6   : > { %vm5823_vm12 = vcmp.lt.f32.partialorder %v853_v54, 0.0004427343  ;;  %v870_v13 = vmul.f32 %v869_v60, %v561_v30  ;;  %4616 = vlog2.f32 %v901_v6  ;;  %v904_v23 = vmul.f32 -0.5, %v5814_v57  ;;  %v5875_v54 = vld [vmem:[%s5648_s4 + $0x138] sm:$0xff]  ;;  %v4394_v56 = vld [vmem:[#allocation8 + $0x28] sm:$0xff] }
  0xb7   : > { %v907_v38 = vand.u32 2147483647, %v5814_v57  ;;  %v897_v60 = vmul.f32 %v896_v39, %v5817_v61  ;;  %2079 = vmatpush.bf16.msra.mxu2 %v4394_v56  ;;  %v959_v56 = vadd.f32 1.0, %v958_v35 }
  0xb8   : > { %v4611_v3 = vpop.eup %4610  ;;  %v873_v28 = vsel %vm5828_vm13, %v870_v13, %v867_v15  ;;  %v5916_v15 = vld [vmem:[%s5648_s4 + $0x158] sm:$0xff] }
  0xb9   : > { %v4613_v7 = vpop.eup %4612  ;;  %vm5877_vm1 = vcmp.lt.f32.partialorder %v907_v38, 0.0004427343  ;;  %v982_v25 = vadd.f32 1.0, %v5916_v15 }
  0xbb   : > { %v4615_v31 = vpop.eup %4614  ;;  %2080 = vmatpush.bf16.msra.mxu2 %v4393_v4 }
  0xbc   : > { %v4617_v37 = vpop.eup %4616  ;;  %v885_v50 = vmul.f32 0.6931472, %v4615_v31 }
  0xbd   : > { %v903_v58 = vmul.f32 0.6931472, %v4617_v37 }
  0xc0   : > { %1363 = vmatmul.bf16.gmra.mxu0 %v1179_v32  ;;  %v831_v32 = vmul.f32 0.6931472, %v4601_v18  ;;  %v858_v18 = vmul.f32 0.6931472, %v4611_v3 }
  0xc1   : > { %1452 = vmatmul.bf16.gmra.mxu1 %v1180_v34  ;;  %v825_v34 = vmul.f32 %v824_v20, %v556_v59  ;;  %v851_v59 = vadd.f32 1.0, %v850_v49  ;;  %v876_v20 = vmul.f32 0.6931472, %v4613_v7  ;;  %v5866_v49 = vld [vmem:[%s5648_s4 + $0x128] sm:$0xff]  ;;  %v5901_v7 = vld [vmem:[%s5648_s4 + $0x150] sm:$0xff] }
  0xc2   : > { %v837_v44 = vsel %vm5799_vm9, %v834_v33, %v831_v32  ;;  %v864_v29 = vsel %vm5834_vm14, %v861_v16, %v858_v18  ;;  %v887_v32 = vadd.f32 1.0, %v886_v22  ;;  %v889_v33 = vand.u32 2147483647, %v5811_v55 }
  0xc3   : > { %v828_v46 = vsel %vm827_vm10, %v825_v34, %v822_v36  ;;  %v1183_v48 = vpack.c.bf16 %v837_v44, %v819_v43  ;;  %v852_v12 = vmul.f32 %v851_v59, %v559_v26  ;;  %v913_v26 = vmul.f32 -0.5, %v5821_v2  ;;  %v5856_v36 = vld [vmem:[%s5648_s4 + $0x120] sm:$0xff]  ;;  %v5860_v44 = vld [vmem:[%s5648_s4 + $0x130] sm:$0xff] }
  0xc4   : > { %v1184_v51 = vpack.c.bf16 %v846_v47, %v828_v46  ;;  %v882_v30 = vsel %vm5838_vm15, %v879_v17, %v876_v20  ;;  %v905_v34 = vadd.f32 1.0, %v904_v23  ;;  %v898_v46 = vand.u32 2147483647, %v5817_v61  ;;  %v4392_v17 = vld [vmem:[#allocation8 + $0x18] sm:$0xff] }
  0xc5   : > { %v855_v27 = vsel %vm5823_vm12, %v852_v12, %v849_v11  ;;  %v1186_v42 = vpack.c.bf16 %v882_v30, %v864_v29  ;;  %v914_v43 = vadd.f32 1.0, %v913_v26  ;;  %v916_v47 = vand.u32 2147483647, %v5821_v2  ;;  %v5910_v11 = vld [vmem:[%s5648_s4 + $0x148] sm:$0xff]  ;;  %2081 = vmatpush.bf16.msra.mxu2 %v4392_v17 }
  0xc6   : > { %v1185_v41 = vpack.c.bf16 %v873_v28, %v855_v27  ;;  %vm5869_vm0 = vcmp.lt.f32.partialorder %v889_v33, 0.0004427343  ;;  %v906_v53 = vmul.f32 %v905_v34, %v5814_v57  ;;  %v937_v62 = vadd.f32 1.0, %v5860_v44  ;;  %v5926_v27 = vld [vmem:[%s7685_s3] ss:$0 sm:$0xff]  ;;  %v4391_v34 = vld [vmem:[#allocation8 + $0x10] sm:$0xff] }
  0xc7   : > { %v915_v57 = vmul.f32 %v914_v43, %v5821_v2  ;;  %v928_v0 = vadd.f32 1.0, %v5866_v49  ;;  %vm5885_vm2 = vcmp.lt.f32.partialorder %v898_v46, 0.0004427343  ;;  %vm5889_vm3 = vcmp.lt.f32.partialorder %v916_v47, 0.0004427343 }
  0xc8   : > { %v922_v6 = vmul.f32 -0.5, %v5856_v36  ;;  %v940_v12 = vmul.f32 -0.5, %v5860_v44  ;;  %v931_v13 = vmul.f32 -0.5, %v5866_v49  ;;  %v949_v16 = vmul.f32 -0.5, %v5875_v54 }
  0xc9   : > { %v973_v18 = vadd.f32 1.0, %v5901_v7  ;;  %v964_v21 = vadd.f32 1.0, %v5910_v11  ;;  %v925_v24 = vand.u32 2147483647, %v5856_v36  ;;  %v943_v29 = vand.u32 2147483647, %v5860_v44  ;;  %2082 = vmatpush.bf16.msra.mxu2 %v4391_v34 }
  0xca   : > { %v923_v20 = vadd.f32 1.0, %v922_v6  ;;  %v941_v28 = vadd.f32 1.0, %v940_v12  ;;  %v932_v30 = vadd.f32 1.0, %v931_v13  ;;  %v950_v33 = vadd.f32 1.0, %v949_v16  ;;  %v4389_v16 = vld [vmem:[#allocation8] sm:$0xff] }
  0xcb   : > { %v934_v39 = vand.u32 2147483647, %v5866_v49  ;;  %vm5937_vm4 = vcmp.lt.f32.partialorder %v925_v24, 0.0004427343  ;;  %v967_v43 = vmul.f32 -0.5, %v5910_v11 }
  0xcc   : > { %v5933_v38 = vmul.f32 %v923_v20, %v5856_v36  ;;  %vm5948_vm5 = vcmp.lt.f32.partialorder %v943_v29, 0.0004427343  ;;  %v951_v4 = vmul.f32 %v950_v33, %v5875_v54 }
  0xcd   : > { %vm5961_vm6 = vcmp.lt.f32.partialorder %v934_v39, 0.0004427343  ;;  %v968_v1 = vadd.f32 1.0, %v967_v43 }
  0xd0   : > { %1368 = vmatmul.bf16.gmra.mxu0 %v1181_v8  ;;  %v909_v8 = vsel %vm5877_vm1, %v906_v53, %v903_v58  ;;  %v4390_v58 = vld [vmem:[#allocation8 + $0x8] sm:$0xff] }
  0xd1   : > { %1457 = vmatmul.bf16.gmra.mxu1 %v1182_v10  ;;  %v892_v10 = vadd.f32 1.0, %v5817_v61  ;;  %v946_v61 = vadd.f32 1.0, %v5875_v54  ;;  %2083 = vmatpush.bf16.msra.mxu2 %v4390_v58 }
  0xd3   : > { %4618 = vlog2.f32 %v892_v10 }
  0xd4   : > { %4620 = vlog2.f32 %v910_v14  ;;  %v955_v14 = vadd.f32 1.0, %v5895_v5 }
  0xd5   : > { %2084 = vmatpush.bf16.msra.mxu2 %v4389_v16 }
  0xd9   : > { %v4619_v40 = vpop.eup %4618 }
  0xda   : > { %v4621_v45 = vpop.eup %4620 }
  0xdb   : > { %v912_v63 = vmul.f32 0.6931472, %v4621_v45 }
  0xdd   : > { %v918_v10 = vsel %vm5889_vm3, %v915_v57, %v912_v63 }
  0xe0   : > { %1373 = vmatmul.bf16.gmra.mxu0 %v1183_v48  ;;  %v919_v48 = vadd.f32 1.0, %v5856_v36  ;;  %v5946_v36 = vmul.f32 %v941_v28, %v5860_v44 }
  0xe1   : > { %1462 = vmatmul.bf16.gmra.mxu1 %v1184_v51  ;;  %v888_v51 = vmul.f32 %v887_v32, %v5811_v55  ;;  %v894_v55 = vmul.f32 0.6931472, %v4619_v40  ;;  %v976_v40 = vmul.f32 -0.5, %v5901_v7 }
  0xe2   : > { %4622 = vlog2.f32 %v919_v48 }
  0xe3   : > { %v891_v2 = vsel %vm5869_vm0, %v888_v51, %v885_v50  ;;  %4624 = vlog2.f32 %v937_v62  ;;  %v900_v9 = vsel %vm5885_vm2, %v897_v60, %v894_v55  ;;  %v985_v50 = vmul.f32 -0.5, %v5916_v15 }
  0xe4   : > { %4626 = vlog2.f32 %v928_v0  ;;  %v1187_v22 = vpack.c.bf16 %v909_v8, %v891_v2  ;;  %v1188_v23 = vpack.c.bf16 %v918_v10, %v900_v9  ;;  %v5959_v60 = vmul.f32 %v932_v30, %v5866_v49  ;;  %v5980_v8 = vld [vmem:[%s5648_s4 + $0x160] sm:$0xff]  ;;  %v5983_v9 = vld [vmem:[%s5648_s4 + $0x170] sm:$0xff] }
  0xe5   : > { %4628 = vlog2.f32 %v946_v61  ;;  %v961_v62 = vand.u32 2147483647, %v5895_v5  ;;  %v977_v55 = vadd.f32 1.0, %v976_v40  ;;  %v979_v49 = vand.u32 2147483647, %v5901_v7 }
  0xe6   : > { %4630 = vlog2.f32 %v955_v14  ;;  %v970_v2 = vand.u32 2147483647, %v5910_v11  ;;  %v986_v6 = vadd.f32 1.0, %v985_v50  ;;  %v960_v14 = vmul.f32 %v959_v56, %v5895_v5 }
  0xe7   : > { %4632 = vlog2.f32 %v973_v18  ;;  %v991_v17 = vadd.f32 1.0, %v5980_v8  ;;  %vm5988_vm8 = vcmp.lt.f32.partialorder %v961_v62, 0.0004427343  ;;  %v978_v18 = vmul.f32 %v977_v55, %v5901_v7 }
  0xe8   : > { %v4623_v19 = vpop.eup %4622  ;;  %4634 = vlog2.f32 %v964_v21  ;;  %v1009_v20 = vadd.f32 1.0, %v5983_v9  ;;  %v5996_v21 = vld [vmem:[%s5648_s4 + $0x168] sm:$0xff]  ;;  %vm5998_vm9 = vcmp.lt.f32.partialorder %v979_v49, 0.0004427343  ;;  %v969_v5 = vmul.f32 %v968_v1, %v5910_v11 }
  0xe9   : > { %v4625_v26 = vpop.eup %4624  ;;  %v5929_v32 = vmul.f32 0.6931472, %v4623_v19  ;;  %4636 = vlog2.f32 %v982_v25  ;;  %v988_v19 = vand.u32 2147483647, %v5916_v15  ;;  %v6004_v25 = vld [vmem:[%s5648_s4 + $0x178] sm:$0xff]  ;;  %v1000_v34 = vadd.f32 1.0, %v5996_v21 }
  0xea   : > { %v4627_v31 = vpop.eup %4626  ;;  %v5943_v47 = vmul.f32 0.6931472, %v4625_v26  ;;  %vm6006_vm10 = vcmp.lt.f32.partialorder %v970_v2, 0.0004427343  ;;  %4638 = vlog2.f32 %v991_v17  ;;  %v994_v35 = vmul.f32 -0.5, %v5980_v8 }
  0xeb   : > { %v4629_v37 = vpop.eup %4628  ;;  %v5954_v52 = vmul.f32 0.6931472, %v4627_v31  ;;  %v927_v61 = vsel %vm5937_vm4, %v5933_v38, %v5929_v32  ;;  %v987_v31 = vmul.f32 %v986_v6, %v5916_v15  ;;  %vm6013_vm11 = vcmp.lt.f32.partialorder %v988_v19, 0.0004427343  ;;  %v6068_v19 = vld [vmem:[%s5648_s4 + $0x190] sm:$0xff] }
  0xec   : > { %v5956_v53 = vmul.f32 0.6931472, %v4629_v37  ;;  %v4631_v59 = vpop.eup %4630  ;;  %4640 = vlog2.f32 %v1009_v20  ;;  %v1018_v37 = vadd.f32 1.0, %v6004_v25  ;;  %v945_v15 = vsel %vm5948_vm5, %v5946_v36, %v5943_v47 }
  0xed   : > { %v4633_v63 = vpop.eup %4632  ;;  %v957_v13 = vmul.f32 0.6931472, %v4631_v59  ;;  %v936_v39 = vsel %vm5961_vm6, %v5959_v60, %v5954_v52  ;;  %v1012_v43 = vmul.f32 -0.5, %v5983_v9  ;;  %v995_v36 = vadd.f32 1.0, %v994_v35 }
  0xee   : > { %v4635_v3 = vpop.eup %4634  ;;  %v1003_v48 = vmul.f32 -0.5, %v5996_v21  ;;  %v1189_v52 = vpack.c.bf16 %v945_v15, %v927_v61  ;;  %v997_v56 = vand.u32 2147483647, %v5980_v8  ;;  %v1015_v1 = vand.u32 2147483647, %v5983_v9 }
  0xef   : > { %v4637_v10 = vpop.eup %4636  ;;  %v966_v29 = vmul.f32 0.6931472, %v4635_v3  ;;  %v1013_v55 = vadd.f32 1.0, %v1012_v43  ;;  %v1021_v3 = vmul.f32 -0.5, %v6004_v25  ;;  %v996_v2 = vmul.f32 %v995_v36, %v5980_v8 }
  0xf0   : > { %1378 = vmatmul.bf16.gmra.mxu0 %v1185_v41  ;;  %v984_v30 = vmul.f32 0.6931472, %v4637_v10  ;;  %v963_v41 = vsel %vm5988_vm8, %v960_v14, %v957_v13  ;;  %v4639_v50 = vpop.eup %4638  ;;  %v1004_v6 = vadd.f32 1.0, %v1003_v48  ;;  %vm6058_vm12 = vcmp.lt.f32.partialorder %v997_v56, 0.0004427343 }
  0xf1   : > { %1467 = vmatmul.bf16.gmra.mxu1 %v1186_v42  ;;  %v952_v42 = vand.u32 2147483647, %v5875_v54  ;;  %v1014_v54 = vmul.f32 %v1013_v55, %v5983_v9  ;;  %v1006_v8 = vand.u32 2147483647, %v5996_v21  ;;  %vm6072_vm13 = vcmp.lt.f32.partialorder %v1015_v1, 0.0004427343 }
  0xf2   : > { %v990_v47 = vsel %vm6013_vm11, %v987_v31, %v984_v30  ;;  %v4641_v58 = vpop.eup %4640  ;;  %v6080_v9 = vmul.f32 %v1004_v6, %v5996_v21 }
  0xf3   : > { %vm5968_vm7 = vcmp.lt.f32.partialorder %v952_v42, 0.0004427343  ;;  %v1011_v17 = vmul.f32 0.6931472, %v4641_v58  ;;  %vm6094_vm14 = vcmp.lt.f32.partialorder %v1006_v8, 0.0004427343 }
  0xf4   : > { %v954_v40 = vsel %vm5968_vm7, %v951_v4, %v5956_v53  ;;  %v993_v4 = vmul.f32 0.6931472, %v4639_v50 }
  0xf5   : > { %v1190_v53 = vpack.c.bf16 %v954_v40, %v936_v39  ;;  %v1017_v21 = vsel %vm6072_vm13, %v1014_v54, %v1011_v17 }
  0xfd   : > { %v1344_v45 = vpop.f32.mrf.mxu0 }
  0xfe   : > { %v1433_v46 = vpop.f32.mrf.mxu1  ;;  %v1345_v51 = vadd.f32 %v5926_v27, %v1344_v45 }
 0x100   : > { %v5966_v57 = vadd.f32 %v1433_v46, %v1345_v51  ;;  %1383 = vmatmul.bf16.gmra.mxu0 %v1187_v22  ;;  %v972_v46 = vsel %vm6006_vm10, %v969_v5, %v966_v29  ;;  %v999_v5 = vsel %vm6058_vm12, %v996_v2, %v993_v4  ;;  %v6084_v29 = vld [vmem:[%s5648_s4 + $0x188] sm:$0xff] }
 0x101   : > { %1472 = vmatmul.bf16.gmra.mxu1 %v1188_v23  ;;  %v975_v23 = vmul.f32 0.6931472, %v4633_v63  ;;  %v6046_v62 = vpack.c.bf16 %v990_v47, %v972_v46 }
 0x102   : > { %v1545_v12 = vand.u32 2147483647, %v5966_v57 }
 0x103   : > { %v981_v42 = vsel %vm5998_vm9, %v978_v18, %v975_v23  ;;  %v6065_v18 = vld [vmem:[%s5648_s4 + $0x180] sm:$0xff] }
 0x104   : > { %v1577_v22 = vsub.f32 0.0, %v1545_v12  ;;  %v6044_v44 = vpack.c.bf16 %v981_v42, %v963_v41  ;;  %v1513_v12 = vmax.f32 %v5966_v57, 0.0  ;;  %v1027_v24 = vadd.f32 1.0, %v6065_v18 }
 0x105   : > { %v1346_v26 = vpop.f32.mrf.mxu0  ;;  %v1036_v41 = vadd.f32 1.0, %v6084_v29  ;;  %v1030_v46 = vmul.f32 -0.5, %v6065_v18  ;;  %v1033_v4 = vand.u32 2147483647, %v6065_v18 }
 0x106   : > { %v1435_v28 = vpop.f32.mrf.mxu1  ;;  %v1609_v32 = vmul.f32 1.442695, %v1577_v22  ;;  %v1347_v33 = vadd.f32 %v5926_v27, %v1346_v26  ;;  %v1022_v26 = vadd.f32 1.0, %v1021_v3 }
 0x107   : > { %vm6147_vm2 = vcmp.lt.f32.partialorder %v1033_v4, 0.0004427343 }
 0x108   : > { %4642 = vpow2.f32 %v1609_v32  ;;  %v6019_v38 = vadd.f32 %v1435_v28, %v1347_v33  ;;  %v1045_v28 = vadd.f32 1.0, %v6068_v19  ;;  %v1023_v48 = vmul.f32 %v1022_v26, %v6004_v25 }
 0x109   : > { %4644 = vlog2.f32 %v1000_v34 }
 0x10a   : > { %v1546_v45 = vand.u32 2147483647, %v6019_v38  ;;  %4646 = vlog2.f32 %v1018_v37  ;;  %v1514_v20 = vmax.f32 %v6019_v38, 0.0  ;;  %v1024_v37 = vand.u32 2147483647, %v6004_v25 }
 0x10c   : > { %v1578_v51 = vsub.f32 0.0, %v1546_v45  ;;  %vm6116_vm0 = vcmp.lt.f32.partialorder %v1024_v37, 0.0004427343 }
 0x10d   : > { %v1349_v59 = vpop.f32.mrf.mxu0 }
 0x10e   : > { %v1438_v60 = vpop.f32.mrf.mxu1  ;;  %v6048_v63 = vpop.eup %4642  ;;  %v1611_v0 = vmul.f32 1.442695, %v1578_v51  ;;  %v1350_v49 = vadd.f32 %v5926_v27, %v1349_v59  ;;  %v6114_v59 = vpack.c.bf16 %v1017_v21, %v999_v5 }
 0x10f   : > { %v1673_v61 = vadd.f32 1.0, %v6048_v63  ;;  %v4645_v10 = vpop.eup %4644  ;;  %v1676_v30 = vmul.f32 -0.5, %v6048_v63  ;;  %v1679_v11 = vand.u32 2147483647, %v6048_v63 }
 0x110   : > { %4648 = vpow2.f32 %v1611_v0  ;;  %v6056_v13 = vadd.f32 %v1438_v60, %v1350_v49  ;;  %1388 = vmatmul.bf16.gmra.mxu0 %v1189_v52  ;;  %v4647_v16 = vpop.eup %4646  ;;  %v6087_v31 = vmul.f32 0.6931472, %v4645_v10  ;;  %v1048_v52 = vmul.f32 -0.5, %v6068_v19 }
 0x111   : > { %1477 = vmatmul.bf16.gmra.mxu1 %v1190_v53  ;;  %4650 = vlog2.f32 %v1673_v61  ;;  %v6089_v32 = vmul.f32 0.6931472, %v4647_v16  ;;  %v1677_v36 = vadd.f32 1.0, %v1676_v30  ;;  %vm6105_vm15 = vcmp.lt.f32.partialorder %v1679_v11, 0.0004427343  ;;  %v6111_v53 = vld [vmem:[%s5648_s4 + $0x198] sm:$0xff] }
 0x112   : > { %v1547_v22 = vand.u32 2147483647, %v6056_v13  ;;  %4652 = vlog2.f32 %v1027_v24  ;;  %v1008_v55 = vsel %vm6094_vm14, %v6080_v9, %v6087_v31  ;;  %v1031_v0 = vadd.f32 1.0, %v1030_v46 }
 0x113   : > { %4654 = vlog2.f32 %v1045_v28  ;;  %v1515_v1 = vmax.f32 %v6056_v13, 0.0  ;;  %v1678_v61 = vmul.f32 %v6048_v63, %v1677_v36  ;;  %v1026_v16 = vsel %vm6116_vm0, %v1023_v48, %v6089_v32 }
 0x114   : > { %v1579_v7 = vsub.f32 0.0, %v1547_v22  ;;  %v1049_v17 = vadd.f32 1.0, %v1048_v52  ;;  %v1054_v54 = vadd.f32 1.0, %v6111_v53  ;;  %v1051_v24 = vand.u32 2147483647, %v6068_v19 }
 0x115   : > { %v1351_v33 = vpop.f32.mrf.mxu0  ;;  %v6156_v35 = vpack.c.bf16 %v1026_v16, %v1008_v55 }
 0x116   : > { %v1440_v34 = vpop.f32.mrf.mxu1  ;;  %v4649_v15 = vpop.eup %4648  ;;  %v1613_v39 = vmul.f32 1.442695, %v1579_v7  ;;  %v1352_v40 = vadd.f32 %v5926_v27, %v1351_v33  ;;  %v1032_v7 = vmul.f32 %v1031_v0, %v6065_v18  ;;  %v1050_v11 = vmul.f32 %v1049_v17, %v6068_v19 }
 0x117   : > { %v4651_v42 = vpop.eup %4650  ;;  %v1682_v43 = vadd.f32 1.0, %v4649_v15  ;;  %v1685_v45 = vmul.f32 -0.5, %v4649_v15  ;;  %v1688_v51 = vand.u32 2147483647, %v4649_v15  ;;  %v1039_v18 = vmul.f32 -0.5, %v6084_v29 }
 0x118   : > { %4656 = vpow2.f32 %v1613_v39  ;;  %v6102_v47 = vadd.f32 %v1440_v34, %v1352_v40  ;;  %v1675_v58 = vmul.f32 0.6931472, %v4651_v42  ;;  %v4653_v49 = vpop.eup %4652  ;;  %vm6158_vm3 = vcmp.lt.f32.partialorder %v1051_v24, 0.0004427343 }
 0x119   : > { %4658 = vlog2.f32 %v1682_v43  ;;  %v1686_v25 = vadd.f32 1.0, %v1685_v45  ;;  %v4655_v2 = vpop.eup %4654  ;;  %vm6127_vm1 = vcmp.lt.f32.partialorder %v1688_v51, 0.0004427343  ;;  %v1029_v28 = vmul.f32 0.6931472, %v4653_v49  ;;  %v6174_v45 = vld [vmem:[%s5648_s4 + $0x1a0] sm:$0xff] }
 0x11a   : > { %v1548_v56 = vand.u32 2147483647, %v6102_v47  ;;  %4660 = vlog2.f32 %v1036_v41  ;;  %v1681_v23 = vsel %vm6105_vm15, %v1678_v61, %v1675_v58  ;;  %v1047_v34 = vmul.f32 0.6931472, %v4655_v2 }
 0x11b   : > { %v1687_v9 = vmul.f32 %v4649_v15, %v1686_v25  ;;  %v1516_v37 = vmax.f32 %v6102_v47, 0.0  ;;  %v1961_v15 = vadd.f32 %v1681_v23, %v1513_v12  ;;  %v1035_v42 = vsel %vm6147_vm2, %v1032_v7, %v1029_v28 }
 0x11c   : > { %v1580_v3 = vsub.f32 0.0, %v1548_v56  ;;  %v1053_v57 = vsel %vm6158_vm3, %v1050_v11, %v1047_v34  ;;  %v1040_v38 = vadd.f32 1.0, %v1039_v18  ;;  %v1042_v12 = vand.u32 2147483647, %v6084_v29 }
 0x11d   : > { %v1354_v6 = vpop.f32.mrf.mxu0  ;;  %v1057_v56 = vmul.f32 -0.5, %v6111_v53  ;;  %v1063_v0 = vadd.f32 1.0, %v6174_v45  ;;  %v6204_v17 = vpack.c.bf16 %v1053_v57, %v1035_v42  ;;  %v1069_v42 = vand.u32 2147483647, %v6174_v45 }
 0x11e   : > { %v1443_v10 = vpop.f32.mrf.mxu1  ;;  %v6135_v8 = vpop.eup %4656  ;;  %v1615_v22 = vmul.f32 1.442695, %v1580_v3  ;;  %v1355_v63 = vadd.f32 %v5926_v27, %v1354_v6  ;;  %v6193_v4 = vmul.f32 %v1040_v38, %v6084_v29  ;;  %vm6195_vm5 = vcmp.lt.f32.partialorder %v1042_v12, 0.0004427343 }
 0x11f   : > { %v4659_v5 = vpop.eup %4658  ;;  %v1691_v26 = vadd.f32 1.0, %v6135_v8  ;;  %v1694_v39 = vmul.f32 -0.5, %v6135_v8  ;;  %v1697_v41 = vand.u32 2147483647, %v6135_v8  ;;  %v1060_v6 = vand.u32 2147483647, %v6111_v53 }
 0x120   : > { %4662 = vpow2.f32 %v1615_v22  ;;  %v6143_v30 = vadd.f32 %v1443_v10, %v1355_v63  ;;  %1393 = vmatmul.bf16.gmra.mxu0 %v6044_v44  ;;  %v1684_v31 = vmul.f32 0.6931472, %v4659_v5  ;;  %v4661_v33 = vpop.eup %4660  ;;  %v6201_v10 = vld [vmem:[%s5648_s4 + $0x1a8] sm:$0xff]  ;;  %v1066_v29 = vmul.f32 -0.5, %v6174_v45 }
 0x121   : > { %1482 = vmatmul.bf16.gmra.mxu1 %v6046_v62  ;;  %4664 = vlog2.f32 %v1691_v26  ;;  %v6171_v43 = vmul.f32 0.6931472, %v4661_v33  ;;  %v1695_v60 = vadd.f32 1.0, %v1694_v39  ;;  %vm6187_vm4 = vcmp.lt.f32.partialorder %v1697_v41, 0.0004427343 }
 0x122   : > { %v1549_v21 = vand.u32 2147483647, %v6143_v30  ;;  %v1690_v44 = vsel %vm6127_vm1, %v1687_v9, %v1684_v31  ;;  %4666 = vlog2.f32 %v1054_v54  ;;  %v1058_v54 = vadd.f32 1.0, %v1057_v56 }
 0x123   : > { %v1962_v19 = vadd.f32 %v1690_v44, %v1514_v20  ;;  %v6180_v20 = vld [vmem:[%s5648_s4 + $0x1b0] sm:$0xff]  ;;  %v1517_v22 = vmax.f32 %v6143_v30, 0.0  ;;  %v1696_v5 = vmul.f32 %v6135_v8, %v1695_v60  ;;  %v1072_v9 = vadd.f32 1.0, %v6201_v10 }
 0x124   : > { %v1581_v40 = vsub.f32 0.0, %v1549_v21  ;;  %v1081_v61 = vadd.f32 1.0, %v6180_v20  ;;  %v1044_v31 = vsel %vm6195_vm5, %v6193_v4, %v6171_v43  ;;  %vm6214_vm6 = vcmp.lt.f32.partialorder %v1060_v6, 0.0004427343 }
 0x125   : > { %v1356_v46 = vpop.f32.mrf.mxu0  ;;  %v1993_v48 = vpack.c.bf16 %v1962_v19, %v1961_v15  ;;  %v1084_v33 = vmul.f32 -0.5, %v6180_v20  ;;  %v1059_v21 = vmul.f32 %v1058_v54, %v6111_v53  ;;  %v1067_v39 = vadd.f32 1.0, %v1066_v29 }
 0x126   : > { %v1445_v36 = vpop.f32.mrf.mxu1  ;;  %v4663_v50 = vpop.eup %4662  ;;  %v1617_v51 = vmul.f32 1.442695, %v1581_v40  ;;  %v1357_v52 = vadd.f32 %v5926_v27, %v1356_v46  ;;  %vm6245_vm8 = vcmp.lt.f32.partialorder %v1069_v42, 0.0004427343  ;;  %v6289_v42 = vld [vmem:[%s5648_s4 + $0x1d0] sm:$0xff] }
 0x127   : > { %v4665_v58 = vpop.eup %4664  ;;  %2085 = vmatmul.bf16.vlgmr.msra.gmra.mxu2 %v1993_v48  ;;  %v1700_v25 = vadd.f32 1.0, %v4663_v50  ;;  %v1703_v55 = vmul.f32 -0.5, %v4663_v50  ;;  %v1706_v7 = vand.u32 2147483647, %v4663_v50  ;;  %v1085_v46 = vadd.f32 1.0, %v1084_v33 }
 0x128   : > { %4668 = vpow2.f32 %v1617_v51  ;;  %v6185_v49 = vadd.f32 %v1445_v36, %v1357_v52  ;;  %v1693_v16 = vmul.f32 0.6931472, %v4665_v58  ;;  %v4667_v23 = vpop.eup %4666  ;;  %v6242_v51 = vld [vmem:[%s5648_s4 + $0x1b8] sm:$0xff]  ;;  %v1068_v58 = vmul.f32 %v1067_v39, %v6174_v45 }
 0x129   : > { %4670 = vlog2.f32 %v1700_v25  ;;  %v1704_v63 = vadd.f32 1.0, %v1703_v55  ;;  %v1056_v15 = vmul.f32 0.6931472, %v4667_v23  ;;  %vm1707_vm7 = vcmp.lt.f32.partialorder %v1706_v7, 0.0004427343 }
 0x12a   : > { %v1550_v14 = vand.u32 2147483647, %v6185_v49  ;;  %4672 = vlog2.f32 %v1063_v0  ;;  %v1699_v18 = vsel %vm6187_vm4, %v1696_v5, %v1693_v16  ;;  %v1518_v53 = vmax.f32 %v6185_v49, 0.0 }
 0x12b   : > { %4674 = vlog2.f32 %v1081_v61  ;;  %v1705_v62 = vmul.f32 %v4663_v50, %v1704_v63  ;;  %v1963_v38 = vadd.f32 %v1699_v18, %v1515_v1  ;;  %v1062_v12 = vsel %vm6214_vm6, %v1059_v21, %v1056_v15 }
 0x12c   : > { %v1582_v24 = vsub.f32 0.0, %v1550_v14  ;;  %v1086_v25 = vmul.f32 %v1085_v46, %v6180_v20  ;;  %v1075_v55 = vmul.f32 -0.5, %v6201_v10  ;;  %v1090_v45 = vadd.f32 1.0, %v6242_v51 }
 0x12d   : > { %v1359_v26 = vpop.f32.mrf.mxu0  ;;  %v1196_v63 = vpack.c.bf16 %v1062_v12, %v1044_v31 }
 0x12e   : > { %v1448_v28 = vpop.f32.mrf.mxu1  ;;  %v6219_v34 = vpop.eup %4668  ;;  %v1619_v8 = vmul.f32 1.442695, %v1582_v24  ;;  %v1360_v11 = vadd.f32 %v5926_v27, %v1359_v26  ;;  %v1076_v5 = vadd.f32 1.0, %v1075_v55  ;;  %v6266_v26 = vld [vmem:[%s5648_s4 + $0x1c0] sm:$0xff] }
 0x12f   : > { %v4671_v44 = vpop.eup %4670  ;;  %v1709_v19 = vadd.f32 1.0, %v6219_v34  ;;  %v1712_v50 = vmul.f32 -0.5, %v6219_v34  ;;  %v1715_v14 = vand.u32 2147483647, %v6219_v34 }
 0x130   : > { %4676 = vpow2.f32 %v1619_v8  ;;  %v6226_v40 = vadd.f32 %v1448_v28, %v1360_v11  ;;  %1398 = vmatmul.bf16.gmra.mxu0 %v6114_v59  ;;  %v1702_v41 = vmul.f32 0.6931472, %v4671_v44  ;;  %v4673_v43 = vpop.eup %4672  ;;  %v1087_v59 = vand.u32 2147483647, %v6180_v20 }
 0x131   : > { %1487 = vmatmul.bf16.gmra.mxu1 %v6156_v35  ;;  %4678 = vlog2.f32 %v1709_v19  ;;  %v4675_v36 = vpop.eup %4674  ;;  %v1065_v56 = vmul.f32 0.6931472, %v4673_v43  ;;  %v1713_v6 = vadd.f32 1.0, %v1712_v50  ;;  %vm6271_vm10 = vcmp.lt.f32.partialorder %v1715_v14, 0.0004427343 }
 0x132   : > { %v1551_v48 = vand.u32 2147483647, %v6226_v40  ;;  %v1708_v57 = vsel %vm1707_vm7, %v1705_v62, %v1702_v41  ;;  %4680 = vlog2.f32 %v1072_v9  ;;  %vm6252_vm9 = vcmp.lt.f32.partialorder %v1087_v59, 0.0004427343 }
 0x133   : > { %v1964_v35 = vadd.f32 %v1708_v57, %v1516_v37  ;;  %v1083_v37 = vmul.f32 0.6931472, %v4675_v36  ;;  %v1071_v29 = vsel %vm6245_vm8, %v1068_v58, %v1065_v56  ;;  %v1078_v9 = vand.u32 2147483647, %v6201_v10 }
 0x134   : > { %v1583_v52 = vsub.f32 0.0, %v1551_v48  ;;  %v1519_v31 = vmax.f32 %v6226_v40, 0.0  ;;  %v1714_v33 = vmul.f32 %v6219_v34, %v1713_v6  ;;  %v1093_v11 = vmul.f32 -0.5, %v6242_v51 }
 0x135   : > { %v1361_v1 = vpop.f32.mrf.mxu0  ;;  %v1994_v47 = vpack.c.bf16 %v1964_v35, %v1963_v38  ;;  %v1089_v24 = vsel %vm6252_vm9, %v1086_v25, %v1083_v37  ;;  %v1099_v62 = vadd.f32 1.0, %v6266_v26  ;;  %v6282_v41 = vmul.f32 %v1076_v5, %v6201_v10 }
 0x136   : > { %v1450_v60 = vpop.f32.mrf.mxu1  ;;  %v4677_v0 = vpop.eup %4676  ;;  %v1621_v3 = vmul.f32 1.442695, %v1583_v52  ;;  %v1362_v61 = vadd.f32 %v5926_v27, %v1361_v1  ;;  %v6276_v21 = vpack.c.bf16 %v1089_v24, %v1071_v29  ;;  %vm6284_vm11 = vcmp.lt.f32.partialorder %v1078_v9, 0.0004427343 }
 0x137   : > { %v4679_v2 = vpop.eup %4678  ;;  %2090 = vmatmul.bf16.gmra.mxu2 %v1994_v47  ;;  %v1718_v16 = vadd.f32 1.0, %v4677_v0  ;;  %v1721_v20 = vmul.f32 -0.5, %v4677_v0  ;;  %v1724_v39 = vand.u32 2147483647, %v4677_v0  ;;  %v1102_v43 = vmul.f32 -0.5, %v6266_v26 }
 0x138   : > { %4682 = vpow2.f32 %v1621_v3  ;;  %v6258_v54 = vadd.f32 %v1450_v60, %v1362_v61  ;;  %v4681_v23 = vpop.eup %4680  ;;  %v1711_v7 = vmul.f32 0.6931472, %v4679_v2  ;;  %v1094_v10 = vadd.f32 1.0, %v1093_v11  ;;  %v6321_v2 = vld [vmem:[%s5648_s4 + $0x1c8] sm:$0xff] }
 0x139   : > { %4684 = vlog2.f32 %v1718_v16  ;;  %v1722_v32 = vadd.f32 1.0, %v1721_v20  ;;  %v6278_v44 = vmul.f32 0.6931472, %v4681_v23  ;;  %v1096_v35 = vand.u32 2147483647, %v6242_v51 }
 0x13a   : > { %v1552_v28 = vand.u32 2147483647, %v6258_v54  ;;  %4686 = vlog2.f32 %v1090_v45  ;;  %v1717_v57 = vsel %vm6271_vm10, %v1714_v33, %v1711_v7  ;;  %v1117_v58 = vadd.f32 1.0, %v6289_v42 }
 0x13b   : > { %v1723_v38 = vmul.f32 %v4677_v0, %v1722_v32  ;;  %4688 = vlog2.f32 %v1099_v62  ;;  %vm1725_vm12 = vcmp.lt.f32.partialorder %v1724_v39, 0.0004427343  ;;  %v1080_v13 = vsel %vm6284_vm11, %v6282_v41, %v6278_v44 }
 0x13c   : > { %v1584_v18 = vsub.f32 0.0, %v1552_v28  ;;  %v1103_v1 = vadd.f32 1.0, %v1102_v43  ;;  %v1105_v60 = vand.u32 2147483647, %v6266_v26  ;;  %v1965_v25 = vadd.f32 %v1717_v57, %v1517_v22 }
 0x13d   : > { %v1364_v15 = vpop.f32.mrf.mxu0  ;;  %v1095_v3 = vmul.f32 %v1094_v10, %v6242_v51  ;;  %vm6315_vm13 = vcmp.lt.f32.partialorder %v1096_v35, 0.0004427343  ;;  %v1120_v45 = vmul.f32 -0.5, %v6289_v42  ;;  %v1520_v30 = vmax.f32 %v6258_v54, 0.0 }
 0x13e   : > { %v1453_v19 = vpop.f32.mrf.mxu1  ;;  %v6292_v46 = vpop.eup %4682  ;;  %v1623_v36 = vmul.f32 1.442695, %v1584_v18  ;;  %v1365_v48 = vadd.f32 %v5926_v27, %v1364_v15  ;;  %vm6325_vm14 = vcmp.lt.f32.partialorder %v1105_v60, 0.0004427343  ;;  %v6331_v23 = vmul.f32 %v1103_v1, %v6266_v26  ;;  %v6344_v18 = vld [vmem:[%s5648_s4 + $0x1d8] sm:$0xff] }
 0x13f   : > { %v4685_v59 = vpop.eup %4684  ;;  %v1727_v12 = vadd.f32 1.0, %v6292_v46  ;;  %v1108_v28 = vadd.f32 1.0, %v6321_v2  ;;  %v1121_v33 = vadd.f32 1.0, %v1120_v45  ;;  %v1123_v8 = vand.u32 2147483647, %v6289_v42 }
 0x140   : > { %v4687_v50 = vpop.eup %4686  ;;  %4690 = vpow2.f32 %v1623_v36  ;;  %v6299_v52 = vadd.f32 %v1453_v19, %v1365_v48  ;;  %1403 = vmatmul.bf16.gmra.mxu0 %v6204_v17  ;;  %v1720_v56 = vmul.f32 0.6931472, %v4685_v59  ;;  %v1730_v17 = vmul.f32 -0.5, %v6292_v46 }
 0x141   : > { %1492 = vmatmul.bf16.gmra.mxu1 %v1196_v63  ;;  %4692 = vlog2.f32 %v1727_v12  ;;  %v1092_v0 = vmul.f32 0.6931472, %v4687_v50  ;;  %v4689_v6 = vpop.eup %4688  ;;  %v1111_v44 = vmul.f32 -0.5, %v6321_v2  ;;  %v1122_v57 = vmul.f32 %v1121_v33, %v6289_v42 }
 0x142   : > { %v1553_v47 = vand.u32 2147483647, %v6299_v52  ;;  %v1726_v37 = vsel %vm1725_vm12, %v1723_v38, %v1720_v56  ;;  %4694 = vlog2.f32 %v1117_v58  ;;  %v1731_v29 = vadd.f32 1.0, %v1730_v17  ;;  %v594_v38 = vld [vmem:[%s5648_s4 + $0x1f8] sm:$0xff] }
 0x143   : > { %v1966_v55 = vadd.f32 %v1726_v37, %v1518_v53  ;;  %v1733_v53 = vand.u32 2147483647, %v6292_v46  ;;  %v1098_v24 = vsel %vm6315_vm13, %v1095_v3, %v1092_v0  ;;  %v1101_v26 = vmul.f32 0.6931472, %v4689_v6 }
 0x144   : > { %v1585_v61 = vsub.f32 0.0, %v1553_v47  ;;  %v1521_v15 = vmax.f32 %v6299_v52, 0.0  ;;  %v1732_v39 = vmul.f32 %v6292_v46, %v1731_v29  ;;  %v1198_v34 = vpack.c.bf16 %v1098_v24, %v1080_v13 }
 0x145   : > { %v1366_v22 = vpop.f32.mrf.mxu0  ;;  %v1995_v49 = vpack.c.bf16 %v1966_v55, %v1965_v25  ;;  %vm6339_vm15 = vcmp.lt.f32.partialorder %v1733_v53, 0.0004427343  ;;  %vm6351_vm0 = vcmp.lt.f32.partialorder %v1123_v8, 0.0004427343  ;;  %v1126_v59 = vadd.f32 1.0, %v6344_v18 }
 0x146   : > { %v1455_v14 = vpop.f32.mrf.mxu1  ;;  %v4691_v16 = vpop.eup %4690  ;;  %v1625_v20 = vmul.f32 1.442695, %v1585_v61  ;;  %v1367_v63 = vadd.f32 %v5926_v27, %v1366_v22  ;;  %v1107_v46 = vsel %vm6325_vm14, %v6331_v23, %v1101_v26  ;;  %v1112_v50 = vadd.f32 1.0, %v1111_v44  ;;  %v6376_v61 = vld [vmem:[%s5648_s4 + $0x1e0] sm:$0xff] }
 0x147   : > { %2095 = vmatmul.bf16.gmra.mxu2 %v1995_v49  ;;  %v1736_v5 = vadd.f32 1.0, %v4691_v16  ;;  %v1739_v9 = vmul.f32 -0.5, %v4691_v16  ;;  %v4693_v7 = vpop.eup %4692  ;;  %v1742_v41 = vand.u32 2147483647, %v4691_v16  ;;  %v1129_v56 = vmul.f32 -0.5, %v6344_v18 }
 0x148   : > { %4696 = vpow2.f32 %v1625_v20  ;;  %v6336_v32 = vadd.f32 %v1455_v14, %v1367_v63  ;;  %v4695_v62 = vpop.eup %4694  ;;  %v1729_v43 = vmul.f32 0.6931472, %v4693_v7  ;;  %v1114_v3 = vand.u32 2147483647, %v6321_v2  ;;  %v6401_v7 = vld [vmem:[%s5648_s4 + $0x1f0] sm:$0xff] }
 0x149   : > { %4698 = vlog2.f32 %v1736_v5  ;;  %v1740_v36 = vadd.f32 1.0, %v1739_v9  ;;  %v1119_v12 = vmul.f32 0.6931472, %v4695_v62  ;;  %vm6363_vm1 = vcmp.lt.f32.partialorder %v1742_v41, 0.0004427343 }
 0x14a   : > { %v1554_v19 = vand.u32 2147483647, %v6336_v32  ;;  %4700 = vlog2.f32 %v1108_v28  ;;  %v1522_v47 = vmax.f32 %v6336_v32, 0.0  ;;  %v1735_v37 = vsel %vm6339_vm15, %v1732_v39, %v1729_v43 }
 0x14b   : > { %4702 = vlog2.f32 %v1126_v59  ;;  %v1741_v17 = vmul.f32 %v4691_v16, %v1740_v36  ;;  %v1125_v45 = vsel %vm6351_vm0, %v1122_v57, %v1119_v12  ;;  %v1113_v6 = vmul.f32 %v1112_v50, %v6321_v2  ;;  %v592_v57 = vld [vmem:[%s5648_s4 + $0x1e8] sm:$0xff] }
 0x14c   : > { %v1586_v48 = vsub.f32 0.0, %v1554_v19  ;;  %v1130_v22 = vadd.f32 1.0, %v1129_v56  ;;  %v1967_v51 = vadd.f32 %v1735_v37, %v1519_v31  ;;  %v1135_v2 = vadd.f32 1.0, %v6376_v61 }
 0x14d   : > { %v1369_v10 = vpop.f32.mrf.mxu0  ;;  %v1138_v20 = vmul.f32 -0.5, %v6376_v61  ;;  %v6392_v23 = vpack.c.bf16 %v1125_v45, %v1107_v46  ;;  %vm6394_vm2 = vcmp.lt.f32.partialorder %v1114_v3, 0.0004427343  ;;  %v1141_v46 = vand.u32 2147483647, %v6376_v61 }
 0x14e   : > { %v1458_v35 = vpop.f32.mrf.mxu1  ;;  %v6360_v58 = vpop.eup %4696  ;;  %v1627_v42 = vmul.f32 1.442695, %v1586_v48  ;;  %v1370_v13 = vadd.f32 %v5926_v27, %v1369_v10  ;;  %v1131_v54 = vmul.f32 %v1130_v22, %v6344_v18  ;;  %v1156_v48 = vmul.f32 -0.5, %v6401_v7 }
 0x14f   : > { %v4699_v60 = vpop.eup %4698  ;;  %v1745_v25 = vadd.f32 1.0, %v6360_v58  ;;  %v1748_v53 = vmul.f32 -0.5, %v6360_v58  ;;  %v1147_v3 = vmul.f32 -0.5, %v592_v57  ;;  %vm6442_vm6 = vcmp.lt.f32.partialorder %v1141_v46, 0.0004427343 }
 0x150   : > { %4704 = vpow2.f32 %v1627_v42  ;;  %v6371_v55 = vadd.f32 %v1458_v35, %v1370_v13  ;;  %1408 = vmatmul.bf16.gmra.mxu0 %v6276_v21  ;;  %v1738_v0 = vmul.f32 0.6931472, %v4699_v60  ;;  %v4701_v4 = vpop.eup %4700  ;;  %v1132_v21 = vand.u32 2147483647, %v6344_v18 }
 0x151   : > { %1497 = vmatmul.bf16.gmra.mxu1 %v1198_v34  ;;  %4706 = vlog2.f32 %v1745_v25  ;;  %v4703_v63 = vpop.eup %4702  ;;  %v1110_v24 = vmul.f32 0.6931472, %v4701_v4  ;;  %v1749_v44 = vadd.f32 1.0, %v1748_v53  ;;  %v1139_v18 = vadd.f32 1.0, %v1138_v20 }
 0x152   : > { %v1555_v14 = vand.u32 2147483647, %v6371_v55  ;;  %v1744_v49 = vsel %vm6363_vm1, %v1741_v17, %v1738_v0  ;;  %v1128_v31 = vmul.f32 0.6931472, %v4703_v63  ;;  %vm6404_vm3 = vcmp.lt.f32.partialorder %v1132_v21, 0.0004427343 }
 0x153   : > { %v1968_v16 = vadd.f32 %v1744_v49, %v1520_v30  ;;  %v1751_v30 = vand.u32 2147483647, %v6360_v58  ;;  %4708 = vlog2.f32 %v1135_v2  ;;  %v1116_v34 = vsel %vm6394_vm2, %v1113_v6, %v1110_v24 }
 0x154   : > { %v1587_v29 = vsub.f32 0.0, %v1555_v14  ;;  %v1134_v43 = vsel %vm6404_vm3, %v1131_v54, %v1128_v31  ;;  %v1750_v35 = vmul.f32 %v6360_v58, %v1749_v44  ;;  %v6426_v56 = vmul.f32 %v1139_v18, %v6376_v61  ;;  %v6434_v61 = vld [vmem:[%s7685_s3] ss:$0 sm:$0xff] }
 0x155   : > { %v1371_v9 = vpop.f32.mrf.mxu0  ;;  %v1996_v28 = vpack.c.bf16 %v1968_v16, %v1967_v51  ;;  %vm6415_vm4 = vcmp.lt.f32.partialorder %v1751_v30, 0.0004427343  ;;  %v1159_v42 = vand.u32 2147483647, %v6401_v7  ;;  %v1200_v1 = vpack.c.bf16 %v1134_v43, %v1116_v34 }
 0x156   : > { %v1460_v40 = vpop.f32.mrf.mxu1  ;;  %v4705_v33 = vpop.eup %4704  ;;  %v1629_v8 = vmul.f32 1.442695, %v1587_v29  ;;  %v1372_v11 = vadd.f32 %v5926_v27, %v1371_v9  ;;  %v1153_v27 = vadd.f32 1.0, %v6401_v7  ;;  %v1144_v60 = vadd.f32 1.0, %v592_v57 }
 0x157   : > { %v4707_v62 = vpop.eup %4706  ;;  %2100 = vmatmul.bf16.gmra.mxu2 %v1996_v28  ;;  %v1754_v19 = vadd.f32 1.0, %v4705_v33  ;;  %v1757_v39 = vmul.f32 -0.5, %v4705_v33  ;;  %v1760_v50 = vand.u32 2147483647, %v4705_v33  ;;  %v1157_v0 = vadd.f32 1.0, %v1156_v48 }
 0x158   : > { %4710 = vpow2.f32 %v1629_v8  ;;  %v6408_v41 = vadd.f32 %v1460_v40, %v1372_v11  ;;  %v1747_v10 = vmul.f32 0.6931472, %v4707_v62  ;;  %v1162_v4 = vadd.f32 1.0, %v594_v38 }
 0x159   : > { %4712 = vlog2.f32 %v1754_v19  ;;  %v1758_v12 = vadd.f32 1.0, %v1757_v39  ;;  %v4709_v37 = vpop.eup %4708  ;;  %v1165_v58 = vmul.f32 -0.5, %v594_v38  ;;  %v1150_v53 = vand.u32 2147483647, %v592_v57 }
 0x15a   : > { %v1556_v59 = vand.u32 2147483647, %v6408_v41  ;;  %4714 = vlog2.f32 %v1153_v27  ;;  %v1753_v14 = vsel %vm6415_vm4, %v1750_v35, %v1747_v10  ;;  %v1168_v51 = vand.u32 2147483647, %v594_v38 }
 0x15b   : > { %4716 = vlog2.f32 %v1144_v60  ;;  %v1759_v21 = vmul.f32 %v4705_v33, %v1758_v12  ;;  %v1148_v20 = vadd.f32 1.0, %v1147_v3  ;;  %vm1761_vm5 = vcmp.lt.f32.partialorder %v1760_v50, 0.0004427343 }
 0x15c   : > { %v1588_v13 = vsub.f32 0.0, %v1556_v59  ;;  %4718 = vlog2.f32 %v1162_v4  ;;  %v1166_v29 = vadd.f32 1.0, %v1165_v58  ;;  %v1969_v28 = vadd.f32 %v1753_v14, %v1521_v15 }
 0x15d   : > { %v1374_v17 = vpop.f32.mrf.mxu0  ;;  %v1137_v31 = vmul.f32 0.6931472, %v4709_v37  ;;  %v1158_v54 = vmul.f32 %v1157_v0, %v6401_v7  ;;  %vm6453_vm7 = vcmp.lt.f32.partialorder %v1159_v42, 0.0004427343  ;;  %v1149_v11 = vmul.f32 %v1148_v20, %v592_v57 }
 0x15e   : > { %v1463_v25 = vpop.f32.mrf.mxu1  ;;  %v6429_v45 = vpop.eup %4710  ;;  %v1631_v6 = vmul.f32 1.442695, %v1588_v13  ;;  %v1375_v22 = vadd.f32 %v6434_v61, %v1374_v17  ;;  %vm6457_vm8 = vcmp.lt.f32.partialorder %v1150_v53, 0.0004427343  ;;  %vm6461_vm9 = vcmp.lt.f32.partialorder %v1168_v51, 0.0004427343 }
 0x15f   : > { %v4713_v49 = vpop.eup %4712  ;;  %v1763_v24 = vadd.f32 1.0, %v6429_v45  ;;  %v1167_v19 = vmul.f32 %v1166_v29, %v594_v38  ;;  %v1766_v43 = vmul.f32 -0.5, %v6429_v45  ;;  %v1143_v59 = vsel %vm6442_vm6, %v6426_v56, %v1137_v31 }
 0x160   : > { %4720 = vpow2.f32 %v1631_v6  ;;  %v6439_v16 = vadd.f32 %v1463_v25, %v1375_v22  ;;  %1413 = vmatmul.bf16.gmra.mxu0 %v6392_v23  ;;  %v1756_v2 = vmul.f32 0.6931472, %v4713_v49  ;;  %v4715_v5 = vpop.eup %4714  ;;  %v1769_v42 = vand.u32 2147483647, %v6429_v45 }
 0x161   : > { %1502 = vmatmul.bf16.gmra.mxu1 %v1200_v1  ;;  %4722 = vlog2.f32 %v1763_v24  ;;  %v4717_v33 = vpop.eup %4716  ;;  %v1155_v44 = vmul.f32 0.6931472, %v4715_v5  ;;  %v1767_v50 = vadd.f32 1.0, %v1766_v43  ;;  %v1524_v20 = vmax.f32 %v6408_v41, 0.0 }
 0x162   : > { %v1557_v9 = vand.u32 2147483647, %v6439_v16  ;;  %v1762_v40 = vsel %vm1761_vm5, %v1759_v21, %v1756_v2  ;;  %v4719_v32 = vpop.eup %4718  ;;  %v1146_v62 = vmul.f32 0.6931472, %v4717_v33  ;;  %vm1770_vm10 = vcmp.lt.f32.partialorder %v1769_v42, 0.0004427343 }
 0x163   : > { %v1970_v23 = vadd.f32 %v1762_v40, %v1522_v47  ;;  %v1164_v27 = vmul.f32 0.6931472, %v4719_v32  ;;  %v1161_v38 = vsel %vm6453_vm7, %v1158_v54, %v1155_v44  ;;  %v1768_v6 = vmul.f32 %v6429_v45, %v1767_v50 }
 0x164   : > { %v1589_v8 = vsub.f32 0.0, %v1557_v9  ;;  %v1152_v35 = vsel %vm6457_vm8, %v1149_v11, %v1146_v62  ;;  %v1201_v60 = vpack.c.bf16 %v1161_v38, %v1143_v59  ;;  %v1523_v2 = vmax.f32 %v6371_v55, 0.0 }
 0x165   : > { %v1376_v15 = vpop.f32.mrf.mxu0  ;;  %v1997_v7 = vpack.c.bf16 %v1970_v23, %v1969_v28  ;;  %v1170_v46 = vsel %vm6461_vm9, %v1167_v19, %v1164_v27  ;;  %v1525_v38 = vmax.f32 %v6439_v16, 0.0 }
 0x166   : > { %v1465_v47 = vpop.f32.mrf.mxu1  ;;  %v4721_v39 = vpop.eup %4720  ;;  %v1633_v18 = vmul.f32 1.442695, %v1589_v8  ;;  %v1377_v34 = vadd.f32 %v6434_v61, %v1376_v15  ;;  %v1202_v56 = vpack.c.bf16 %v1170_v46, %v1152_v35 }
 0x167   : > { %2105 = vmatmul.bf16.gmra.mxu2 %v1997_v7  ;;  %v1772_v36 = vadd.f32 1.0, %v4721_v39  ;;  %v1775_v48 = vmul.f32 -0.5, %v4721_v39  ;;  %v4723_v10 = vpop.eup %4722  ;;  %v1778_v0 = vand.u32 2147483647, %v4721_v39 }
 0x168   : > { %4724 = vpow2.f32 %v1633_v18  ;;  %v6467_v57 = vadd.f32 %v1465_v47, %v1377_v34  ;;  %v1765_v37 = vmul.f32 0.6931472, %v4723_v10 }
 0x169   : > { %4726 = vlog2.f32 %v1772_v36  ;;  %v1776_v13 = vadd.f32 1.0, %v1775_v48  ;;  %vm1779_vm11 = vcmp.lt.f32.partialorder %v1778_v0, 0.0004427343 }
 0x16a   : > { %v1558_v12 = vand.u32 2147483647, %v6467_v57  ;;  %v1771_v53 = vsel %vm1770_vm10, %v1768_v6, %v1765_v37  ;;  %v1526_v35 = vmax.f32 %v6467_v57, 0.0  ;;  %v4404_v6 = vld [vmem:[#allocation10 + $0x38] sm:$0xff] }
 0x16b   : > { %v1777_v14 = vmul.f32 %v4721_v39, %v1776_v13  ;;  %v1971_v45 = vadd.f32 %v1771_v53, %v1523_v2  ;;  %2477 = vmatpush.bf16.msra.mxu3 %v4404_v6 }
 0x16c   : > { %v1590_v1 = vsub.f32 0.0, %v1558_v12 }
 0x16d   : > { %v1379_v17 = vpop.f32.mrf.mxu0 }
 0x16e   : > { %v1468_v25 = vpop.f32.mrf.mxu1  ;;  %v4725_v3 = vpop.eup %4724  ;;  %v1635_v4 = vmul.f32 1.442695, %v1590_v1  ;;  %v1380_v58 = vadd.f32 %v6434_v61, %v1379_v17 }
 0x16f   : > { %v4727_v22 = vpop.eup %4726  ;;  %v1781_v49 = vadd.f32 1.0, %v4725_v3  ;;  %v1784_v31 = vmul.f32 -0.5, %v4725_v3  ;;  %v1787_v52 = vand.u32 2147483647, %v4725_v3 }
 0x170   : > { %4728 = vpow2.f32 %v1635_v4  ;;  %v6482_v21 = vadd.f32 %v1468_v25, %v1380_v58  ;;  %1418 = vmatmul.bf16.gmra.mxu0 %v1201_v60  ;;  %v1774_v51 = vmul.f32 0.6931472, %v4727_v22 }
 0x171   : > { %1507 = vmatmul.bf16.gmra.mxu1 %v1202_v56  ;;  %4730 = vlog2.f32 %v1781_v49  ;;  %v1785_v11 = vadd.f32 1.0, %v1784_v31  ;;  %vm1788_vm12 = vcmp.lt.f32.partialorder %v1787_v52, 0.0004427343 }
 0x172   : > { %v1559_v63 = vand.u32 2147483647, %v6482_v21  ;;  %v1780_v29 = vsel %vm1779_vm11, %v1777_v14, %v1774_v51 }
 0x173   : > { %v1972_v24 = vadd.f32 %v1780_v29, %v1524_v20  ;;  %v1786_v62 = vmul.f32 %v4725_v3, %v1785_v11  ;;  %v4402_v11 = vld [vmem:[#allocation10 + $0x28] sm:$0xff] }
 0x174   : > { %v1591_v5 = vsub.f32 0.0, %v1559_v63 }
 0x175   : > { %v1381_v9 = vpop.f32.mrf.mxu0  ;;  %v1998_v28 = vpack.c.bf16 %v1972_v24, %v1971_v45  ;;  %v4403_v45 = vld [vmem:[#allocation10 + $0x30] sm:$0xff] }
 0x176   : > { %v1470_v40 = vpop.f32.mrf.mxu1  ;;  %v4729_v23 = vpop.eup %4728  ;;  %v1637_v54 = vmul.f32 1.442695, %v1591_v5  ;;  %v1382_v30 = vadd.f32 %v6434_v61, %v1381_v9  ;;  %2478 = vmatpush.bf16.msra.mxu3 %v4403_v45 }
 0x177   : > { %2110 = vmatmul.bf16.gmra.mxu2 %v1998_v28  ;;  %v1790_v55 = vadd.f32 1.0, %v4729_v23  ;;  %v4731_v33 = vpop.eup %4730  ;;  %v1793_v8 = vmul.f32 -0.5, %v4729_v23  ;;  %v1796_v19 = vand.u32 2147483647, %v4729_v23 }
 0x178   : > { %4732 = vpow2.f32 %v1637_v54  ;;  %v6488_v41 = vadd.f32 %v1470_v40, %v1382_v30  ;;  %v1783_v32 = vmul.f32 0.6931472, %v4731_v33  ;;  %v1527_v33 = vmax.f32 %v6482_v21, 0.0  ;;  %v4397_v40 = vld [vmem:[#allocation10] sm:$0xff] }
 0x179   : > { %4734 = vlog2.f32 %v1790_v55  ;;  %v1794_v47 = vadd.f32 1.0, %v1793_v8  ;;  %vm1797_vm13 = vcmp.lt.f32.partialorder %v1796_v19, 0.0004427343 }
 0x17a   : > { %v1560_v26 = vand.u32 2147483647, %v6488_v41  ;;  %v1789_v43 = vsel %vm1788_vm12, %v1786_v62, %v1783_v32  ;;  %v1528_v8 = vmax.f32 %v6488_v41, 0.0  ;;  %2479 = vmatpush.bf16.msra.mxu3 %v4402_v11 }
 0x17b   : > { %v1795_v10 = vmul.f32 %v4729_v23, %v1794_v47  ;;  %v1973_v50 = vadd.f32 %v1789_v43, %v1525_v38 }
 0x17c   : > { %v1592_v15 = vsub.f32 0.0, %v1560_v26 }
 0x17d   : > { %v1384_v7 = vpop.f32.mrf.mxu0 }
 0x17e   : > { %v1473_v44 = vpop.f32.mrf.mxu1  ;;  %v4733_v39 = vpop.eup %4732  ;;  %v1639_v18 = vmul.f32 1.442695, %v1592_v15  ;;  %v1385_v34 = vadd.f32 %v6434_v61, %v1384_v7 }
 0x17f   : > { %v4735_v27 = vpop.eup %4734  ;;  %v1799_v36 = vadd.f32 1.0, %v4733_v39  ;;  %v1802_v37 = vmul.f32 -0.5, %v4733_v39  ;;  %v1805_v14 = vand.u32 2147483647, %v4733_v39 }
 0x180   : > { %4736 = vpow2.f32 %v1639_v18  ;;  %v6492_v48 = vadd.f32 %v1473_v44, %v1385_v34  ;;  %v1792_v59 = vmul.f32 0.6931472, %v4735_v27 }
 0x181   : > { %4738 = vlog2.f32 %v1799_v36  ;;  %v1803_v58 = vadd.f32 1.0, %v1802_v37  ;;  %vm6502_vm14 = vcmp.lt.f32.partialorder %v1805_v14, 0.0004427343 }
 0x182   : > { %v1561_v46 = vand.u32 2147483647, %v6492_v48  ;;  %v1798_v12 = vsel %vm1797_vm13, %v1795_v10, %v1792_v59  ;;  %v4400_v10 = vld [vmem:[#allocation10 + $0x18] sm:$0xff]  ;;  %v1529_v14 = vmax.f32 %v6492_v48, 0.0 }
 0x183   : > { %v1974_v42 = vadd.f32 %v1798_v12, %v1526_v35  ;;  %v1804_v63 = vmul.f32 %v4733_v39, %v1803_v58  ;;  %v4401_v39 = vld [vmem:[#allocation10 + $0x20] sm:$0xff] }
 0x184   : > { %v1593_v13 = vsub.f32 0.0, %v1561_v46  ;;  %2480 = vmatpush.bf16.msra.mxu3 %v4401_v39 }
 0x185   : > { %v1386_v1 = vpop.f32.mrf.mxu0  ;;  %v1999_v56 = vpack.c.bf16 %v1974_v42, %v1973_v50 }
 0x186   : > { %v1475_v60 = vpop.f32.mrf.mxu1  ;;  %v4737_v17 = vpop.eup %4736  ;;  %v1641_v25 = vmul.f32 1.442695, %v1593_v13  ;;  %v1387_v0 = vadd.f32 %v6434_v61, %v1386_v1 }
 0x187   : > { %2115 = vmatmul.bf16.gmra.mxu2 %v1999_v56  ;;  %v1808_v16 = vadd.f32 1.0, %v4737_v17  ;;  %v4739_v3 = vpop.eup %4738  ;;  %v1811_v4 = vmul.f32 -0.5, %v4737_v17  ;;  %v1814_v29 = vand.u32 2147483647, %v4737_v17  ;;  %v4399_v56 = vld [vmem:[#allocation10 + $0x10] sm:$0xff] }
 0x188   : > { %4740 = vpow2.f32 %v1641_v25  ;;  %v6498_v57 = vadd.f32 %v1475_v60, %v1387_v0  ;;  %v1801_v49 = vmul.f32 0.6931472, %v4739_v3  ;;  %2481 = vmatpush.bf16.msra.mxu3 %v4400_v10 }
 0x189   : > { %4742 = vlog2.f32 %v1808_v16  ;;  %v1812_v51 = vadd.f32 1.0, %v1811_v4  ;;  %vm1815_vm15 = vcmp.lt.f32.partialorder %v1814_v29, 0.0004427343 }
 0x18a   : > { %v1562_v22 = vand.u32 2147483647, %v6498_v57  ;;  %v1807_v31 = vsel %vm6502_vm14, %v1804_v63, %v1801_v49  ;;  %v1530_v49 = vmax.f32 %v6498_v57, 0.0  ;;  %v6533_v57 = vld [vmem:[%s7687_s5] ss:$0 sm:$0xff] }
 0x18b   : > { %v1813_v55 = vmul.f32 %v4737_v17, %v1812_v51  ;;  %v1975_v32 = vadd.f32 %v1807_v31, %v1527_v33 }
 0x18c   : > { %v1594_v53 = vsub.f32 0.0, %v1562_v22  ;;  %2482 = vmatpush.bf16.msra.mxu3 %v4399_v56 }
 0x18d   : > { %v1389_v2 = vpop.f32.mrf.mxu0 }
 0x18e   : > { %v1478_v20 = vpop.f32.mrf.mxu1  ;;  %v4741_v24 = vpop.eup %4740  ;;  %v1643_v5 = vmul.f32 1.442695, %v1594_v53  ;;  %v1390_v9 = vadd.f32 %v6434_v61, %v1389_v2  ;;  %v4398_v53 = vld [vmem:[#allocation10 + $0x8] sm:$0xff] }
 0x18f   : > { %v4743_v28 = vpop.eup %4742  ;;  %v1817_v23 = vadd.f32 1.0, %v4741_v24  ;;  %v1820_v19 = vmul.f32 -0.5, %v4741_v24  ;;  %v1823_v35 = vand.u32 2147483647, %v4741_v24 }
 0x190   : > { %4744 = vpow2.f32 %v1643_v5  ;;  %v6508_v54 = vadd.f32 %v1478_v20, %v1390_v9  ;;  %v1810_v30 = vmul.f32 0.6931472, %v4743_v28  ;;  %2483 = vmatpush.bf16.msra.mxu3 %v4398_v53 }
 0x191   : > { %4746 = vlog2.f32 %v1817_v23  ;;  %v1821_v59 = vadd.f32 1.0, %v1820_v19  ;;  %vm6518_vm0 = vcmp.lt.f32.partialorder %v1823_v35, 0.0004427343 }
 0x192   : > { %v1563_v26 = vand.u32 2147483647, %v6508_v54  ;;  %v1816_v52 = vsel %vm1815_vm15, %v1813_v55, %v1810_v30 }
 0x193   : > { %v1976_v15 = vadd.f32 %v1816_v52, %v1528_v8  ;;  %v1822_v1 = vmul.f32 %v4741_v24, %v1821_v59 }
 0x194   : > { %v1595_v47 = vsub.f32 0.0, %v1563_v26  ;;  %2484 = vmatpush.bf16.msra.mxu3 %v4397_v40 }
 0x195   : > { %v1391_v7 = vpop.f32.mrf.mxu0  ;;  %v2000_v62 = vpack.c.bf16 %v1976_v15, %v1975_v32 }
 0x196   : > { %v1480_v44 = vpop.f32.mrf.mxu1  ;;  %v4745_v18 = vpop.eup %4744  ;;  %v1645_v34 = vmul.f32 1.442695, %v1595_v47  ;;  %v1392_v21 = vadd.f32 %v6434_v61, %v1391_v7 }
 0x197   : > { %2120 = vmatmul.bf16.gmra.mxu2 %v2000_v62  ;;  %v1826_v41 = vadd.f32 1.0, %v4745_v18  ;;  %v4747_v27 = vpop.eup %4746  ;;  %v1829_v36 = vmul.f32 -0.5, %v4745_v18  ;;  %v1832_v60 = vand.u32 2147483647, %v4745_v18 }
 0x198   : > { %4748 = vpow2.f32 %v1645_v34  ;;  %v6514_v43 = vadd.f32 %v1480_v44, %v1392_v21  ;;  %v1819_v46 = vmul.f32 0.6931472, %v4747_v27 }
 0x199   : > { %4750 = vlog2.f32 %v1826_v41  ;;  %v1830_v50 = vadd.f32 1.0, %v1829_v36  ;;  %vm1833_vm1 = vcmp.lt.f32.partialorder %v1832_v60, 0.0004427343 }
 0x19a   : > { %v1564_v38 = vand.u32 2147483647, %v6514_v43  ;;  %v1825_v3 = vsel %vm6518_vm0, %v1822_v1, %v1819_v46 }
 0x19b   : > { %v1831_v22 = vmul.f32 %v4745_v18, %v1830_v50  ;;  %v1977_v20 = vadd.f32 %v1825_v3, %v1529_v14  ;;  %v1532_v50 = vmax.f32 %v6514_v43, 0.0  ;;  %v2198_v14 = vlaneseq }
 0x19c   : > { %v1596_v12 = vsub.f32 0.0, %v1564_v38 }
 0x19d   : > { %v1394_v42 = vpop.f32.mrf.mxu0 }
 0x19e   : > { %v1483_v13 = vpop.f32.mrf.mxu1  ;;  %v4749_v37 = vpop.eup %4748  ;;  %v1647_v17 = vmul.f32 1.442695, %v1596_v12  ;;  %v1395_v25 = vadd.f32 %v6434_v61, %v1394_v42  ;;  %v1531_v12 = vmax.f32 %v6508_v54, 0.0 }
 0x19f   : > { %v4751_v16 = vpop.eup %4750  ;;  %v1835_v4 = vadd.f32 1.0, %v4749_v37  ;;  %v1838_v9 = vmul.f32 -0.5, %v4749_v37  ;;  %v1841_v52 = vand.u32 2147483647, %v4749_v37 }
 0x1a0   : > { %4752 = vpow2.f32 %v1647_v17  ;;  %v6524_v58 = vadd.f32 %v1483_v13, %v1395_v25  ;;  %v1828_v6 = vmul.f32 0.6931472, %v4751_v16 }
 0x1a1   : > { %4754 = vlog2.f32 %v1835_v4  ;;  %v1839_v8 = vadd.f32 1.0, %v1838_v9  ;;  %vm6551_vm2 = vcmp.lt.f32.partialorder %v1841_v52, 0.0004427343  ;;  %v2201_v9 = vld [vmem:[%s5658_s30] sm:$0xff] }
 0x1a2   : > { %v1565_v51 = vand.u32 2147483647, %v6524_v58  ;;  %v1834_v2 = vsel %vm1833_vm1, %v1831_v22, %v1828_v6 }
 0x1a3   : > { %v1978_v63 = vadd.f32 %v1834_v2, %v1530_v49  ;;  %v1840_v39 = vmul.f32 %v4749_v37, %v1839_v8 }
 0x1a4   : > { %v1597_v29 = vsub.f32 0.0, %v1565_v51 }
 0x1a5   : > { %v1396_v45 = vpop.f32.mrf.mxu0  ;;  %v2001_v5 = vpack.c.bf16 %v1978_v63, %v1977_v20 }
 0x1a6   : > { %v1485_v24 = vpop.f32.mrf.mxu1  ;;  %v4753_v28 = vpop.eup %4752  ;;  %v1649_v31 = vmul.f32 1.442695, %v1597_v29  ;;  %v1397_v48 = vadd.f32 %v6434_v61, %v1396_v45 }
 0x1a7   : > { %2125 = vmatmul.bf16.gmra.mxu2 %v2001_v5  ;;  %v1844_v23 = vadd.f32 1.0, %v4753_v28  ;;  %v4755_v30 = vpop.eup %4754  ;;  %v1847_v33 = vmul.f32 -0.5, %v4753_v28  ;;  %v1850_v18 = vand.u32 2147483647, %v4753_v28  ;;  %v6575_v5 = vand.u32 127, %v2198_v14 }
 0x1a8   : > { %4756 = vpow2.f32 %v1649_v31  ;;  %v6535_v55 = vadd.f32 %v1485_v24, %v1397_v48  ;;  %v1837_v15 = vmul.f32 0.6931472, %v4755_v30  ;;  %v4347_v48 = vld [vmem:[#allocation11 + $0xe0] sm:$0xf]  ;;  %v4433_v30 = vld [vmem:[#allocation11 + $0xe4] sm:$0xf] }
 0x1a9   : > { %4758 = vlog2.f32 %v1844_v23  ;;  %v1848_v7 = vadd.f32 1.0, %v1847_v33  ;;  %vm1851_vm3 = vcmp.lt.f32.partialorder %v1850_v18, 0.0004427343  ;;  %v4435_v23 = vld [vmem:[#allocation11 + $0xec] sm:$0xf0]  ;;  %vm2200_vm5 = vcmp.lt.s32.totalorder %v6575_v5, 64 }
 0x1aa   : > { %v1566_v11 = vand.u32 2147483647, %v6535_v55  ;;  %v2086_v26 = vpop.f32.mrf.mxu2  ;;  %v1843_v59 = vsel %vm6551_vm2, %v1840_v39, %v1837_v15  ;;  %v4348_v8 = vor.u32 %v4435_v23, %v4347_v48 }
 0x1ab   : > { %v6539_v32 = vadd.f32 %v6533_v57, %v2086_v26  ;;  %v1849_v46 = vmul.f32 %v4753_v28, %v1848_v7  ;;  %v1979_v37 = vadd.f32 %v1843_v59, %v1531_v12  ;;  %v1533_v59 = vmax.f32 %v6524_v58, 0.0 }
 0x1ac   : > { %v1598_v47 = vsub.f32 0.0, %v1566_v11  ;;  %v4349_v11 = vld [vmem:[#allocation11 + $0xf0] sm:$0xf0]  ;;  %3264 = vmatpush.bf16.msrb.mxu0 %v4348_v8 }
 0x1ad   : > { %2166 = vst [vmem:[%s6543_s13] sm:$0xff] %v6539_v32  ;;  %v2233_v44 = vmul.f32 0.5, %v6539_v32  ;;  %v1399_v62 = vpop.f32.mrf.mxu0  ;;  %v4352_v7 = vor.u32 %v4433_v30, %v4349_v11  ;;  %v2203_v11 = vld [vmem:[%s5658_s30 + $0x10] sm:$0xff] }
 0x1ae   : > { %v1488_v19 = vpop.f32.mrf.mxu1  ;;  %v6548_v34 = vpop.eup %4756  ;;  %v1651_v21 = vmul.f32 1.442695, %v1598_v47  ;;  %v1400_v41 = vadd.f32 %v6434_v61, %v1399_v62 }
 0x1af   : > { %v4759_v36 = vpop.eup %4758  ;;  %v1853_v10 = vadd.f32 1.0, %v6548_v34  ;;  %v2265_v42 = vmul.f32 1.442695, %v2233_v44  ;;  %v1856_v3 = vmul.f32 -0.5, %v6548_v34  ;;  %v1859_v20 = vand.u32 2147483647, %v6548_v34  ;;  %3353 = vmatpush.bf16.msrb.mxu1 %v4352_v7 }
 0x1b0   : > { %4760 = vpow2.f32 %v1651_v21  ;;  %v6558_v38 = vadd.f32 %v1488_v19, %v1400_v41  ;;  %v1846_v35 = vmul.f32 0.6931472, %v4759_v36  ;;  %v2202_v44 = vld [vmem:[%s5658_s30 + $0x8] sm:$0xff] }
 0x1b1   : > { %4762 = vlog2.f32 %v1853_v10  ;;  %v1857_v63 = vadd.f32 1.0, %v1856_v3  ;;  %vm6581_vm4 = vcmp.lt.f32.partialorder %v1859_v20, 0.0004427343 }
 0x1b2   : > { %v1567_v13 = vand.u32 2147483647, %v6558_v38  ;;  %v2088_v1 = vpop.f32.mrf.mxu2  ;;  %v1852_v60 = vsel %vm1851_vm3, %v1849_v46, %v1846_v35  ;;  %4764 = vpow2.f32 %v2265_v42  ;;  %v1535_v7 = vmax.f32 %v6558_v38, 0.0 }
 0x1b3   : > { %v6564_v56 = vadd.f32 %v6533_v57, %v2088_v1  ;;  %v1980_v17 = vadd.f32 %v1852_v60, %v1532_v50  ;;  %v1858_v62 = vmul.f32 %v6548_v34, %v1857_v63  ;;  %v1534_v50 = vmax.f32 %v6535_v55, 0.0 }
 0x1b4   : > { %v1599_v25 = vsub.f32 0.0, %v1567_v13 }
 0x1b5   : > { %2167 = vst [vmem:[%s6543_s13 + $0x8] sm:$0xff] %v6564_v56  ;;  %v2234_v54 = vmul.f32 0.5, %v6564_v56  ;;  %v1401_v0 = vpop.f32.mrf.mxu0  ;;  %v2002_v16 = vpack.c.bf16 %v1980_v17, %v1979_v37 }
 0x1b6   : > { %v1490_v43 = vpop.f32.mrf.mxu1  ;;  %v4761_v4 = vpop.eup %4760  ;;  %v1653_v6 = vmul.f32 1.442695, %v1599_v25  ;;  %v1402_v22 = vadd.f32 %v6434_v61, %v1401_v0  ;;  %v4436_v0 = vld [vmem:[#allocation11 + $0xf4] sm:$0xf0] }
 0x1b7   : > { %v2267_v49 = vmul.f32 1.442695, %v2234_v54  ;;  %2130 = vmatmul.bf16.gmra.mxu2 %v2002_v16  ;;  %v1862_v53 = vadd.f32 1.0, %v4761_v4  ;;  %v4763_v51 = vpop.eup %4762  ;;  %v1865_v29 = vmul.f32 -0.5, %v4761_v4  ;;  %v1868_v27 = vand.u32 2147483647, %v4761_v4 }
 0x1b8   : > { %4766 = vpow2.f32 %v1653_v6  ;;  %v6571_v2 = vadd.f32 %v1490_v43, %v1402_v22  ;;  %v1855_v40 = vmul.f32 0.6931472, %v4763_v51  ;;  %v4765_v28 = vpop.eup %4764  ;;  %v4355_v54 = vld [vmem:[#allocation11 + $0xe8] sm:$0xf]  ;;  %v4434_v43 = vld [vmem:[#allocation11 + $0xec] sm:$0xf] }
 0x1b9   : > { %4768 = vpow2.f32 %v2267_v49  ;;  %v1866_v19 = vadd.f32 1.0, %v1865_v29  ;;  %v2329_v41 = vmul.f32 %v4765_v28, %v2201_v9  ;;  %vm1869_vm6 = vcmp.lt.f32.partialorder %v1868_v27, 0.0004427343  ;;  %v4357_v22 = vld [vmem:[#allocation11 + $0xf8] sm:$0xf0] }
 0x1ba   : > { %v1568_v45 = vand.u32 2147483647, %v6571_v2  ;;  %v2091_v24 = vpop.f32.mrf.mxu2  ;;  %4770 = vlog2.f32 %v1862_v53  ;;  %v1861_v10 = vsel %vm6581_vm4, %v1858_v62, %v1855_v40  ;;  %v4356_v6 = vor.u32 %v4436_v0, %v4355_v54 }
 0x1bb   : > { %v6579_v31 = vadd.f32 %v6533_v57, %v2091_v24  ;;  %v1867_v1 = vmul.f32 %v4761_v4, %v1866_v19  ;;  %v2361_v37 = vsel %vm2200_vm5, %v6539_v32, %v2329_v41  ;;  %v1981_v3 = vadd.f32 %v1861_v10, %v1533_v59  ;;  %v2204_v19 = vld [vmem:[%s5658_s30 + $0x18] sm:$0xff] }
 0x1bc   : > { %v1600_v33 = vsub.f32 0.0, %v1568_v45  ;;  %v4360_v53 = vor.u32 %v4434_v43, %v4357_v22  ;;  %3442 = vmatpush.bf16.msrb.mxu2 %v4356_v6 }
 0x1bd   : > { %2168 = vst [vmem:[%s6543_s13 + $0x10] sm:$0xff] %v6579_v31  ;;  %v2235_v52 = vmul.f32 0.5, %v6579_v31  ;;  %v1404_v15 = vpop.f32.mrf.mxu0 }
 0x1be   : > { %v1493_v47 = vpop.f32.mrf.mxu1  ;;  %v6590_v39 = vpop.eup %4766  ;;  %v1655_v18 = vmul.f32 1.442695, %v1600_v33  ;;  %v1405_v21 = vadd.f32 %v6434_v61, %v1404_v15  ;;  %3531 = vmatpush.bf16.msrb.mxu3 %v4360_v53 }
 0x1bf   : > { %v4769_v36 = vpop.eup %4768  ;;  %v1871_v12 = vadd.f32 1.0, %v6590_v39  ;;  %v2269_v42 = vmul.f32 1.442695, %v2235_v52  ;;  %v1874_v24 = vmul.f32 -0.5, %v6590_v39  ;;  %v1877_v52 = vand.u32 2147483647, %v6590_v39 }
 0x1c0   : > { %v4771_v35 = vpop.eup %4770  ;;  %4772 = vpow2.f32 %v1655_v18  ;;  %v6597_v34 = vadd.f32 %v1493_v47, %v1405_v21  ;;  %v2330_v46 = vmul.f32 %v4769_v36, %v2202_v44 }
 0x1c1   : > { %v1864_v13 = vmul.f32 0.6931472, %v4771_v35  ;;  %4774 = vlog2.f32 %v1871_v12  ;;  %v1875_v26 = vadd.f32 1.0, %v1874_v24  ;;  %vm6635_vm7 = vcmp.lt.f32.partialorder %v1877_v52, 0.0004427343 }
 0x1c2   : > { %v1569_v58 = vand.u32 2147483647, %v6597_v34  ;;  %v2093_v60 = vpop.f32.mrf.mxu2  ;;  %v2362_v17 = vsel %vm2200_vm5, %v6564_v56, %v2330_v46  ;;  %4776 = vpow2.f32 %v2269_v42  ;;  %v1536_v46 = vmax.f32 %v6571_v2, 0.0 }
 0x1c3   : > { %v6609_v25 = vadd.f32 %v6533_v57, %v2093_v60  ;;  %v2393_v55 = vpack.c.bf16 %v2362_v17, %v2361_v37  ;;  %v1870_v16 = vsel %vm1869_vm6, %v1867_v1, %v1864_v13  ;;  %v1876_v12 = vmul.f32 %v6590_v39, %v1875_v26  ;;  %v4429_v26 = vld [vmem:[#allocation11 + $0xc4] sm:$0xf] }
 0x1c4   : > { %v1601_v4 = vsub.f32 0.0, %v1569_v58  ;;  %v1982_v14 = vadd.f32 %v1870_v16, %v1534_v50  ;;  %v1537_v50 = vmax.f32 %v6597_v34, 0.0 }
 0x1c5   : > { %2169 = vst [vmem:[%s6543_s13 + $0x18] sm:$0xff] %v6609_v25  ;;  %v2236_v32 = vmul.f32 0.5, %v6609_v25  ;;  %v1406_v56 = vpop.f32.mrf.mxu0  ;;  %2485 = vmatmul.bf16.vlgmr.msra.gmra.mxu3 %v2393_v55 }
 0x1c6   : > { %v1495_v49 = vpop.f32.mrf.mxu1  ;;  %v4773_v51 = vpop.eup %4772  ;;  %v1657_v20 = vmul.f32 1.442695, %v1601_v4  ;;  %v1407_v63 = vadd.f32 %v6434_v61, %v1406_v56  ;;  %v2003_v29 = vpack.c.bf16 %v1982_v14, %v1981_v3 }
 0x1c7   : > { %v2271_v45 = vmul.f32 1.442695, %v2236_v32  ;;  %v1880_v9 = vadd.f32 1.0, %v4773_v51  ;;  %v1883_v28 = vmul.f32 -0.5, %v4773_v51  ;;  %v4775_v48 = vpop.eup %4774  ;;  %v1886_v47 = vand.u32 2147483647, %v4773_v51 }
 0x1c8   : > { %4778 = vpow2.f32 %v1657_v20  ;;  %v6616_v40 = vadd.f32 %v1495_v49, %v1407_v63  ;;  %2135 = vmatmul.bf16.gmra.mxu2 %v2003_v29  ;;  %v4777_v33 = vpop.eup %4776  ;;  %v1873_v18 = vmul.f32 0.6931472, %v4775_v48 }
 0x1c9   : > { %4780 = vpow2.f32 %v2271_v45  ;;  %v1884_v21 = vadd.f32 1.0, %v1883_v28  ;;  %v2331_v10 = vmul.f32 %v4777_v33, %v2203_v11  ;;  %vm1887_vm8 = vcmp.lt.f32.partialorder %v1886_v47, 0.0004427343  ;;  %v4331_v33 = vld [vmem:[#allocation11 + $0xc0] sm:$0xf] }
 0x1ca   : > { %v1570_v23 = vand.u32 2147483647, %v6616_v40  ;;  %v2096_v30 = vpop.f32.mrf.mxu2  ;;  %4782 = vlog2.f32 %v1880_v9  ;;  %v1879_v58 = vsel %vm6635_vm7, %v1876_v12, %v1873_v18  ;;  %v4431_v11 = vld [vmem:[#allocation11 + $0xcc] sm:$0xf0]  ;;  %v2206_v12 = vld [vmem:[%s5658_s30 + $0x28] sm:$0xff] }
 0x1cb   : > { %v6620_v8 = vadd.f32 %v6533_v57, %v2096_v30  ;;  %v1885_v60 = vmul.f32 %v4773_v51, %v1884_v21  ;;  %v2363_v55 = vsel %vm2200_vm5, %v6579_v31, %v2331_v10  ;;  %v1983_v4 = vadd.f32 %v1879_v58, %v1535_v7 }
 0x1cc   : > { %v1602_v15 = vsub.f32 0.0, %v1570_v23  ;;  %v4332_v7 = vor.u32 %v4431_v11, %v4331_v33 }
 0x1cd   : > { %2170 = vst [vmem:[%s6543_s13 + $0x20] sm:$0xff] %v6620_v8  ;;  %v1409_v44 = vpop.f32.mrf.mxu0  ;;  %v2237_v36 = vmul.f32 0.5, %v6620_v8 }
 0x1ce   : > { %v1498_v62 = vpop.f32.mrf.mxu1  ;;  %v6628_v41 = vpop.eup %4778  ;;  %v1659_v27 = vmul.f32 1.442695, %v1602_v15  ;;  %v1410_v59 = vadd.f32 %v6434_v61, %v1409_v44  ;;  %v4333_v44 = vld [vmem:[#allocation11 + $0xd0] sm:$0xf0]  ;;  %3265 = vmatpush.bf16.msrb.mxu0 %v4332_v7 }
 0x1cf   : > { %v4781_v35 = vpop.eup %4780  ;;  %v1889_v38 = vadd.f32 1.0, %v6628_v41  ;;  %v2273_v37 = vmul.f32 1.442695, %v2237_v36  ;;  %v1892_v22 = vmul.f32 -0.5, %v6628_v41  ;;  %v1895_v28 = vand.u32 2147483647, %v6628_v41 }
 0x1d0   : > { %v4783_v42 = vpop.eup %4782  ;;  %4784 = vpow2.f32 %v1659_v27  ;;  %v6639_v13 = vadd.f32 %v1498_v62, %v1410_v59  ;;  %v2332_v1 = vmul.f32 %v4781_v35, %v2204_v19  ;;  %v2205_v62 = vld [vmem:[%s5658_s30 + $0x20] sm:$0xff]  ;;  %v4336_v36 = vor.u32 %v4429_v26, %v4333_v44 }
 0x1d1   : > { %4786 = vlog2.f32 %v1889_v38  ;;  %v1882_v2 = vmul.f32 0.6931472, %v4783_v42  ;;  %v1893_v24 = vadd.f32 1.0, %v1892_v22  ;;  %vm6671_vm9 = vcmp.lt.f32.partialorder %v1895_v28, 0.0004427343 }
 0x1d2   : > { %v1571_v39 = vand.u32 2147483647, %v6639_v13  ;;  %v2098_v17 = vpop.f32.mrf.mxu2  ;;  %v2364_v54 = vsel %vm2200_vm5, %v6609_v25, %v2332_v1  ;;  %4788 = vpow2.f32 %v2273_v37  ;;  %3354 = vmatpush.bf16.msrb.mxu1 %v4336_v36  ;;  %v4339_v22 = vld [vmem:[#allocation11 + $0xc8] sm:$0xf]  ;;  %v2207_v36 = vld [vmem:[%s5658_s30 + $0x30] sm:$0xff] }
 0x1d3   : > { %v6651_v0 = vadd.f32 %v6533_v57, %v2098_v17  ;;  %v2394_v43 = vpack.c.bf16 %v2364_v54, %v2363_v55  ;;  %v1888_v16 = vsel %vm1887_vm8, %v1885_v60, %v1882_v2  ;;  %v1894_v19 = vmul.f32 %v6628_v41, %v1893_v24 }
 0x1d4   : > { %v1603_v3 = vsub.f32 0.0, %v1571_v39  ;;  %v1984_v6 = vadd.f32 %v1888_v16, %v1536_v46 }
 0x1d5   : > { %2171 = vst [vmem:[%s6543_s13 + $0x28] sm:$0xff] %v6651_v0  ;;  %v2238_v14 = vmul.f32 0.5, %v6651_v0  ;;  %v1411_v32 = vpop.f32.mrf.mxu0  ;;  %2490 = vmatmul.bf16.gmra.mxu3 %v2394_v43 }
 0x1d6   : > { %v1500_v31 = vpop.f32.mrf.mxu1  ;;  %v4785_v56 = vpop.eup %4784  ;;  %v1661_v25 = vmul.f32 1.442695, %v1603_v3  ;;  %v1412_v49 = vadd.f32 %v6434_v61, %v1411_v32  ;;  %v2004_v53 = vpack.c.bf16 %v1984_v6, %v1983_v4  ;;  %v4430_v32 = vld [vmem:[#allocation11 + $0xcc] sm:$0xf] }
 0x1d7   : > { %v4787_v51 = vpop.eup %4786  ;;  %v1898_v20 = vadd.f32 1.0, %v4785_v56  ;;  %v2275_v63 = vmul.f32 1.442695, %v2238_v14  ;;  %v1901_v29 = vmul.f32 -0.5, %v4785_v56  ;;  %v1904_v18 = vand.u32 2147483647, %v4785_v56 }
 0x1d8   : > { %4790 = vpow2.f32 %v1661_v25  ;;  %v6658_v45 = vadd.f32 %v1500_v31, %v1412_v49  ;;  %2140 = vmatmul.bf16.gmra.mxu2 %v2004_v53  ;;  %v1891_v9 = vmul.f32 0.6931472, %v4787_v51  ;;  %v4789_v52 = vpop.eup %4788  ;;  %v4432_v14 = vld [vmem:[#allocation11 + $0xd4] sm:$0xf0]  ;;  %v4341_v53 = vld [vmem:[#allocation11 + $0xd8] sm:$0xf0] }
 0x1d9   : > { %4792 = vlog2.f32 %v1898_v20  ;;  %v1902_v15 = vadd.f32 1.0, %v1901_v29  ;;  %v2333_v58 = vmul.f32 %v4789_v52, %v2205_v62  ;;  %vm1905_vm10 = vcmp.lt.f32.partialorder %v1904_v18, 0.0004427343 }
 0x1da   : > { %4794 = vpow2.f32 %v2275_v63  ;;  %v1572_v48 = vand.u32 2147483647, %v6658_v45  ;;  %v2101_v23 = vpop.f32.mrf.mxu2  ;;  %v1897_v42 = vsel %vm6671_vm9, %v1894_v19, %v1891_v9  ;;  %v4340_v49 = vor.u32 %v4432_v14, %v4339_v22  ;;  %v6702_v9 = vld [vmem:[%s7685_s3] ss:$0 sm:$0xff] }
 0x1db   : > { %v6663_v30 = vadd.f32 %v6533_v57, %v2101_v23  ;;  %v1903_v37 = vmul.f32 %v4785_v56, %v1902_v15  ;;  %v1985_v55 = vadd.f32 %v1897_v42, %v1537_v50  ;;  %v2365_v6 = vsel %vm2200_vm5, %v6620_v8, %v2333_v58 }
 0x1dc   : > { %v1604_v47 = vsub.f32 0.0, %v1572_v48  ;;  %v4344_v8 = vor.u32 %v4430_v32, %v4341_v53  ;;  %3443 = vmatpush.bf16.msrb.mxu2 %v4340_v49 }
 0x1dd   : > { %2172 = vst [vmem:[%s6543_s13 + $0x30] sm:$0xff] %v6663_v30  ;;  %v1414_v21 = vpop.f32.mrf.mxu0  ;;  %v2239_v46 = vmul.f32 0.5, %v6663_v30 }
 0x1de   : > { %v1503_v27 = vpop.f32.mrf.mxu1  ;;  %v6669_v59 = vpop.eup %4790  ;;  %v1663_v35 = vmul.f32 1.442695, %v1604_v47  ;;  %v1415_v38 = vadd.f32 %v6434_v61, %v1414_v21  ;;  %v1538_v61 = vmax.f32 %v6616_v40, 0.0  ;;  %3532 = vmatpush.bf16.msrb.mxu3 %v4344_v8  ;;  %v4323_v8 = vld [vmem:[#allocation11 + $0xa8] sm:$0xf] }
 0x1df   : > { %v4793_v41 = vpop.eup %4792  ;;  %v1907_v1 = vadd.f32 1.0, %v6669_v59  ;;  %v2277_v54 = vmul.f32 1.442695, %v2239_v46  ;;  %v1910_v31 = vmul.f32 -0.5, %v6669_v59  ;;  %v1913_v15 = vand.u32 2147483647, %v6669_v59 }
 0x1e0   : > { %v4795_v2 = vpop.eup %4794  ;;  %v1900_v60 = vmul.f32 0.6931472, %v4793_v41  ;;  %4796 = vpow2.f32 %v1663_v35  ;;  %v6682_v39 = vadd.f32 %v1503_v27, %v1415_v38 }
 0x1e1   : > { %4798 = vlog2.f32 %v1907_v1  ;;  %v2334_v17 = vmul.f32 %v4795_v2, %v2206_v12  ;;  %v1911_v11 = vadd.f32 1.0, %v1910_v31  ;;  %vm6714_vm11 = vcmp.lt.f32.partialorder %v1913_v15, 0.0004427343  ;;  %v2208_v1 = vld [vmem:[%s5658_s30 + $0x38] sm:$0xff]  ;;  %v4315_v31 = vld [vmem:[#allocation11 + $0xa0] sm:$0xf] }
 0x1e2   : > { %v1906_v34 = vsel %vm1905_vm10, %v1903_v37, %v1900_v60  ;;  %v1573_v43 = vand.u32 2147483647, %v6682_v39  ;;  %v2103_v16 = vpop.f32.mrf.mxu2  ;;  %4800 = vpow2.f32 %v2277_v54  ;;  %v1539_v2 = vmax.f32 %v6639_v13, 0.0 }
 0x1e3   : > { %v1986_v3 = vadd.f32 %v1906_v34, %v1538_v61  ;;  %v6687_v4 = vadd.f32 %v6533_v57, %v2103_v16  ;;  %v2366_v40 = vsel %vm2200_vm5, %v6651_v0, %v2334_v17  ;;  %v1912_v18 = vmul.f32 %v6669_v59, %v1911_v11 }
 0x1e4   : > { %v1605_v56 = vsub.f32 0.0, %v1573_v43  ;;  %v2395_v25 = vpack.c.bf16 %v2366_v40, %v2365_v6  ;;  %v1540_v43 = vmax.f32 %v6658_v45, 0.0 }
 0x1e5   : > { %2173 = vst [vmem:[%s6543_s13 + $0x38] sm:$0xff] %v6687_v4  ;;  %v2240_v51 = vmul.f32 0.5, %v6687_v4  ;;  %v1416_v20 = vpop.f32.mrf.mxu0  ;;  %v2005_v29 = vpack.c.bf16 %v1986_v3, %v1985_v55 }
 0x1e6   : > { %v1505_v63 = vpop.f32.mrf.mxu1  ;;  %v4797_v24 = vpop.eup %4796  ;;  %v1665_v0 = vmul.f32 1.442695, %v1605_v56  ;;  %v1417_v28 = vadd.f32 %v6702_v9, %v1416_v20  ;;  %2495 = vmatmul.bf16.gmra.mxu3 %v2395_v25  ;;  %v4427_v56 = vld [vmem:[#allocation11 + $0xac] sm:$0xf0]  ;;  %v4425_v25 = vld [vmem:[#allocation11 + $0xa4] sm:$0xf] }
 0x1e7   : > { %v4799_v48 = vpop.eup %4798  ;;  %v1916_v23 = vadd.f32 1.0, %v4797_v24  ;;  %v2279_v33 = vmul.f32 1.442695, %v2240_v51  ;;  %v1919_v26 = vmul.f32 -0.5, %v4797_v24  ;;  %v1922_v35 = vand.u32 2147483647, %v4797_v24 }
 0x1e8   : > { %4802 = vpow2.f32 %v1665_v0  ;;  %v6705_v52 = vadd.f32 %v1505_v63, %v1417_v28  ;;  %2145 = vmatmul.bf16.gmra.mxu2 %v2005_v29  ;;  %v1909_v47 = vmul.f32 0.6931472, %v4799_v48  ;;  %v4801_v19 = vpop.eup %4800  ;;  %v4316_v20 = vor.u32 %v4427_v56, %v4315_v31  ;;  %v4317_v63 = vld [vmem:[#allocation11 + $0xb0] sm:$0xf0]  ;;  %v4428_v28 = vld [vmem:[#allocation11 + $0xb4] sm:$0xf0] }
 0x1e9   : > { %4804 = vlog2.f32 %v1916_v23  ;;  %v1920_v21 = vadd.f32 1.0, %v1919_v26  ;;  %v2335_v37 = vmul.f32 %v4801_v19, %v2207_v36  ;;  %vm1923_vm12 = vcmp.lt.f32.partialorder %v1922_v35, 0.0004427343  ;;  %v4426_v48 = vld [vmem:[#allocation11 + $0xac] sm:$0xf] }
 0x1ea   : > { %4806 = vpow2.f32 %v2279_v33  ;;  %v1574_v7 = vand.u32 2147483647, %v6705_v52  ;;  %v2106_v44 = vpop.f32.mrf.mxu2  ;;  %v1915_v41 = vsel %vm6714_vm11, %v1912_v18, %v1909_v47  ;;  %v4320_v0 = vor.u32 %v4425_v25, %v4317_v63  ;;  %3266 = vmatpush.bf16.msrb.mxu0 %v4316_v20  ;;  %v4325_v26 = vld [vmem:[#allocation11 + $0xb8] sm:$0xf0] }
 0x1eb   : > { %v6710_v62 = vadd.f32 %v6533_v57, %v2106_v44  ;;  %v1921_v55 = vmul.f32 %v4797_v24, %v1920_v21  ;;  %v1987_v54 = vadd.f32 %v1915_v41, %v1539_v2  ;;  %v2367_v32 = vsel %vm2200_vm5, %v6663_v30, %v2335_v37 }
 0x1ec   : > { %v1606_v27 = vsub.f32 0.0, %v1574_v7  ;;  %v4324_v11 = vor.u32 %v4428_v28, %v4323_v8  ;;  %3355 = vmatpush.bf16.msrb.mxu1 %v4320_v0  ;;  %v4328_v21 = vor.u32 %v4426_v48, %v4325_v26  ;;  %v4299_v28 = vld [vmem:[#allocation11 + $0x80] sm:$0xf]  ;;  %v4307_v26 = vld [vmem:[#allocation11 + $0x88] sm:$0xf] }
 0x1ed   : > { %2174 = vst [vmem:[%s6543_s13 + $0x40] sm:$0xff] %v6710_v62  ;;  %v1419_v46 = vpop.f32.mrf.mxu0  ;;  %v2241_v59 = vmul.f32 0.5, %v6710_v62 }
 0x1ee   : > { %v1508_v38 = vpop.f32.mrf.mxu1  ;;  %v6720_v12 = vpop.eup %4802  ;;  %v1667_v50 = vmul.f32 1.442695, %v1606_v27  ;;  %v1420_v42 = vadd.f32 %v6702_v9, %v1419_v46  ;;  %3444 = vmatpush.bf16.msrb.mxu2 %v4324_v11  ;;  %3533 = vmatpush.bf16.msrb.mxu3 %v4328_v21 }
 0x1ef   : > { %v4805_v58 = vpop.eup %4804  ;;  %v1925_v60 = vadd.f32 1.0, %v6720_v12  ;;  %v2281_v6 = vmul.f32 1.442695, %v2241_v59  ;;  %v1928_v49 = vmul.f32 -0.5, %v6720_v12  ;;  %v2209_v59 = vld [vmem:[%s5658_s30 + $0x40] sm:$0xff] }
 0x1f0   : > { %v4807_v61 = vpop.eup %4806  ;;  %v1918_v17 = vmul.f32 0.6931472, %v4805_v58  ;;  %4808 = vpow2.f32 %v1667_v50  ;;  %v6729_v34 = vadd.f32 %v1508_v38, %v1420_v42 }
 0x1f1   : > { %v2336_v16 = vmul.f32 %v4807_v61, %v2208_v1  ;;  %4810 = vlog2.f32 %v1925_v60  ;;  %v1929_v27 = vadd.f32 1.0, %v1928_v49  ;;  %v2210_v61 = vld [vmem:[%s5658_s30 + $0x48] sm:$0xff] }
 0x1f2   : > { %v1924_v3 = vsel %vm1923_vm12, %v1921_v55, %v1918_v17  ;;  %v1575_v13 = vand.u32 2147483647, %v6729_v34  ;;  %v2108_v40 = vpop.f32.mrf.mxu2  ;;  %4812 = vpow2.f32 %v2281_v6 }
 0x1f3   : > { %v1988_v22 = vadd.f32 %v1924_v3, %v1540_v43  ;;  %v6734_v14 = vadd.f32 %v6533_v57, %v2108_v40  ;;  %v2368_v45 = vsel %vm2200_vm5, %v6687_v4, %v2336_v16  ;;  %v1930_v42 = vmul.f32 %v6720_v12, %v1929_v27 }
 0x1f4   : > { %v1607_v53 = vsub.f32 0.0, %v1575_v13  ;;  %v2396_v51 = vpack.c.bf16 %v2368_v45, %v2367_v32  ;;  %v1541_v16 = vmax.f32 %v6682_v39, 0.0  ;;  %v1542_v13 = vmax.f32 %v6705_v52, 0.0 }
 0x1f5   : > { %2175 = vst [vmem:[%s6543_s13 + $0x48] sm:$0xff] %v6734_v14  ;;  %v2242_v29 = vmul.f32 0.5, %v6734_v14  ;;  %v1421_v24 = vpop.f32.mrf.mxu0  ;;  %v2006_v30 = vpack.c.bf16 %v1988_v22, %v1987_v54 }
 0x1f6   : > { %v4809_v4 = vpop.eup %4808  ;;  %v1669_v23 = vmul.f32 1.442695, %v1607_v53  ;;  %v1422_v33 = vadd.f32 %v6702_v9, %v1421_v24  ;;  %2500 = vmatmul.bf16.gmra.mxu3 %v2396_v51  ;;  %v1510_v7 = vpop.f32.mrf.mxu1  ;;  %v1931_v9 = vand.u32 2147483647, %v6720_v12 }
 0x1f7   : > { %v1934_v15 = vadd.f32 1.0, %v4809_v4  ;;  %v2283_v47 = vmul.f32 1.442695, %v2242_v29  ;;  %v4811_v44 = vpop.eup %4810  ;;  %v1937_v19 = vmul.f32 -0.5, %v4809_v4  ;;  %v1940_v1 = vand.u32 2147483647, %v4809_v4 }
 0x1f8   : > { %4814 = vpow2.f32 %v1669_v23  ;;  %v6747_v18 = vadd.f32 %v1510_v7, %v1422_v33  ;;  %2150 = vmatmul.bf16.gmra.mxu2 %v2006_v30  ;;  %v1927_v35 = vmul.f32 0.6931472, %v4811_v44  ;;  %v4813_v38 = vpop.eup %4812  ;;  %vm6760_vm13 = vcmp.lt.f32.partialorder %v1931_v9, 0.0004427343  ;;  %v4421_v23 = vld [vmem:[#allocation11 + $0x84] sm:$0xf] }
 0x1f9   : > { %4816 = vlog2.f32 %v1934_v15  ;;  %v1938_v41 = vadd.f32 1.0, %v1937_v19  ;;  %v2337_v12 = vmul.f32 %v4813_v38, %v2209_v59  ;;  %vm1941_vm14 = vcmp.lt.f32.partialorder %v1940_v1, 0.0004427343  ;;  %v4301_v33 = vld [vmem:[#allocation11 + $0x90] sm:$0xf0]  ;;  %v2212_v59 = vld [vmem:[%s5658_s30 + $0x58] sm:$0xff] }
 0x1fa   : > { %4818 = vpow2.f32 %v2283_v47  ;;  %v1576_v36 = vand.u32 2147483647, %v6747_v18  ;;  %v2111_v10 = vpop.f32.mrf.mxu2  ;;  %v1933_v55 = vsel %vm6760_vm13, %v1930_v42, %v1927_v35  ;;  %v4424_v15 = vld [vmem:[#allocation11 + $0x94] sm:$0xf0]  ;;  %v4422_v47 = vld [vmem:[#allocation11 + $0x8c] sm:$0xf]  ;;  %v4304_v27 = vor.u32 %v4421_v23, %v4301_v33 }
 0x1fb   : > { %v6752_v46 = vadd.f32 %v6533_v57, %v2111_v10  ;;  %v1939_v6 = vmul.f32 %v4809_v4, %v1938_v41  ;;  %v1989_v22 = vadd.f32 %v1933_v55, %v1541_v16  ;;  %v2369_v39 = vsel %vm2200_vm5, %v6710_v62, %v2337_v12  ;;  %v4423_v4 = vld [vmem:[#allocation11 + $0x8c] sm:$0xf0]  ;;  %v4285_v23 = vld [vmem:[#allocation11 + $0x70] sm:$0xf0]  ;;  %v4291_v33 = vld [vmem:[#allocation11 + $0x68] sm:$0xf] }
 0x1fc   : > { %v1608_v50 = vsub.f32 0.0, %v1576_v36  ;;  %v2211_v19 = vld [vmem:[%s5658_s30 + $0x50] sm:$0xff]  ;;  %v4300_v21 = vor.u32 %v4423_v4, %v4299_v28  ;;  %v4308_v9 = vor.u32 %v4424_v15, %v4307_v26  ;;  %v4309_v36 = vld [vmem:[#allocation11 + $0x98] sm:$0xf0]  ;;  %3356 = vmatpush.bf16.msrb.mxu1 %v4304_v27  ;;  %v4417_v28 = vld [vmem:[#allocation11 + $0x64] sm:$0xf] }
 0x1fd   : > { %2176 = vst [vmem:[%s6543_s13 + $0x50] sm:$0xff] %v6752_v46  ;;  %v2243_v37 = vmul.f32 0.5, %v6752_v46  ;;  %v4312_v41 = vor.u32 %v4422_v47, %v4309_v36  ;;  %v2215_v47 = vld [vmem:[%s5658_s30 + $0x70] sm:$0xff]  ;;  %v2216_v36 = vld [vmem:[%s5658_s30 + $0x78] sm:$0xff] }
 0x1fe   : > { %v6758_v58 = vpop.eup %4814  ;;  %v1671_v60 = vmul.f32 1.442695, %v1608_v50  ;;  %3267 = vmatpush.bf16.msrb.mxu0 %v4300_v21  ;;  %3445 = vmatpush.bf16.msrb.mxu2 %v4308_v9  ;;  %v4293_v21 = vld [vmem:[#allocation11 + $0x78] sm:$0xf0] }
 0x1ff   : > { %v4817_v17 = vpop.eup %4816  ;;  %v1943_v54 = vadd.f32 1.0, %v6758_v58  ;;  %v2285_v45 = vmul.f32 1.442695, %v2243_v37  ;;  %v1946_v53 = vmul.f32 -0.5, %v6758_v58  ;;  %v1949_v62 = vand.u32 2147483647, %v6758_v58  ;;  %3534 = vmatpush.bf16.msrb.mxu3 %v4312_v41 }
 0x200   : > { %v4819_v43 = vpop.eup %4818  ;;  %v1936_v3 = vmul.f32 0.6931472, %v4817_v17  ;;  %4820 = vpow2.f32 %v1671_v60  ;;  %v1544_v17 = vmax.f32 %v6747_v18, 0.0 }
 0x201   : > { %4822 = vlog2.f32 %v1943_v54  ;;  %v2338_v40 = vmul.f32 %v4819_v43, %v2210_v61  ;;  %v1947_v0 = vadd.f32 1.0, %v1946_v53  ;;  %vm6789_vm15 = vcmp.lt.f32.partialorder %v1949_v62, 0.0004427343 }
 0x202   : > { %v1942_v32 = vsel %vm1941_vm14, %v1939_v6, %v1936_v3  ;;  %v2113_v31 = vpop.f32.mrf.mxu2  ;;  %4824 = vpow2.f32 %v2285_v45 }
 0x203   : > { %v1990_v56 = vadd.f32 %v1942_v32, %v1542_v13  ;;  %v6772_v25 = vadd.f32 %v6533_v57, %v2113_v31  ;;  %v2370_v49 = vsel %vm2200_vm5, %v6734_v14, %v2338_v40  ;;  %v1948_v10 = vmul.f32 %v6758_v58, %v1947_v0  ;;  %v4419_v0 = vld [vmem:[#allocation11 + $0x6c] sm:$0xf0] }
 0x204   : > { %v2397_v52 = vpack.c.bf16 %v2370_v49, %v2369_v39  ;;  %v1543_v58 = vmax.f32 %v6729_v34, 0.0  ;;  %v2214_v49 = vld [vmem:[%s5658_s30 + $0x68] sm:$0xff] }
 0x205   : > { %2177 = vst [vmem:[%s6543_s13 + $0x58] sm:$0xff] %v6772_v25  ;;  %v2244_v51 = vmul.f32 0.5, %v6772_v25  ;;  %v2007_v20 = vpack.c.bf16 %v1990_v56, %v1989_v22 }
 0x206   : > { %v4821_v63 = vpop.eup %4820  ;;  %2505 = vmatmul.bf16.gmra.mxu3 %v2397_v52 }
 0x207   : > { %v4823_v8 = vpop.eup %4822  ;;  %v1952_v29 = vadd.f32 1.0, %v4821_v63  ;;  %v2287_v24 = vmul.f32 1.442695, %v2244_v51  ;;  %v1955_v30 = vmul.f32 -0.5, %v4821_v63  ;;  %v1958_v35 = vand.u32 2147483647, %v4821_v63 }
 0x208   : > { %2155 = vmatmul.bf16.gmra.mxu2 %v2007_v20  ;;  %v1945_v14 = vmul.f32 0.6931472, %v4823_v8  ;;  %v4825_v7 = vpop.eup %4824 }
 0x209   : > { %4826 = vlog2.f32 %v1952_v29  ;;  %v1956_v44 = vadd.f32 1.0, %v1955_v30  ;;  %v2339_v2 = vmul.f32 %v4825_v7, %v2211_v19  ;;  %vm1959_vm0 = vcmp.lt.f32.partialorder %v1958_v35, 0.0004427343  ;;  %v4418_v19 = vld [vmem:[#allocation11 + $0x6c] sm:$0xf] }
 0x20a   : > { %4828 = vpow2.f32 %v2287_v24  ;;  %v2116_v48 = vpop.f32.mrf.mxu2  ;;  %v1951_v1 = vsel %vm6789_vm15, %v1948_v10, %v1945_v14  ;;  %v4283_v14 = vld [vmem:[#allocation11 + $0x60] sm:$0xf]  ;;  %v4288_v7 = vor.u32 %v4417_v28, %v4285_v23  ;;  %v4296_v27 = vor.u32 %v4418_v19, %v4293_v21  ;;  %v4411_v28 = vld [vmem:[#allocation11 + $0x2c] sm:$0xf0] }
 0x20b   : > { %v2117_v11 = vadd.f32 %v6533_v57, %v2116_v48  ;;  %v1957_v61 = vmul.f32 %v4821_v63, %v1956_v44  ;;  %v1991_v12 = vadd.f32 %v1951_v1, %v1543_v58  ;;  %v2371_v34 = vsel %vm2200_vm5, %v6752_v46, %v2339_v2  ;;  %v2213_v46 = vld [vmem:[%s5658_s30 + $0x60] sm:$0xff] }
 0x20c   : > { %v4284_v4 = vor.u32 %v4419_v0, %v4283_v14  ;;  %3357 = vmatpush.bf16.msrb.mxu1 %v4288_v7  ;;  %3535 = vmatpush.bf16.msrb.mxu3 %v4296_v27  ;;  %v4251_v14 = vld [vmem:[#allocation11 + $0x20] sm:$0xf] }
 0x20d   : > { %2178 = vst [vmem:[%s6543_s13 + $0x60] sm:$0xff] %v2117_v11  ;;  %v2245_v38 = vmul.f32 0.5, %v2117_v11 }
 0x20e   : > { %3268 = vmatpush.bf16.msrb.mxu0 %v4284_v4  ;;  %v4253_v4 = vld [vmem:[#allocation11 + $0x30] sm:$0xf0] }
 0x20f   : > { %v4827_v42 = vpop.eup %4826  ;;  %v2289_v55 = vmul.f32 1.442695, %v2245_v38 }
 0x210   : > { %v4829_v60 = vpop.eup %4828  ;;  %v1954_v37 = vmul.f32 0.6931472, %v4827_v42 }
 0x211   : > { %v2340_v54 = vmul.f32 %v4829_v60, %v2212_v59  ;;  %4830 = vpow2.f32 %v2289_v55  ;;  %v2217_v55 = vld [vmem:[%s5658_s30 + $0x80] sm:$0xff] }
 0x212   : > { %v1960_v43 = vsel %vm1959_vm0, %v1957_v61, %v1954_v37  ;;  %v2118_v16 = vpop.f32.mrf.mxu2 }
 0x213   : > { %v1992_v3 = vadd.f32 %v1960_v43, %v1544_v17  ;;  %v2119_v6 = vadd.f32 %v6533_v57, %v2118_v16  ;;  %v2372_v13 = vsel %vm2200_vm5, %v6772_v25, %v2340_v54 }
 0x214   : > { %v2398_v18 = vpack.c.bf16 %v2372_v13, %v2371_v34 }
 0x215   : > { %2179 = vst [vmem:[%s6543_s13 + $0x68] sm:$0xff] %v2119_v6  ;;  %v2246_v40 = vmul.f32 0.5, %v2119_v6  ;;  %v2008_v22 = vpack.c.bf16 %v1992_v3, %v1991_v12  ;;  %v2218_v12 = vld [vmem:[%s5658_s30 + $0x88] sm:$0xff] }
 0x216   : > { %2510 = vmatmul.bf16.gmra.mxu3 %v2398_v18 }
 0x217   : > { %v2291_v32 = vmul.f32 1.442695, %v2246_v40  ;;  %v4831_v31 = vpop.eup %4830 }
 0x218   : > { %2160 = vmatmul.bf16.gmra.mxu2 %v2008_v22  ;;  %v2341_v25 = vmul.f32 %v4831_v31, %v2213_v46  ;;  %v4415_v46 = vld [vmem:[#allocation11 + $0x4c] sm:$0xf0] }
 0x219   : > { %4832 = vpow2.f32 %v2291_v32 }
 0x21a   : > { %v2121_v45 = vpop.f32.mrf.mxu2  ;;  %v2373_v63 = vsel %vm2200_vm5, %v2117_v11, %v2341_v25  ;;  %v4420_v11 = vld [vmem:[#allocation11 + $0x74] sm:$0xf0]  ;;  %v4413_v25 = vld [vmem:[#allocation11 + $0x44] sm:$0xf] }
 0x21b   : > { %v2122_v56 = vadd.f32 %v6533_v57, %v2121_v45  ;;  %v4292_v44 = vor.u32 %v4420_v11, %v4291_v33  ;;  %v6848_v45 = vld [vmem:[%s7689_s7] ss:$0 sm:$0xff]  ;;  %v2220_v33 = vld [vmem:[%s5658_s30 + $0x98] sm:$0xff]  ;;  %v4252_v11 = vor.u32 %v4411_v28, %v4251_v14 }
 0x21d   : > { %2180 = vst [vmem:[%s6543_s13 + $0x70] sm:$0xff] %v2122_v56  ;;  %v2247_v39 = vmul.f32 0.5, %v2122_v56  ;;  %3446 = vmatpush.bf16.msrb.mxu2 %v4292_v44 }
 0x21f   : > { %v4833_v52 = vpop.eup %4832  ;;  %v2293_v51 = vmul.f32 1.442695, %v2247_v39 }
 0x220   : > { %v2342_v53 = vmul.f32 %v4833_v52, %v2214_v49  ;;  %v4269_v52 = vld [vmem:[#allocation11 + $0x50] sm:$0xf0] }
 0x221   : > { %4834 = vpow2.f32 %v2293_v51 }
 0x222   : > { %v2123_v20 = vpop.f32.mrf.mxu2  ;;  %v2374_v8 = vsel %vm2200_vm5, %v2119_v6, %v2342_v53  ;;  %v4275_v53 = vld [vmem:[#allocation11 + $0x48] sm:$0xf] }
 0x223   : > { %v2124_v29 = vadd.f32 %v6533_v57, %v2123_v20  ;;  %v2399_v24 = vpack.c.bf16 %v2374_v8, %v2373_v63  ;;  %v6819_v57 = vld [vmem:[%s7687_s5] ss:$0 sm:$0xff]  ;;  %v4272_v20 = vor.u32 %v4413_v25, %v4269_v52  ;;  %v4416_v63 = vld [vmem:[#allocation11 + $0x54] sm:$0xf0] }
 0x224   : > { %v4276_v8 = vor.u32 %v4416_v63, %v4275_v53  ;;  %v2221_v25 = vld [vmem:[%s5658_s30 + $0xa0] sm:$0xff] }
 0x225   : > { %2181 = vst [vmem:[%s6543_s13 + $0x78] sm:$0xff] %v2124_v29  ;;  %v2248_v62 = vmul.f32 0.5, %v2124_v29  ;;  %3358 = vmatpush.bf16.msrb.mxu1 %v4272_v20 }
 0x226   : > { %2515 = vmatmul.bf16.gmra.mxu3 %v2399_v24  ;;  %3447 = vmatpush.bf16.msrb.mxu2 %v4276_v8 }
 0x227   : > { %v2295_v30 = vmul.f32 1.442695, %v2248_v62  ;;  %v4835_v26 = vpop.eup %4834 }
 0x228   : > { %v2343_v10 = vmul.f32 %v4835_v26, %v2215_v47  ;;  %v4412_v47 = vld [vmem:[#allocation11 + $0x34] sm:$0xf0] }
 0x229   : > { %4836 = vpow2.f32 %v2295_v30  ;;  %v2219_v30 = vld [vmem:[%s5658_s30 + $0x90] sm:$0xff] }
 0x22a   : > { %v2126_v48 = vpop.f32.mrf.mxu2  ;;  %v2375_v59 = vsel %vm2200_vm5, %v2122_v56, %v2343_v10  ;;  %v4267_v56 = vld [vmem:[#allocation11 + $0x40] sm:$0xf] }
 0x22b   : > { %v2127_v15 = vadd.f32 %v6819_v57, %v2126_v48  ;;  %v4268_v49 = vor.u32 %v4415_v46, %v4267_v56  ;;  %v4409_v48 = vld [vmem:[#allocation11 + $0x24] sm:$0xf]  ;;  %v4414_v56 = vld [vmem:[#allocation11 + $0x4c] sm:$0xf]  ;;  %v4277_v46 = vld [vmem:[#allocation11 + $0x58] sm:$0xf0] }
 0x22c   : > { %v4256_v26 = vor.u32 %v4409_v48, %v4253_v4  ;;  %v4280_v52 = vor.u32 %v4414_v56, %v4277_v46 }
 0x22d   : > { %2182 = vst [vmem:[%s6543_s13 + $0x80] sm:$0xff] %v2127_v15  ;;  %v2249_v9 = vmul.f32 0.5, %v2127_v15  ;;  %3269 = vmatpush.bf16.msrb.mxu0 %v4268_v49 }
 0x22e   : > { %3359 = vmatpush.bf16.msrb.mxu1 %v4256_v26  ;;  %3536 = vmatpush.bf16.msrb.mxu3 %v4280_v52 }
 0x22f   : > { %v4837_v35 = vpop.eup %4836  ;;  %v2297_v41 = vmul.f32 1.442695, %v2249_v9  ;;  %v4235_v9 = vld [vmem:[#allocation11] sm:$0xf] }
 0x230   : > { %v2344_v38 = vmul.f32 %v4837_v35, %v2216_v36  ;;  %v4407_v36 = vld [vmem:[#allocation11 + $0xc] sm:$0xf0] }
 0x231   : > { %4838 = vpow2.f32 %v2297_v41  ;;  %3270 = vmatpush.bf16.msrb.mxu0 %v4252_v11  ;;  %v4405_v41 = vld [vmem:[#allocation11 + $0x4] sm:$0xf] }
 0x232   : > { %v2128_v50 = vpop.f32.mrf.mxu2  ;;  %v2376_v42 = vsel %vm2200_vm5, %v2124_v29, %v2344_v38  ;;  %v4236_v38 = vor.u32 %v4407_v36, %v4235_v9 }
 0x233   : > { %v2129_v1 = vadd.f32 %v6819_v57, %v2128_v50  ;;  %v2400_v2 = vpack.c.bf16 %v2376_v42, %v2375_v59  ;;  %v4237_v50 = vld [vmem:[#allocation11 + $0x10] sm:$0xf0] }
 0x234   : > { %v4240_v42 = vor.u32 %v4405_v41, %v4237_v50 }
 0x235   : > { %2183 = vst [vmem:[%s6543_s13 + $0x88] sm:$0xff] %v2129_v1  ;;  %v2250_v60 = vmul.f32 0.5, %v2129_v1  ;;  %3271 = vmatpush.bf16.msrb.mxu0 %v4236_v38 }
 0x236   : > { %2520 = vmatmul.bf16.gmra.mxu3 %v2400_v2  ;;  %v4408_v2 = vld [vmem:[#allocation11 + $0x14] sm:$0xf0]  ;;  %3360 = vmatpush.bf16.msrb.mxu1 %v4240_v42 }
 0x237   : > { %v2299_v58 = vmul.f32 1.442695, %v2250_v60  ;;  %v4839_v61 = vpop.eup %4838 }
 0x238   : > { %v2345_v43 = vmul.f32 %v4839_v61, %v2217_v55 }
 0x239   : > { %4840 = vpow2.f32 %v2299_v58 }
 0x23a   : > { %v2131_v37 = vpop.f32.mrf.mxu2  ;;  %v2377_v13 = vsel %vm2200_vm5, %v2127_v15, %v2345_v43  ;;  %v4259_v15 = vld [vmem:[#allocation11 + $0x28] sm:$0xf] }
 0x23b   : > { %v6832_v17 = vadd.f32 %v6819_v57, %v2131_v37  ;;  %v4260_v19 = vor.u32 %v4412_v47, %v4259_v15 }
 0x23d   : > { %2184 = vst [vmem:[%s6543_s13 + $0x90] sm:$0xff] %v6832_v17  ;;  %v2251_v54 = vmul.f32 0.5, %v6832_v17  ;;  %3448 = vmatpush.bf16.msrb.mxu2 %v4260_v19 }
 0x23f   : > { %v4841_v16 = vpop.eup %4840  ;;  %v2301_v6 = vmul.f32 1.442695, %v2251_v54 }
 0x240   : > { %v2346_v3 = vmul.f32 %v4841_v16, %v2218_v12 }
 0x241   : > { %4842 = vpow2.f32 %v2301_v6 }
 0x242   : > { %v2133_v34 = vpop.f32.mrf.mxu2  ;;  %v2378_v18 = vsel %vm2200_vm5, %v2129_v1, %v2346_v3  ;;  %v4243_v1 = vld [vmem:[#allocation11 + $0x8] sm:$0xf] }
 0x243   : > { %v2134_v40 = vadd.f32 %v6819_v57, %v2133_v34  ;;  %v2401_v22 = vpack.c.bf16 %v2378_v18, %v2377_v13  ;;  %v4244_v37 = vor.u32 %v4408_v2, %v4243_v1 }
 0x245   : > { %2185 = vst [vmem:[%s6543_s13 + $0x98] sm:$0xff] %v2134_v40  ;;  %v2252_v32 = vmul.f32 0.5, %v2134_v40  ;;  %3449 = vmatpush.bf16.msrb.mxu2 %v4244_v37 }
 0x246   : > { %2525 = vmatmul.bf16.gmra.mxu3 %v2401_v22 }
 0x247   : > { %v2303_v31 = vmul.f32 1.442695, %v2252_v32  ;;  %v4843_v29 = vpop.eup %4842 }
 0x248   : > { %v2486_v39 = vpop.f32.mrf.mxu3  ;;  %v2347_v44 = vmul.f32 %v4843_v29, %v2219_v30  ;;  %v2222_v29 = vld [vmem:[%s5658_s30 + $0xa8] sm:$0xff] }
 0x249   : > { %4844 = vpow2.f32 %v2303_v31  ;;  %v6851_v51 = vadd.f32 %v6848_v45, %v2486_v39 }
 0x24a   : > { %v2379_v60 = vsel %vm2200_vm5, %v6832_v17, %v2347_v44 }
 0x24b   : > { %v2598_v24 = vand.u32 2147483647, %v6851_v51  ;;  %v2136_v62 = vpop.f32.mrf.mxu2 }
 0x24c   : > { %v6856_v0 = vadd.f32 %v6819_v57, %v2136_v62 }
 0x24d   : > { %v2630_v23 = vsub.f32 0.0, %v2598_v24 }
 0x24e   : > { %2186 = vst [vmem:[%s6543_s13 + $0xa0] sm:$0xff] %v6856_v0  ;;  %v2253_v7 = vmul.f32 0.5, %v6856_v0 }
 0x24f   : > { %v4845_v21 = vpop.eup %4844  ;;  %v2662_v27 = vmul.f32 1.442695, %v2630_v23 }
 0x250   : > { %v2488_v10 = vpop.f32.mrf.mxu3  ;;  %v2348_v35 = vmul.f32 %v4845_v21, %v2220_v33  ;;  %v2305_v61 = vmul.f32 1.442695, %v2253_v7 }
 0x251   : > { %4846 = vpow2.f32 %v2662_v27  ;;  %v6863_v59 = vadd.f32 %v6848_v45, %v2488_v10 }
 0x252   : > { %v2380_v58 = vsel %vm2200_vm5, %v2134_v40, %v2348_v35  ;;  %4848 = vpow2.f32 %v2305_v61 }
 0x253   : > { %v2599_v55 = vand.u32 2147483647, %v6863_v59  ;;  %v2138_v54 = vpop.f32.mrf.mxu2  ;;  %v2402_v12 = vpack.c.bf16 %v2380_v58, %v2379_v60 }
 0x254   : > { %v2139_v43 = vadd.f32 %v6819_v57, %v2138_v54 }
 0x255   : > { %v2631_v16 = vsub.f32 0.0, %v2599_v55  ;;  %v2567_v55 = vmax.f32 %v6863_v59, 0.0 }
 0x256   : > { %2187 = vst [vmem:[%s6543_s13 + $0xa8] sm:$0xff] %v2139_v43  ;;  %v2254_v3 = vmul.f32 0.5, %v2139_v43  ;;  %2530 = vmatmul.bf16.gmra.mxu3 %v2402_v12 }
 0x257   : > { %v4847_v6 = vpop.eup %4846  ;;  %v2664_v17 = vmul.f32 1.442695, %v2631_v16 }
 0x258   : > { %v2726_v34 = vadd.f32 1.0, %v4847_v6  ;;  %v2307_v13 = vmul.f32 1.442695, %v2254_v3  ;;  %v2491_v18 = vpop.f32.mrf.mxu3  ;;  %v4849_v39 = vpop.eup %4848  ;;  %v2729_v20 = vmul.f32 -0.5, %v4847_v6  ;;  %v2732_v47 = vand.u32 2147483647, %v4847_v6 }
 0x259   : > { %4850 = vpow2.f32 %v2664_v17  ;;  %v6874_v40 = vadd.f32 %v6848_v45, %v2491_v18  ;;  %v2349_v30 = vmul.f32 %v4849_v39, %v2221_v25  ;;  %v2224_v39 = vld [vmem:[%s5658_s30 + $0xb8] sm:$0xff] }
 0x25a   : > { %4852 = vpow2.f32 %v2307_v13  ;;  %v2730_v33 = vadd.f32 1.0, %v2729_v20  ;;  %vm2733_vm1 = vcmp.lt.f32.partialorder %v2732_v47, 0.0004427343 }
 0x25b   : > { %v2600_v22 = vand.u32 2147483647, %v6874_v40  ;;  %v2141_v32 = vpop.f32.mrf.mxu2  ;;  %4854 = vlog2.f32 %v2726_v34  ;;  %v2381_v44 = vsel %vm2200_vm5, %v6856_v0, %v2349_v30  ;;  %v2566_v0 = vmax.f32 %v6851_v51, 0.0  ;;  %v2223_v34 = vld [vmem:[%s5658_s30 + $0xb0] sm:$0xff] }
 0x25c   : > { %v6878_v31 = vadd.f32 %v6819_v57, %v2141_v32  ;;  %v2731_v41 = vmul.f32 %v4847_v6, %v2730_v33 }
 0x25d   : > { %v2632_v49 = vsub.f32 0.0, %v2600_v22 }
 0x25e   : > { %2188 = vst [vmem:[%s6543_s13 + $0xb0] sm:$0xff] %v6878_v31  ;;  %v2255_v8 = vmul.f32 0.5, %v6878_v31 }
 0x25f   : > { %v4851_v53 = vpop.eup %4850  ;;  %v2666_v63 = vmul.f32 1.442695, %v2632_v49 }
 0x260   : > { %v2735_v24 = vadd.f32 1.0, %v4851_v53  ;;  %v2493_v62 = vpop.f32.mrf.mxu3  ;;  %v4853_v14 = vpop.eup %4852  ;;  %v2738_v28 = vmul.f32 -0.5, %v4851_v53  ;;  %v2309_v11 = vmul.f32 1.442695, %v2255_v8  ;;  %v2741_v10 = vand.u32 2147483647, %v4851_v53 }
 0x261   : > { %4856 = vpow2.f32 %v2666_v63  ;;  %v6886_v48 = vadd.f32 %v6848_v45, %v2493_v62  ;;  %v4855_v4 = vpop.eup %4854  ;;  %v2350_v23 = vmul.f32 %v4853_v14, %v2222_v29 }
 0x262   : > { %4858 = vlog2.f32 %v2735_v24  ;;  %v2728_v21 = vmul.f32 0.6931472, %v4855_v4  ;;  %v2739_v27 = vadd.f32 1.0, %v2738_v28  ;;  %vm2742_vm2 = vcmp.lt.f32.partialorder %v2741_v10, 0.0004427343 }
 0x263   : > { %v2601_v26 = vand.u32 2147483647, %v6886_v48  ;;  %v2143_v15 = vpop.f32.mrf.mxu2  ;;  %v2382_v19 = vsel %vm2200_vm5, %v2139_v43, %v2350_v23  ;;  %4860 = vpow2.f32 %v2309_v11 }
 0x264   : > { %v6890_v7 = vadd.f32 %v6819_v57, %v2143_v15  ;;  %v2403_v36 = vpack.c.bf16 %v2382_v19, %v2381_v44  ;;  %v2734_v60 = vsel %vm2733_vm1, %v2731_v41, %v2728_v21  ;;  %v2740_v37 = vmul.f32 %v4851_v53, %v2739_v27 }
 0x265   : > { %v2633_v9 = vsub.f32 0.0, %v2601_v26  ;;  %v3014_v43 = vadd.f32 %v2734_v60, %v2566_v0  ;;  %v2568_v27 = vmax.f32 %v6874_v40, 0.0 }
 0x266   : > { %2189 = vst [vmem:[%s6543_s13 + $0xb8] sm:$0xff] %v6890_v7  ;;  %v2256_v35 = vmul.f32 0.5, %v6890_v7  ;;  %2535 = vmatmul.bf16.gmra.mxu3 %v2403_v36 }
 0x267   : > { %v4857_v38 = vpop.eup %4856  ;;  %v2668_v50 = vmul.f32 1.442695, %v2633_v9 }
 0x268   : > { %v4859_v42 = vpop.eup %4858  ;;  %v2744_v1 = vadd.f32 1.0, %v4857_v38  ;;  %v2311_v2 = vmul.f32 1.442695, %v2256_v35  ;;  %v2747_v59 = vmul.f32 -0.5, %v4857_v38  ;;  %v2750_v29 = vand.u32 2147483647, %v4857_v38 }
 0x269   : > { %v2737_v58 = vmul.f32 0.6931472, %v4859_v42  ;;  %4862 = vpow2.f32 %v2668_v50  ;;  %v2496_v61 = vpop.f32.mrf.mxu3  ;;  %v4861_v6 = vpop.eup %4860 }
 0x26a   : > { %4864 = vlog2.f32 %v2744_v1  ;;  %v6903_v54 = vadd.f32 %v6848_v45, %v2496_v61  ;;  %v2351_v49 = vmul.f32 %v4861_v6, %v2223_v34  ;;  %v2748_v20 = vadd.f32 1.0, %v2747_v59  ;;  %v4410_v61 = vld [vmem:[#allocation11 + $0x2c] sm:$0xf]  ;;  %v2225_v59 = vld [vmem:[%s5658_s30 + $0xc0] sm:$0xff] }
 0x26b   : > { %v2743_v12 = vsel %vm2742_vm2, %v2740_v37, %v2737_v58  ;;  %4866 = vpow2.f32 %v2311_v2  ;;  %v2146_v51 = vpop.f32.mrf.mxu2  ;;  %vm6932_vm3 = vcmp.lt.f32.partialorder %v2750_v29, 0.0004427343 }
 0x26c   : > { %v3015_v16 = vadd.f32 %v2743_v12, %v2567_v55  ;;  %v2602_v3 = vand.u32 2147483647, %v6903_v54  ;;  %v6907_v17 = vadd.f32 %v6819_v57, %v2146_v51  ;;  %v2383_v14 = vsel %vm2200_vm5, %v6878_v31, %v2351_v49  ;;  %v4261_v55 = vld [vmem:[#allocation11 + $0x38] sm:$0xf0]  ;;  %v2226_v49 = vld [vmem:[%s5658_s30 + $0xc8] sm:$0xff] }
 0x26d   : > { %v2749_v11 = vmul.f32 %v4857_v38, %v2748_v20  ;;  %v4264_v51 = vor.u32 %v4410_v61, %v4261_v55 }
 0x26e   : > { %v2634_v13 = vsub.f32 0.0, %v2602_v3  ;;  %v6910_v18 = vpack.c.bf16 %v3015_v16, %v3014_v43  ;;  %2190 = vst [vmem:[%s6543_s13 + $0xc0] sm:$0xff] %v6907_v17  ;;  %v2257_v63 = vmul.f32 0.5, %v6907_v17 }
 0x26f   : > { %v4863_v22 = vpop.eup %4862  ;;  %3537 = vmatpush.bf16.msrb.mxu3 %v4264_v51  ;;  %v2227_v51 = vld [vmem:[%s5658_s30 + $0xd0] sm:$0xff] }
 0x270   : > { %v4865_v32 = vpop.eup %4864  ;;  %v2753_v56 = vadd.f32 1.0, %v4863_v22  ;;  %v2670_v46 = vmul.f32 1.442695, %v2634_v13  ;;  %3272 = vmatmul.bf16.vlgmr.msrb.gmra.mxu0 %v6910_v18  ;;  %3361 = vmatmul.bf16.vlgmr.msrb.gmra.mxu1 %v6910_v18  ;;  %v2756_v52 = vmul.f32 -0.5, %v4863_v22  ;;  %v2759_v26 = vand.u32 2147483647, %v4863_v22 }
 0x271   : > { %v4867_v25 = vpop.eup %4866  ;;  %v2498_v53 = vpop.f32.mrf.mxu3  ;;  %3450 = vmatmul.bf16.vlgmr.msrb.gmra.mxu2 %v6910_v18  ;;  %v2746_v30 = vmul.f32 0.6931472, %v4865_v32  ;;  %v2313_v15 = vmul.f32 1.442695, %v2257_v63 }
 0x272   : > { %4868 = vlog2.f32 %v2753_v56  ;;  %v6920_v8 = vadd.f32 %v6848_v45, %v2498_v53  ;;  %v2352_v62 = vmul.f32 %v4867_v25, %v2224_v39  ;;  %v2757_v28 = vadd.f32 1.0, %v2756_v52 }
 0x273   : > { %4870 = vpow2.f32 %v2670_v46  ;;  %v2148_v24 = vpop.f32.mrf.mxu2  ;;  %v2752_v9 = vsel %vm6932_vm3, %v2749_v11, %v2746_v30  ;;  %vm2760_vm4 = vcmp.lt.f32.partialorder %v2759_v26, 0.0004427343 }
 0x274   : > { %v2603_v4 = vand.u32 2147483647, %v6920_v8  ;;  %v6927_v23 = vadd.f32 %v6819_v57, %v2148_v24  ;;  %v2384_v33 = vsel %vm2200_vm5, %v6890_v7, %v2352_v62  ;;  %v2569_v7 = vmax.f32 %v6886_v48, 0.0 }
 0x275   : > { %v2404_v47 = vpack.c.bf16 %v2384_v33, %v2383_v14  ;;  %v2758_v35 = vmul.f32 %v4863_v22, %v2757_v28  ;;  %4872 = vpow2.f32 %v2313_v15  ;;  %v3016_v48 = vadd.f32 %v2752_v9, %v2568_v27 }
 0x276   : > { %v2635_v19 = vsub.f32 0.0, %v2603_v4  ;;  %2191 = vst [vmem:[%s6543_s13 + $0xc8] sm:$0xff] %v6927_v23  ;;  %v2258_v31 = vmul.f32 0.5, %v6927_v23 }
 0x277   : > { %2540 = vmatmul.bf16.gmra.mxu3 %v2404_v47 }
 0x278   : > { %v4869_v21 = vpop.eup %4868  ;;  %v2672_v38 = vmul.f32 1.442695, %v2635_v19  ;;  %v2315_v41 = vmul.f32 1.442695, %v2258_v31 }
 0x279   : > { %v6943_v36 = vpop.eup %4870  ;;  %v2755_v10 = vmul.f32 0.6931472, %v4869_v21  ;;  %v2501_v50 = vpop.f32.mrf.mxu3 }
 0x27a   : > { %v2762_v42 = vadd.f32 1.0, %v6943_v36  ;;  %v6947_v40 = vadd.f32 %v6848_v45, %v2501_v50  ;;  %4874 = vpow2.f32 %v2672_v38  ;;  %v2765_v3 = vmul.f32 -0.5, %v6943_v36 }
 0x27b   : > { %v2761_v0 = vsel %vm2760_vm4, %v2758_v35, %v2755_v10  ;;  %v2151_v1 = vpop.f32.mrf.mxu2  ;;  %4876 = vpow2.f32 %v2315_v41  ;;  %v4873_v43 = vpop.eup %4872  ;;  %v2768_v29 = vand.u32 2147483647, %v6943_v36  ;;  %v2570_v38 = vmax.f32 %v6903_v54, 0.0 }
 0x27c   : > { %v3017_v2 = vadd.f32 %v2761_v0, %v2569_v7  ;;  %v2604_v60 = vand.u32 2147483647, %v6947_v40  ;;  %v6951_v58 = vadd.f32 %v6819_v57, %v2151_v1  ;;  %4878 = vlog2.f32 %v2762_v42 }
 0x27d   : > { %v2353_v52 = vmul.f32 %v4873_v43, %v2225_v59  ;;  %v2766_v53 = vadd.f32 1.0, %v2765_v3  ;;  %vm6984_vm6 = vcmp.lt.f32.partialorder %v2768_v29, 0.0004427343  ;;  %v2571_v41 = vmax.f32 %v6920_v8, 0.0 }
 0x27e   : > { %v6953_v37 = vpack.c.bf16 %v3017_v2, %v3016_v48  ;;  %v2636_v12 = vsub.f32 0.0, %v2604_v60  ;;  %2192 = vst [vmem:[%s6543_s13 + $0xd0] sm:$0xff] %v6951_v58  ;;  %v2259_v22 = vmul.f32 0.5, %v6951_v58 }
 0x27f   : > { %v2385_v11 = vsel %vm2200_vm5, %v6907_v17, %v2353_v52  ;;  %v2767_v47 = vmul.f32 %v6943_v36, %v2766_v53 }
 0x280   : > { %3277 = vmatmul.bf16.gmra.mxu0 %v6953_v37  ;;  %3366 = vmatmul.bf16.gmra.mxu1 %v6953_v37  ;;  %v4875_v16 = vpop.eup %4874  ;;  %v2674_v6 = vmul.f32 1.442695, %v2636_v12  ;;  %v2317_v24 = vmul.f32 1.442695, %v2259_v22 }
 0x281   : > { %v2503_v34 = vpop.f32.mrf.mxu3  ;;  %3455 = vmatmul.bf16.gmra.mxu2 %v6953_v37  ;;  %v2771_v13 = vadd.f32 1.0, %v4875_v16  ;;  %v4877_v56 = vpop.eup %4876  ;;  %v2774_v46 = vmul.f32 -0.5, %v4875_v16  ;;  %v2777_v33 = vand.u32 2147483647, %v4875_v16 }
 0x282   : > { %v6964_v32 = vadd.f32 %v6848_v45, %v2503_v34  ;;  %4880 = vpow2.f32 %v2674_v6  ;;  %v4879_v25 = vpop.eup %4878  ;;  %v2354_v62 = vmul.f32 %v4877_v56, %v2226_v49 }
 0x283   : > { %v2153_v39 = vpop.f32.mrf.mxu2  ;;  %4882 = vlog2.f32 %v2771_v13  ;;  %v2764_v30 = vmul.f32 0.6931472, %v4879_v25  ;;  %v2775_v14 = vadd.f32 1.0, %v2774_v46  ;;  %vm2778_vm7 = vcmp.lt.f32.partialorder %v2777_v33, 0.0004427343  ;;  %v2228_v13 = vld [vmem:[%s5658_s30 + $0xd8] sm:$0xff] }
 0x284   : > { %v2605_v20 = vand.u32 2147483647, %v6964_v32  ;;  %v6969_v63 = vadd.f32 %v6819_v57, %v2153_v39  ;;  %v2386_v26 = vsel %vm2200_vm5, %v6927_v23, %v2354_v62  ;;  %4884 = vpow2.f32 %v2317_v24 }
 0x285   : > { %v2405_v31 = vpack.c.bf16 %v2386_v26, %v2385_v11  ;;  %v2770_v23 = vsel %vm6984_vm6, %v2767_v47, %v2764_v30  ;;  %v2776_v36 = vmul.f32 %v4875_v16, %v2775_v14 }
 0x286   : > { %v2637_v28 = vsub.f32 0.0, %v2605_v20  ;;  %2193 = vst [vmem:[%s6543_s13 + $0xd8] sm:$0xff] %v6969_v63  ;;  %v2260_v4 = vmul.f32 0.5, %v6969_v63  ;;  %v3018_v1 = vadd.f32 %v2770_v23, %v2570_v38  ;;  %v2573_v23 = vmax.f32 %v6964_v32, 0.0 }
 0x287   : > { %2545 = vmatmul.bf16.gmra.mxu3 %v2405_v31 }
 0x288   : > { %v6981_v15 = vpop.eup %4880  ;;  %v2676_v44 = vmul.f32 1.442695, %v2637_v28  ;;  %v2319_v19 = vmul.f32 1.442695, %v2260_v4 }
 0x289   : > { %v2506_v21 = vpop.f32.mrf.mxu3  ;;  %v4883_v27 = vpop.eup %4882  ;;  %v2780_v7 = vadd.f32 1.0, %v6981_v15  ;;  %v2783_v8 = vmul.f32 -0.5, %v6981_v15  ;;  %v2786_v25 = vand.u32 2147483647, %v6981_v15 }
 0x28a   : > { %v6990_v17 = vadd.f32 %v6848_v45, %v2506_v21  ;;  %v2773_v10 = vmul.f32 0.6931472, %v4883_v27  ;;  %4886 = vpow2.f32 %v2676_v44  ;;  %v4885_v60 = vpop.eup %4884 }
 0x28b   : > { %v2156_v35 = vpop.f32.mrf.mxu2  ;;  %4888 = vpow2.f32 %v2319_v19  ;;  %v2355_v56 = vmul.f32 %v4885_v60, %v2227_v51  ;;  %v2784_v46 = vadd.f32 1.0, %v2783_v8  ;;  %vm7031_vm8 = vcmp.lt.f32.partialorder %v2786_v25, 0.0004427343 }
 0x28c   : > { %v2779_v50 = vsel %vm2778_vm7, %v2776_v36, %v2773_v10  ;;  %v2606_v42 = vand.u32 2147483647, %v6990_v17  ;;  %v6998_v0 = vadd.f32 %v6819_v57, %v2156_v35  ;;  %4890 = vlog2.f32 %v2780_v7 }
 0x28d   : > { %v3019_v48 = vadd.f32 %v2779_v50, %v2571_v41  ;;  %v2387_v14 = vsel %vm2200_vm5, %v6951_v58, %v2355_v56  ;;  %v2785_v33 = vmul.f32 %v6981_v15, %v2784_v46  ;;  %v2572_v7 = vmax.f32 %v6947_v40, 0.0  ;;  %v4406_v50 = vld [vmem:[#allocation11 + $0xc] sm:$0xf] }
 0x28e   : > { %v2638_v2 = vsub.f32 0.0, %v2606_v42  ;;  %2194 = vst [vmem:[%s6543_s13 + $0xe0] sm:$0xff] %v6998_v0  ;;  %v2261_v16 = vmul.f32 0.5, %v6998_v0  ;;  %v4245_v42 = vld [vmem:[#allocation11 + $0x18] sm:$0xf0] }
 0x28f   : > { %v7002_v61 = vpack.c.bf16 %v3019_v48, %v3018_v1  ;;  %v4248_v40 = vor.u32 %v4406_v50, %v4245_v42 }
 0x290   : > { %v4887_v54 = vpop.eup %4886  ;;  %v2678_v55 = vmul.f32 1.442695, %v2638_v2  ;;  %v2321_v52 = vmul.f32 1.442695, %v2261_v16 }
 0x291   : > { %v2508_v12 = vpop.f32.mrf.mxu3  ;;  %v2789_v43 = vadd.f32 1.0, %v4887_v54  ;;  %3282 = vmatmul.bf16.gmra.mxu0 %v7002_v61  ;;  %3371 = vmatmul.bf16.gmra.mxu1 %v7002_v61  ;;  %v4889_v6 = vpop.eup %4888  ;;  %v2792_v34 = vmul.f32 -0.5, %v4887_v54  ;;  %v2795_v30 = vand.u32 2147483647, %v4887_v54 }
 0x292   : > { %v7008_v3 = vadd.f32 %v6848_v45, %v2508_v12  ;;  %4892 = vpow2.f32 %v2678_v55  ;;  %3460 = vmatmul.bf16.gmra.mxu2 %v7002_v61  ;;  %v4891_v22 = vpop.eup %4890  ;;  %v2356_v53 = vmul.f32 %v4889_v6, %v2228_v13  ;;  %v2229_v12 = vld [vmem:[%s5658_s30 + $0xe0] sm:$0xff]  ;;  %3538 = vmatpush.bf16.msrb.mxu3 %v4248_v40 }
 0x293   : > { %v2158_v59 = vpop.f32.mrf.mxu2  ;;  %4894 = vlog2.f32 %v2789_v43  ;;  %v2782_v20 = vmul.f32 0.6931472, %v4891_v22  ;;  %v2793_v29 = vadd.f32 1.0, %v2792_v34  ;;  %vm2796_vm9 = vcmp.lt.f32.partialorder %v2795_v30, 0.0004427343 }
 0x294   : > { %v2607_v39 = vand.u32 2147483647, %v7008_v3  ;;  %v7016_v49 = vadd.f32 %v6819_v57, %v2158_v59  ;;  %v2388_v28 = vsel %vm2200_vm5, %v6969_v63, %v2356_v53  ;;  %4896 = vpow2.f32 %v2321_v52  ;;  %v2230_v59 = vld [vmem:[%s5658_s30 + $0xe8] sm:$0xff] }
 0x295   : > { %v2406_v47 = vpack.c.bf16 %v2388_v28, %v2387_v14  ;;  %v2788_v63 = vsel %vm7031_vm8, %v2785_v33, %v2782_v20  ;;  %v2794_v15 = vmul.f32 %v4887_v54, %v2793_v29 }
 0x296   : > { %v2639_v24 = vsub.f32 0.0, %v2607_v39  ;;  %2195 = vst [vmem:[%s6543_s13 + $0xe8] sm:$0xff] %v7016_v49  ;;  %v2262_v62 = vmul.f32 0.5, %v7016_v49  ;;  %v3020_v38 = vadd.f32 %v2788_v63, %v2572_v7 }
 0x297   : > { %2550 = vmatmul.bf16.gmra.mxu3 %v2406_v47 }
 0x298   : > { %v7028_v4 = vpop.eup %4892  ;;  %v2680_v11 = vmul.f32 1.442695, %v2639_v24  ;;  %v2323_v26 = vmul.f32 1.442695, %v2262_v62 }
 0x299   : > { %v2511_v44 = vpop.f32.mrf.mxu3  ;;  %v4895_v19 = vpop.eup %4894  ;;  %v2798_v21 = vadd.f32 1.0, %v7028_v4  ;;  %v2801_v32 = vmul.f32 -0.5, %v7028_v4  ;;  %v2804_v52 = vand.u32 2147483647, %v7028_v4 }
 0x29a   : > { %v7037_v58 = vadd.f32 %v6848_v45, %v2511_v44  ;;  %v2791_v27 = vmul.f32 0.6931472, %v4895_v19  ;;  %4898 = vpow2.f32 %v2680_v11  ;;  %v4897_v48 = vpop.eup %4896 }
 0x29b   : > { %v2161_v9 = vpop.f32.mrf.mxu2  ;;  %4900 = vpow2.f32 %v2323_v26  ;;  %v2802_v22 = vadd.f32 1.0, %v2801_v32  ;;  %v2357_v56 = vmul.f32 %v4897_v48, %v2229_v12  ;;  %vm2805_vm10 = vcmp.lt.f32.partialorder %v2804_v52, 0.0004427343  ;;  %v2232_v48 = vld [vmem:[%s5658_s30 + $0xf8] sm:$0xff] }
 0x29c   : > { %v2797_v10 = vsel %vm2796_vm9, %v2794_v15, %v2791_v27  ;;  %v2608_v36 = vand.u32 2147483647, %v7037_v58  ;;  %v7045_v35 = vadd.f32 %v6819_v57, %v2161_v9  ;;  %4902 = vlog2.f32 %v2798_v21 }
 0x29d   : > { %v3021_v41 = vadd.f32 %v2797_v10, %v2573_v23  ;;  %v2803_v30 = vmul.f32 %v7028_v4, %v2802_v22  ;;  %v2389_v28 = vsel %vm2200_vm5, %v6998_v0, %v2357_v56  ;;  %v2575_v27 = vmax.f32 %v7008_v3, 0.0 }
 0x29e   : > { %v2640_v1 = vsub.f32 0.0, %v2608_v36  ;;  %2196 = vst [vmem:[%s6543_s13 + $0xf0] sm:$0xff] %v7045_v35  ;;  %v2263_v8 = vmul.f32 0.5, %v7045_v35  ;;  %v2576_v5 = vmax.f32 %v7037_v58, 0.0 }
 0x29f   : > { %v7050_v2 = vpack.c.bf16 %v3021_v41, %v3020_v38  ;;  %v2231_v38 = vld [vmem:[%s5658_s30 + $0xf0] sm:$0xff]  ;;  %s7192_s30 = scalar_lea.vmem [#allocation13], %s4103_s22 }
 0x2a0   : > { %v4899_v60 = vpop.eup %4898  ;;  %v2682_v54 = vmul.f32 1.442695, %v2640_v1  ;;  %v2325_v46 = vmul.f32 1.442695, %v2263_v8 }
 0x2a1   : > { %v2513_v55 = vpop.f32.mrf.mxu3  ;;  %v2807_v51 = vadd.f32 1.0, %v4899_v60  ;;  %3287 = vmatmul.bf16.gmra.mxu0 %v7050_v2  ;;  %3376 = vmatmul.bf16.gmra.mxu1 %v7050_v2  ;;  %v4901_v16 = vpop.eup %4900  ;;  %v2810_v6 = vmul.f32 -0.5, %v4899_v60  ;;  %v2813_v14 = vand.u32 2147483647, %v4899_v60 }
 0x2a2   : > { %v7055_v43 = vadd.f32 %v6848_v45, %v2513_v55  ;;  %4904 = vpow2.f32 %v2682_v54  ;;  %3465 = vmatmul.bf16.gmra.mxu2 %v7050_v2  ;;  %v4903_v13 = vpop.eup %4902  ;;  %v2358_v53 = vmul.f32 %v4901_v16, %v2230_v59 }
 0x2a3   : > { %v2163_v34 = vpop.f32.mrf.mxu2  ;;  %4906 = vlog2.f32 %v2807_v51  ;;  %v2800_v20 = vmul.f32 0.6931472, %v4903_v13  ;;  %v2811_v29 = vadd.f32 1.0, %v2810_v6  ;;  %vm2814_vm11 = vcmp.lt.f32.partialorder %v2813_v14, 0.0004427343 }
 0x2a4   : > { %v2609_v39 = vand.u32 2147483647, %v7055_v43  ;;  %v7063_v25 = vadd.f32 %v6819_v57, %v2163_v34  ;;  %v2390_v57 = vsel %vm2200_vm5, %v7016_v49, %v2358_v53  ;;  %4908 = vpow2.f32 %v2325_v46 }
 0x2a5   : > { %v2407_v47 = vpack.c.bf16 %v2390_v57, %v2389_v28  ;;  %v2806_v21 = vsel %vm2805_vm10, %v2803_v30, %v2800_v20  ;;  %v2812_v0 = vmul.f32 %v4899_v60, %v2811_v29  ;;  %v2574_v49 = vmax.f32 %v6990_v17, 0.0 }
 0x2a6   : > { %v2641_v24 = vsub.f32 0.0, %v2609_v39  ;;  %2197 = vst [vmem:[%s6543_s13 + $0xf8] sm:$0xff] %v7063_v25  ;;  %v2264_v62 = vmul.f32 0.5, %v7063_v25  ;;  %s3882_s13 = scalar_lea.sflag [#allocation15], %s5644_s26 }
 0x2a7   : > { %2555 = vmatmul.bf16.gmra.mxu3 %v2407_v47  ;;  %v3022_v7 = vadd.f32 %v2806_v21, %v2574_v49 }
 0x2a8   : > { %v4905_v33 = vpop.eup %4904  ;;  %v2684_v11 = vmul.f32 1.442695, %v2641_v24  ;;  %v2327_v26 = vmul.f32 1.442695, %v2264_v62 }
 0x2a9   : > { %v2516_v44 = vpop.f32.mrf.mxu3  ;;  %v4907_v19 = vpop.eup %4906  ;;  %v2816_v31 = vadd.f32 1.0, %v4905_v33  ;;  %v2819_v42 = vmul.f32 -0.5, %v4905_v33  ;;  %v2822_v16 = vand.u32 2147483647, %v4905_v33 }
 0x2aa   : > { %v7077_v4 = vadd.f32 %v6848_v45, %v2516_v44  ;;  %v2809_v63 = vmul.f32 0.6931472, %v4907_v19  ;;  %4910 = vpow2.f32 %v2684_v11  ;;  %v4909_v10 = vpop.eup %4908 }
 0x2ab   : > { %4912 = vpow2.f32 %v2327_v26  ;;  %v2359_v32 = vmul.f32 %v4909_v10, %v2231_v38  ;;  %v2820_v55 = vadd.f32 1.0, %v2819_v42  ;;  %vm2823_vm12 = vcmp.lt.f32.partialorder %v2822_v16, 0.0004427343 }
 0x2ac   : > { %v2815_v15 = vsel %vm2814_vm11, %v2812_v0, %v2809_v63  ;;  %v2610_v9 = vand.u32 2147483647, %v7077_v4  ;;  %4914 = vlog2.f32 %v2816_v31 }
 0x2ad   : > { %v3023_v23 = vadd.f32 %v2815_v15, %v2575_v27  ;;  %v2391_v6 = vsel %vm2200_vm5, %v7045_v35, %v2359_v32  ;;  %v2821_v52 = vmul.f32 %v4905_v33, %v2820_v55 }
 0x2ae   : > { %v2642_v36 = vsub.f32 0.0, %v2610_v9 }
 0x2af   : > { %v7083_v41 = vpack.c.bf16 %v3023_v23, %v3022_v7 }
 0x2b0   : > { %v4911_v50 = vpop.eup %4910  ;;  %v2686_v1 = vmul.f32 1.442695, %v2642_v36 }
 0x2b1   : > { %v2518_v17 = vpop.f32.mrf.mxu3  ;;  %v2825_v40 = vadd.f32 1.0, %v4911_v50  ;;  %3292 = vmatmul.bf16.gmra.mxu0 %v7083_v41  ;;  %3381 = vmatmul.bf16.gmra.mxu1 %v7083_v41  ;;  %v4913_v60 = vpop.eup %4912  ;;  %v2828_v54 = vmul.f32 -0.5, %v4911_v50  ;;  %v2831_v56 = vand.u32 2147483647, %v4911_v50 }
 0x2b2   : > { %v7086_v3 = vadd.f32 %v6848_v45, %v2518_v17  ;;  %4916 = vpow2.f32 %v2686_v1  ;;  %3470 = vmatmul.bf16.gmra.mxu2 %v7083_v41  ;;  %v4915_v8 = vpop.eup %4914  ;;  %v2360_v51 = vmul.f32 %v4913_v60, %v2232_v48 }
 0x2b3   : > { %4918 = vlog2.f32 %v2825_v40  ;;  %v2818_v34 = vmul.f32 0.6931472, %v4915_v8  ;;  %v2829_v59 = vadd.f32 1.0, %v2828_v54  ;;  %v2578_v54 = vmax.f32 %v7077_v4, 0.0 }
 0x2b4   : > { %v2611_v12 = vand.u32 2147483647, %v7086_v3  ;;  %v2392_v22 = vsel %vm2200_vm5, %v7063_v25, %v2360_v51  ;;  %v2577_v25 = vmax.f32 %v7055_v43, 0.0  ;;  %vm2832_vm5 = vcmp.lt.f32.partialorder %v2831_v56, 0.0004427343 }
 0x2b5   : > { %v2408_v46 = vpack.c.bf16 %v2392_v22, %v2391_v6  ;;  %v2824_v35 = vsel %vm2823_vm12, %v2821_v52, %v2818_v34  ;;  %v2830_v14 = vmul.f32 %v4911_v50, %v2829_v59  ;;  %v2579_v8 = vmax.f32 %v7086_v3, 0.0 }
 0x2b6   : > { %v2643_v13 = vsub.f32 0.0, %v2611_v12  ;;  %v3024_v33 = vadd.f32 %v2824_v35, %v2576_v5 }
 0x2b7   : > { %2560 = vmatmul.bf16.gmra.mxu3 %v2408_v46 }
 0x2b8   : > { %v4917_v39 = vpop.eup %4916  ;;  %v2688_v53 = vmul.f32 1.442695, %v2643_v13 }
 0x2b9   : > { %v2521_v20 = vpop.f32.mrf.mxu3  ;;  %v4919_v29 = vpop.eup %4918  ;;  %v2834_v24 = vadd.f32 1.0, %v4917_v39  ;;  %v2837_v19 = vmul.f32 -0.5, %v4917_v39  ;;  %v2840_v15 = vand.u32 2147483647, %v4917_v39 }
 0x2ba   : > { %v7100_v62 = vadd.f32 %v6848_v45, %v2521_v20  ;;  %v2827_v30 = vmul.f32 0.6931472, %v4919_v29  ;;  %4920 = vpow2.f32 %v2688_v53 }
 0x2bb   : > { %4922 = vlog2.f32 %v2834_v24  ;;  %v2838_v49 = vadd.f32 1.0, %v2837_v19  ;;  %vm2841_vm13 = vcmp.lt.f32.partialorder %v2840_v15, 0.0004427343 }
 0x2bc   : > { %v2833_v28 = vsel %vm2832_vm5, %v2830_v14, %v2827_v30  ;;  %v2612_v57 = vand.u32 2147483647, %v7100_v62  ;;  %v2580_v19 = vmax.f32 %v7100_v62, 0.0 }
 0x2bd   : > { %v3025_v11 = vadd.f32 %v2833_v28, %v2577_v25  ;;  %v2839_v38 = vmul.f32 %v4917_v39, %v2838_v49 }
 0x2be   : > { %v2644_v26 = vsub.f32 0.0, %v2612_v57  ;;  %v7133_v57 = vld [vmem:[%s7689_s7] ss:$0 sm:$0xff] }
 0x2bf   : > { %v7105_v47 = vpack.c.bf16 %v3025_v11, %v3024_v33 }
 0x2c0   : > { %v4921_v44 = vpop.eup %4920  ;;  %v2690_v31 = vmul.f32 1.442695, %v2644_v26 }
 0x2c1   : > { %v2523_v21 = vpop.f32.mrf.mxu3  ;;  %v2843_v63 = vadd.f32 1.0, %v4921_v44  ;;  %3297 = vmatmul.bf16.gmra.mxu0 %v7105_v47  ;;  %3386 = vmatmul.bf16.gmra.mxu1 %v7105_v47  ;;  %v2846_v58 = vmul.f32 -0.5, %v4921_v44  ;;  %v4923_v43 = vpop.eup %4922  ;;  %v2849_v10 = vand.u32 2147483647, %v4921_v44 }
 0x2c2   : > { %v7108_v0 = vadd.f32 %v6848_v45, %v2523_v21  ;;  %4924 = vpow2.f32 %v2690_v31  ;;  %3475 = vmatmul.bf16.gmra.mxu2 %v7105_v47  ;;  %v2836_v9 = vmul.f32 0.6931472, %v4923_v43 }
 0x2c3   : > { %4926 = vlog2.f32 %v2843_v63  ;;  %v2847_v7 = vadd.f32 1.0, %v2846_v58  ;;  %vm2850_vm14 = vcmp.lt.f32.partialorder %v2849_v10, 0.0004427343 }
 0x2c4   : > { %v2613_v27 = vand.u32 2147483647, %v7108_v0  ;;  %v2842_v48 = vsel %vm2841_vm13, %v2839_v38, %v2836_v9  ;;  %v2581_v31 = vmax.f32 %v7108_v0, 0.0 }
 0x2c5   : > { %v2848_v60 = vmul.f32 %v4921_v44, %v2847_v7  ;;  %v3026_v51 = vadd.f32 %v2842_v48, %v2578_v54  ;;  %v7154_v48 = vld [vmem:[%s7691_s9] sm:$0xf] }
 0x2c6   : > { %v2645_v23 = vsub.f32 0.0, %v2613_v27 }
 0x2c7   : > { %3539 = vmatmul.bf16.vlgmr.msrb.gmra.mxu3 %v6910_v18 }
 0x2c8   : > { %v4925_v36 = vpop.eup %4924  ;;  %v2692_v50 = vmul.f32 1.442695, %v2645_v23 }
 0x2c9   : > { %v2526_v42 = vpop.f32.mrf.mxu3  ;;  %v4927_v1 = vpop.eup %4926  ;;  %v2852_v17 = vadd.f32 1.0, %v4925_v36  ;;  %v2855_v13 = vmul.f32 -0.5, %v4925_v36  ;;  %v2858_v53 = vand.u32 2147483647, %v4925_v36 }
 0x2ca   : > { %v7115_v40 = vadd.f32 %v6848_v45, %v2526_v42  ;;  %v2845_v32 = vmul.f32 0.6931472, %v4927_v1  ;;  %4928 = vpow2.f32 %v2692_v50 }
 0x2cb   : > { %4930 = vlog2.f32 %v2852_v17  ;;  %v2856_v39 = vadd.f32 1.0, %v2855_v13  ;;  %vm2859_vm15 = vcmp.lt.f32.partialorder %v2858_v53, 0.0004427343  ;;  %v7164_v13 = vperm.slane %v7154_v48, 1 }
 0x2cc   : > { %v2851_v55 = vsel %vm2850_vm14, %v2848_v60, %v2845_v32  ;;  %v2614_v12 = vand.u32 2147483647, %v7115_v40 }
 0x2cd   : > { %v3027_v16 = vadd.f32 %v2851_v55, %v2579_v8  ;;  %v2857_v30 = vmul.f32 %v4925_v36, %v2856_v39  ;;  %v2582_v8 = vmax.f32 %v7115_v40, 0.0 }
 0x2ce   : > { %v2646_v6 = vsub.f32 0.0, %v2614_v12 }
 0x2cf   : > { %v7121_v34 = vpack.c.bf16 %v3027_v16, %v3026_v51 }
 0x2d0   : > { %v4929_v59 = vpop.eup %4928  ;;  %v2694_v22 = vmul.f32 1.442695, %v2646_v6 }
 0x2d1   : > { %v2528_v56 = vpop.f32.mrf.mxu3  ;;  %v2861_v46 = vadd.f32 1.0, %v4929_v59  ;;  %3302 = vmatmul.bf16.gmra.mxu0 %v7121_v34  ;;  %3391 = vmatmul.bf16.gmra.mxu1 %v7121_v34  ;;  %v2864_v4 = vmul.f32 -0.5, %v4929_v59  ;;  %v4931_v3 = vpop.eup %4930  ;;  %v2867_v35 = vand.u32 2147483647, %v4929_v59 }
 0x2d2   : > { %v7124_v18 = vadd.f32 %v6848_v45, %v2528_v56  ;;  %4932 = vpow2.f32 %v2694_v22  ;;  %3480 = vmatmul.bf16.gmra.mxu2 %v7121_v34  ;;  %v2854_v20 = vmul.f32 0.6931472, %v4931_v3 }
 0x2d3   : > { %4934 = vlog2.f32 %v2861_v46  ;;  %v2865_v29 = vadd.f32 1.0, %v2864_v4  ;;  %vm2868_vm0 = vcmp.lt.f32.partialorder %v2867_v35, 0.0004427343 }
 0x2d4   : > { %v2615_v52 = vand.u32 2147483647, %v7124_v18  ;;  %v2860_v11 = vsel %vm2859_vm15, %v2857_v30, %v2854_v20  ;;  %v2583_v46 = vmax.f32 %v7124_v18, 0.0 }
 0x2d5   : > { %v2866_v44 = vmul.f32 %v4929_v59, %v2865_v29  ;;  %v3028_v58 = vadd.f32 %v2860_v11, %v2580_v19  ;;  %v7161_v59 = vperm.slane %v7154_v48, 0  ;;  %v7181_v11 = vperm.slane %v7154_v48, 2 }
 0x2d6   : > { %v2647_v24 = vsub.f32 0.0, %v2615_v52 }
 0x2d7   : > { %3544 = vmatmul.bf16.gmra.mxu3 %v6953_v37 }
 0x2d8   : > { %v4933_v45 = vpop.eup %4932  ;;  %v2696_v14 = vmul.f32 1.442695, %v2647_v24 }
 0x2d9   : > { %v2531_v5 = vpop.f32.mrf.mxu3  ;;  %v4935_v25 = vpop.eup %4934  ;;  %v2870_v28 = vadd.f32 1.0, %v4933_v45  ;;  %v2873_v27 = vmul.f32 -0.5, %v4933_v45  ;;  %v2876_v38 = vand.u32 2147483647, %v4933_v45 }
 0x2da   : > { %v7136_v33 = vadd.f32 %v7133_v57, %v2531_v5  ;;  %v2863_v26 = vmul.f32 0.6931472, %v4935_v25  ;;  %4936 = vpow2.f32 %v2696_v14 }
 0x2db   : > { %4938 = vlog2.f32 %v2870_v28  ;;  %v2874_v36 = vadd.f32 1.0, %v2873_v27  ;;  %vm2877_vm1 = vcmp.lt.f32.partialorder %v2876_v38, 0.0004427343 }
 0x2dc   : > { %v2869_v21 = vsel %vm2868_vm0, %v2866_v44, %v2863_v26  ;;  %v2616_v63 = vand.u32 2147483647, %v7136_v33 }
 0x2dd   : > { %v3029_v43 = vadd.f32 %v2869_v21, %v2581_v31  ;;  %v2875_v32 = vmul.f32 %v4933_v45, %v2874_v36 }
 0x2de   : > { %v2648_v49 = vsub.f32 0.0, %v2616_v63 }
 0x2df   : > { %v7142_v15 = vpack.c.bf16 %v3029_v43, %v3028_v58 }
 0x2e0   : > { %v4937_v9 = vpop.eup %4936  ;;  %v2698_v7 = vmul.f32 1.442695, %v2648_v49 }
 0x2e1   : > { %v2533_v23 = vpop.f32.mrf.mxu3  ;;  %v2879_v10 = vadd.f32 1.0, %v4937_v9  ;;  %3307 = vmatmul.bf16.gmra.mxu0 %v7142_v15  ;;  %3396 = vmatmul.bf16.gmra.mxu1 %v7142_v15  ;;  %v4939_v62 = vpop.eup %4938  ;;  %v2882_v0 = vmul.f32 -0.5, %v4937_v9  ;;  %v2885_v60 = vand.u32 2147483647, %v4937_v9 }
 0x2e2   : > { %v7145_v37 = vadd.f32 %v7133_v57, %v2533_v23  ;;  %4940 = vpow2.f32 %v2698_v7  ;;  %3485 = vmatmul.bf16.gmra.mxu2 %v7142_v15  ;;  %v2872_v42 = vmul.f32 0.6931472, %v4939_v62 }
 0x2e3   : > { %4942 = vlog2.f32 %v2879_v10  ;;  %v2883_v1 = vadd.f32 1.0, %v2882_v0  ;;  %vm2886_vm2 = vcmp.lt.f32.partialorder %v2885_v60, 0.0004427343  ;;  %v2584_v60 = vmax.f32 %v7136_v33, 0.0 }
 0x2e4   : > { %v2617_v50 = vand.u32 2147483647, %v7145_v37  ;;  %v2878_v51 = vsel %vm2877_vm1, %v2875_v32, %v2872_v42  ;;  %v2585_v33 = vmax.f32 %v7145_v37, 0.0 }
 0x2e5   : > { %v2884_v56 = vmul.f32 %v4937_v9, %v2883_v1  ;;  %v3030_v4 = vadd.f32 %v2878_v51, %v2582_v8 }
 0x2e6   : > { %v2649_v17 = vsub.f32 0.0, %v2617_v50 }
 0x2e7   : > { %3549 = vmatmul.bf16.gmra.mxu3 %v7002_v61 }
 0x2e8   : > { %v7156_v54 = vpop.eup %4940  ;;  %v2700_v55 = vmul.f32 1.442695, %v2649_v17 }
 0x2e9   : > { %v4943_v12 = vpop.eup %4942  ;;  %v2888_v16 = vadd.f32 1.0, %v7156_v54  ;;  %v2536_v6 = vpop.f32.mrf.mxu3  ;;  %v2891_v18 = vmul.f32 -0.5, %v7156_v54  ;;  %v2894_v49 = vand.u32 2147483647, %v7156_v54 }
 0x2ea   : > { %v2881_v22 = vmul.f32 0.6931472, %v4943_v12  ;;  %4944 = vpow2.f32 %v2700_v55  ;;  %v7168_v40 = vadd.f32 %v7133_v57, %v2536_v6 }
 0x2eb   : > { %4946 = vlog2.f32 %v2888_v16  ;;  %v2892_v21 = vadd.f32 1.0, %v2891_v18  ;;  %vm7200_vm3 = vcmp.lt.f32.partialorder %v2894_v49, 0.0004427343 }
 0x2ec   : > { %v2887_v3 = vsel %vm2886_vm2, %v2884_v56, %v2881_v22  ;;  %v2618_v39 = vand.u32 2147483647, %v7168_v40 }
 0x2ed   : > { %v3273_v52 = vpop.f32.mrf.mxu0  ;;  %v3362_v53 = vpop.f32.mrf.mxu1  ;;  %v3031_v20 = vadd.f32 %v2887_v3, %v2583_v46  ;;  %v2893_v42 = vmul.f32 %v7156_v54, %v2892_v21 }
 0x2ee   : > { %v3274_v29 = vadd.f32 %v3273_v52, %v7161_v59  ;;  %v3363_v24 = vadd.f32 %v3362_v53, %v7164_v13  ;;  %v2650_v61 = vsub.f32 0.0, %v2618_v39 }
 0x2ef   : > { %v7174_v45 = vpack.c.bf16 %v3031_v20, %v3030_v4 }
 0x2f0   : > { %v3620_v35 = vmul.f32 1.442695, %v3274_v29  ;;  %v4945_v30 = vpop.eup %4944  ;;  %v2702_v14 = vmul.f32 1.442695, %v2650_v61  ;;  %v3622_v5 = vmul.f32 1.442695, %v3363_v24 }
 0x2f1   : > { %v2897_v25 = vadd.f32 1.0, %v4945_v30  ;;  %v2538_v28 = vpop.f32.mrf.mxu3  ;;  %3312 = vmatmul.bf16.gmra.mxu0 %v7174_v45  ;;  %3401 = vmatmul.bf16.gmra.mxu1 %v7174_v45  ;;  %v2900_v26 = vmul.f32 -0.5, %v4945_v30  ;;  %v4947_v19 = vpop.eup %4946  ;;  %v2903_v36 = vand.u32 2147483647, %v4945_v30 }
 0x2f2   : > { %4948 = vpow2.f32 %v3620_v35  ;;  %v7184_v44 = vadd.f32 %v7133_v57, %v2538_v28  ;;  %3490 = vmatmul.bf16.gmra.mxu2 %v7174_v45  ;;  %v2890_v7 = vmul.f32 0.6931472, %v4947_v19 }
 0x2f3   : > { %4950 = vpow2.f32 %v2702_v14  ;;  %v2901_v23 = vadd.f32 1.0, %v2900_v26  ;;  %vm2904_vm4 = vcmp.lt.f32.partialorder %v2903_v36, 0.0004427343 }
 0x2f4   : > { %4952 = vlog2.f32 %v2897_v25  ;;  %v3451_v31 = vpop.f32.mrf.mxu2  ;;  %v2619_v63 = vand.u32 2147483647, %v7184_v44  ;;  %v2896_v51 = vsel %vm7200_vm3, %v2893_v42, %v2890_v7 }
 0x2f5   : > { %4954 = vpow2.f32 %v3622_v5  ;;  %v3275_v58 = vpop.f32.mrf.mxu0  ;;  %v3364_v43 = vpop.f32.mrf.mxu1  ;;  %v3452_v27 = vadd.f32 %v3451_v31, %v7181_v11  ;;  %v2902_v54 = vmul.f32 %v4945_v30, %v2901_v23  ;;  %v3032_v52 = vadd.f32 %v2896_v51, %v2584_v60 }
 0x2f6   : > { %v3276_v9 = vadd.f32 %v3275_v58, %v7161_v59  ;;  %v2651_v10 = vsub.f32 0.0, %v2619_v63  ;;  %v3365_v62 = vadd.f32 %v3364_v43, %v7164_v13 }
 0x2f7   : > { %3812 = vst [vmem:[%s7192_s30 + $0x10] sm:$0xff] %v3452_v27  ;;  %3554 = vmatmul.bf16.gmra.mxu3 %v7050_v2 }
 0x2f8   : > { %v4949_v0 = vpop.eup %4948  ;;  %v3624_v38 = vmul.f32 1.442695, %v3276_v9  ;;  %v2704_v1 = vmul.f32 1.442695, %v2651_v10  ;;  %v3626_v17 = vmul.f32 1.442695, %v3365_v62 }
 0x2f9   : > { %v7195_v50 = vpop.eup %4950  ;;  %3748 = vst [vmem:[%s7192_s30] sm:$0xff] %v4949_v0 }
 0x2fa   : > { %v4953_v32 = vpop.eup %4952  ;;  %v2906_v55 = vadd.f32 1.0, %v7195_v50  ;;  %4956 = vpow2.f32 %v3624_v38  ;;  %v2541_v6 = vpop.f32.mrf.mxu3  ;;  %v2909_v24 = vmul.f32 -0.5, %v7195_v50  ;;  %v2912_v63 = vand.u32 2147483647, %v7195_v50 }
 0x2fb   : > { %v4955_v12 = vpop.eup %4954  ;;  %v2899_v16 = vmul.f32 0.6931472, %v4953_v32  ;;  %4958 = vpow2.f32 %v2704_v1  ;;  %v7211_v22 = vadd.f32 %v7133_v57, %v2541_v6 }
 0x2fc   : > { %4960 = vlog2.f32 %v2906_v55  ;;  %3749 = vst [vmem:[%s7192_s30 + $0x8] sm:$0xff] %v4955_v12  ;;  %v3453_v56 = vpop.f32.mrf.mxu2  ;;  %v2910_v21 = vadd.f32 1.0, %v2909_v24  ;;  %vm7236_vm6 = vcmp.lt.f32.partialorder %v2912_v63, 0.0004427343  ;;  %v2586_v55 = vmax.f32 %v7168_v40, 0.0 }
 0x2fd   : > { %v2905_v46 = vsel %vm2904_vm4, %v2902_v54, %v2899_v16  ;;  %4962 = vpow2.f32 %v3626_v17  ;;  %v3454_v4 = vadd.f32 %v3453_v56, %v7181_v11  ;;  %v3278_v3 = vpop.f32.mrf.mxu0  ;;  %v3367_v39 = vpop.f32.mrf.mxu1  ;;  %v2620_v53 = vand.u32 2147483647, %v7211_v22 }
 0x2fe   : > { %v3033_v2 = vadd.f32 %v2905_v46, %v2585_v33  ;;  %v3279_v37 = vadd.f32 %v3278_v3, %v7161_v59  ;;  %v3368_v20 = vadd.f32 %v3367_v39, %v7164_v13  ;;  %v2911_v36 = vmul.f32 %v7195_v50, %v2910_v21 }
 0x2ff   : > { %3814 = vst [vmem:[%s7192_s30 + $0x30] sm:$0xff] %v3454_v4  ;;  %v2652_v61 = vsub.f32 0.0, %v2620_v53  ;;  %v2587_v33 = vmax.f32 %v7184_v44, 0.0 }
 0x300   : > { %v4957_v29 = vpop.eup %4956  ;;  %v7219_v35 = vpack.c.bf16 %v3033_v2, %v3032_v52  ;;  %v3628_v18 = vmul.f32 1.442695, %v3279_v37  ;;  %v3630_v28 = vmul.f32 1.442695, %v3368_v20 }
 0x301   : > { %v4959_v30 = vpop.eup %4958  ;;  %3750 = vst [vmem:[%s7192_s30 + $0x20] sm:$0xff] %v4957_v29  ;;  %v2706_v25 = vmul.f32 1.442695, %v2652_v61 }
 0x302   : > { %v4961_v14 = vpop.eup %4960  ;;  %v2915_v5 = vadd.f32 1.0, %v4959_v30  ;;  %3317 = vmatmul.bf16.gmra.mxu0 %v7219_v35  ;;  %3406 = vmatmul.bf16.gmra.mxu1 %v7219_v35  ;;  %v2918_v19 = vmul.f32 -0.5, %v4959_v30  ;;  %4964 = vpow2.f32 %v3628_v18  ;;  %v2543_v31 = vpop.f32.mrf.mxu3  ;;  %v2921_v42 = vand.u32 2147483647, %v4959_v30 }
 0x303   : > { %v4963_v26 = vpop.eup %4962  ;;  %3495 = vmatmul.bf16.gmra.mxu2 %v7219_v35  ;;  %v7228_v58 = vadd.f32 %v7133_v57, %v2543_v31  ;;  %v2908_v7 = vmul.f32 0.6931472, %v4961_v14 }
 0x304   : > { %4966 = vlog2.f32 %v2915_v5  ;;  %3751 = vst [vmem:[%s7192_s30 + $0x28] sm:$0xff] %v4963_v26  ;;  %v3456_v43 = vpop.f32.mrf.mxu2  ;;  %v2919_v23 = vadd.f32 1.0, %v2918_v19  ;;  %vm2922_vm7 = vcmp.lt.f32.partialorder %v2921_v42, 0.0004427343 }
 0x305   : > { %4968 = vpow2.f32 %v2706_v25  ;;  %v3457_v49 = vadd.f32 %v3456_v43, %v7181_v11  ;;  %v3280_v27 = vpop.f32.mrf.mxu0  ;;  %v3369_v9 = vpop.f32.mrf.mxu1  ;;  %v2621_v10 = vand.u32 2147483647, %v7228_v58  ;;  %v2914_v12 = vsel %vm7236_vm6, %v2911_v36, %v2908_v7 }
 0x306   : > { %4970 = vpow2.f32 %v3630_v28  ;;  %v3281_v62 = vadd.f32 %v3280_v27, %v7161_v59  ;;  %v3370_v0 = vadd.f32 %v3369_v9, %v7164_v13  ;;  %v2920_v16 = vmul.f32 %v4959_v30, %v2919_v23 }
 0x307   : > { %3816 = vst [vmem:[%s7192_s30 + $0x50] sm:$0xff] %v3457_v49  ;;  %v2653_v17 = vsub.f32 0.0, %v2621_v10  ;;  %3559 = vmatmul.bf16.gmra.mxu3 %v7083_v41  ;;  %v3034_v3 = vadd.f32 %v2914_v12, %v2586_v55 }
 0x308   : > { %v4965_v1 = vpop.eup %4964  ;;  %v3632_v32 = vmul.f32 1.442695, %v3281_v62  ;;  %v3634_v60 = vmul.f32 1.442695, %v3370_v0 }
 0x309   : > { %3752 = vst [vmem:[%s7192_s30 + $0x40] sm:$0xff] %v4965_v1  ;;  %v2708_v54 = vmul.f32 1.442695, %v2653_v17 }
 0x30a   : > { %v4967_v8 = vpop.eup %4966  ;;  %4972 = vpow2.f32 %v3632_v32  ;;  %v2546_v52 = vpop.f32.mrf.mxu3 }
 0x30b   : > { %v7244_v51 = vpop.eup %4968  ;;  %v2917_v50 = vmul.f32 0.6931472, %v4967_v8  ;;  %4974 = vpow2.f32 %v3634_v60  ;;  %v7252_v41 = vadd.f32 %v7133_v57, %v2546_v52 }
 0x30c   : > { %v4971_v6 = vpop.eup %4970  ;;  %v2924_v40 = vadd.f32 1.0, %v7244_v51  ;;  %v3458_v56 = vpop.f32.mrf.mxu2  ;;  %4976 = vpow2.f32 %v2708_v54  ;;  %v2927_v30 = vmul.f32 -0.5, %v7244_v51  ;;  %v2930_v49 = vand.u32 2147483647, %v7244_v51 }
 0x30d   : > { %v2923_v46 = vsel %vm2922_vm7, %v2920_v16, %v2917_v50  ;;  %3753 = vst [vmem:[%s7192_s30 + $0x48] sm:$0xff] %v4971_v6  ;;  %v3459_v4 = vadd.f32 %v3458_v56, %v7181_v11  ;;  %v2622_v24 = vand.u32 2147483647, %v7252_v41  ;;  %v2589_v56 = vmax.f32 %v7228_v58, 0.0 }
 0x30e   : > { %v3035_v39 = vadd.f32 %v2923_v46, %v2587_v33  ;;  %4978 = vlog2.f32 %v2924_v40  ;;  %v3283_v44 = vpop.f32.mrf.mxu0  ;;  %v3372_v2 = vpop.f32.mrf.mxu1  ;;  %v2928_v21 = vadd.f32 1.0, %v2927_v30  ;;  %vm7276_vm8 = vcmp.lt.f32.partialorder %v2930_v49, 0.0004427343 }
 0x30f   : > { %3818 = vst [vmem:[%s7192_s30 + $0x70] sm:$0xff] %v3459_v4  ;;  %v3284_v53 = vadd.f32 %v3283_v44, %v7161_v59  ;;  %v3373_v37 = vadd.f32 %v3372_v2, %v7164_v13  ;;  %v2654_v25 = vsub.f32 0.0, %v2622_v24  ;;  %v2588_v40 = vmax.f32 %v7211_v22, 0.0 }
 0x310   : > { %v7257_v20 = vpack.c.bf16 %v3035_v39, %v3034_v3  ;;  %v4973_v29 = vpop.eup %4972  ;;  %v2929_v1 = vmul.f32 %v7244_v51, %v2928_v21 }
 0x311   : > { %v4975_v61 = vpop.eup %4974  ;;  %3754 = vst [vmem:[%s7192_s30 + $0x60] sm:$0xff] %v4973_v29  ;;  %v3636_v18 = vmul.f32 1.442695, %v3284_v53  ;;  %v3638_v14 = vmul.f32 1.442695, %v3373_v37 }
 0x312   : > { %3322 = vmatmul.bf16.gmra.mxu0 %v7257_v20  ;;  %3411 = vmatmul.bf16.gmra.mxu1 %v7257_v20  ;;  %v4977_v5 = vpop.eup %4976  ;;  %3755 = vst [vmem:[%s7192_s30 + $0x68] sm:$0xff] %v4975_v61  ;;  %v2710_v31 = vmul.f32 1.442695, %v2654_v25  ;;  %v2548_v63 = vpop.f32.mrf.mxu3 }
 0x313   : > { %3500 = vmatmul.bf16.gmra.mxu2 %v7257_v20  ;;  %v2933_v28 = vadd.f32 1.0, %v4977_v5  ;;  %4980 = vpow2.f32 %v3636_v18  ;;  %v2936_v19 = vmul.f32 -0.5, %v4977_v5  ;;  %v7268_v27 = vadd.f32 %v7133_v57, %v2548_v63 }
 0x314   : > { %v4979_v26 = vpop.eup %4978  ;;  %4982 = vpow2.f32 %v3638_v14  ;;  %v2939_v17 = vand.u32 2147483647, %v4977_v5 }
 0x315   : > { %4984 = vlog2.f32 %v2933_v28  ;;  %v3461_v43 = vpop.f32.mrf.mxu2  ;;  %v2926_v10 = vmul.f32 0.6931472, %v4979_v26  ;;  %v2937_v36 = vadd.f32 1.0, %v2936_v19  ;;  %v2623_v38 = vand.u32 2147483647, %v7268_v27 }
 0x316   : > { %4986 = vpow2.f32 %v2710_v31  ;;  %v3462_v9 = vadd.f32 %v3461_v43, %v7181_v11  ;;  %v3285_v7 = vpop.f32.mrf.mxu0  ;;  %v3374_v23 = vpop.f32.mrf.mxu1  ;;  %vm2940_vm9 = vcmp.lt.f32.partialorder %v2939_v17, 0.0004427343 }
 0x317   : > { %v3286_v62 = vadd.f32 %v3285_v7, %v7161_v59  ;;  %v3375_v0 = vadd.f32 %v3374_v23, %v7164_v13  ;;  %v2655_v12 = vsub.f32 0.0, %v2623_v38  ;;  %3564 = vmatmul.bf16.gmra.mxu3 %v7105_v47  ;;  %v2932_v16 = vsel %vm7276_vm8, %v2929_v1, %v2926_v10 }
 0x318   : > { %3820 = vst [vmem:[%s7192_s30 + $0x90] sm:$0xff] %v3462_v9  ;;  %v2938_v6 = vmul.f32 %v4977_v5, %v2937_v36  ;;  %v3036_v22 = vadd.f32 %v2932_v16, %v2588_v40 }
 0x319   : > { %v4981_v42 = vpop.eup %4980  ;;  %v3640_v32 = vmul.f32 1.442695, %v3286_v62  ;;  %v3642_v60 = vmul.f32 1.442695, %v3375_v0  ;;  %v2712_v33 = vmul.f32 1.442695, %v2655_v12 }
 0x31a   : > { %v4983_v8 = vpop.eup %4982  ;;  %3756 = vst [vmem:[%s7192_s30 + $0x80] sm:$0xff] %v4981_v42  ;;  %v2551_v46 = vpop.f32.mrf.mxu3 }
 0x31b   : > { %v4985_v50 = vpop.eup %4984  ;;  %3757 = vst [vmem:[%s7192_s30 + $0x88] sm:$0xff] %v4983_v8  ;;  %4988 = vpow2.f32 %v3640_v32  ;;  %v7291_v39 = vadd.f32 %v7133_v57, %v2551_v46 }
 0x31c   : > { %v7285_v54 = vpop.eup %4986  ;;  %v2935_v51 = vmul.f32 0.6931472, %v4985_v50  ;;  %4990 = vpow2.f32 %v3642_v60 }
 0x31d   : > { %v2942_v47 = vadd.f32 1.0, %v7285_v54  ;;  %v3463_v4 = vpop.f32.mrf.mxu2  ;;  %4992 = vpow2.f32 %v2712_v33  ;;  %v2624_v58 = vand.u32 2147483647, %v7291_v39  ;;  %v2945_v25 = vmul.f32 -0.5, %v7285_v54 }
 0x31e   : > { %v2941_v3 = vsel %vm2940_vm9, %v2938_v6, %v2935_v51  ;;  %v3464_v52 = vadd.f32 %v3463_v4, %v7181_v11  ;;  %v3288_v44 = vpop.f32.mrf.mxu0  ;;  %v3377_v2 = vpop.f32.mrf.mxu1  ;;  %v2948_v0 = vand.u32 2147483647, %v7285_v54 }
 0x31f   : > { %v3037_v53 = vadd.f32 %v2941_v3, %v2589_v56  ;;  %4994 = vlog2.f32 %v2942_v47  ;;  %v3289_v37 = vadd.f32 %v3288_v44, %v7161_v59  ;;  %v3378_v29 = vadd.f32 %v3377_v2, %v7164_v13 }
 0x320   : > { %3822 = vst [vmem:[%s7192_s30 + $0xb0] sm:$0xff] %v3464_v52  ;;  %v2656_v18 = vsub.f32 0.0, %v2624_v58  ;;  %v2946_v10 = vadd.f32 1.0, %v2945_v25  ;;  %vm7320_vm10 = vcmp.lt.f32.partialorder %v2948_v0, 0.0004427343  ;;  %v2590_v2 = vmax.f32 %v7252_v41, 0.0 }
 0x321   : > { %v4989_v24 = vpop.eup %4988  ;;  %v7298_v61 = vpack.c.bf16 %v3037_v53, %v3036_v22  ;;  %v3644_v14 = vmul.f32 1.442695, %v3289_v37  ;;  %v3646_v5 = vmul.f32 1.442695, %v3378_v29  ;;  %v2591_v22 = vmax.f32 %v7268_v27, 0.0 }
 0x322   : > { %v4991_v30 = vpop.eup %4990  ;;  %3758 = vst [vmem:[%s7192_s30 + $0xa0] sm:$0xff] %v4989_v24  ;;  %v2714_v26 = vmul.f32 1.442695, %v2656_v18  ;;  %v2553_v21 = vpop.f32.mrf.mxu3  ;;  %v2947_v12 = vmul.f32 %v7285_v54, %v2946_v10 }
 0x323   : > { %3759 = vst [vmem:[%s7192_s30 + $0xa8] sm:$0xff] %v4991_v30  ;;  %3327 = vmatmul.bf16.gmra.mxu0 %v7298_v61  ;;  %3416 = vmatmul.bf16.gmra.mxu1 %v7298_v61  ;;  %v4993_v28 = vpop.eup %4992  ;;  %4996 = vpow2.f32 %v3644_v14  ;;  %v7307_v49 = vadd.f32 %v7133_v57, %v2553_v21 }
 0x324   : > { %3505 = vmatmul.bf16.gmra.mxu2 %v7298_v61  ;;  %v2951_v19 = vadd.f32 1.0, %v4993_v28  ;;  %v2954_v31 = vmul.f32 -0.5, %v4993_v28  ;;  %4998 = vpow2.f32 %v3646_v5  ;;  %v2957_v50 = vand.u32 2147483647, %v4993_v28 }
 0x325   : > { %v3466_v63 = vpop.f32.mrf.mxu2  ;;  %v4995_v43 = vpop.eup %4994  ;;  %5000 = vpow2.f32 %v2714_v26  ;;  %v2625_v36 = vand.u32 2147483647, %v7307_v49 }
 0x326   : > { %v3467_v9 = vadd.f32 %v3466_v63, %v7181_v11  ;;  %v3290_v7 = vpop.f32.mrf.mxu0  ;;  %v3379_v23 = vpop.f32.mrf.mxu1  ;;  %5002 = vlog2.f32 %v2951_v19  ;;  %v2944_v42 = vmul.f32 0.6931472, %v4995_v43  ;;  %v2955_v1 = vadd.f32 1.0, %v2954_v31 }
 0x327   : > { %v3291_v62 = vadd.f32 %v3290_v7, %v7161_v59  ;;  %v3380_v38 = vadd.f32 %v3379_v23, %v7164_v13  ;;  %v2657_v60 = vsub.f32 0.0, %v2625_v36  ;;  %3569 = vmatmul.bf16.gmra.mxu3 %v7121_v34  ;;  %vm2958_vm11 = vcmp.lt.f32.partialorder %v2957_v50, 0.0004427343 }
 0x328   : > { %3824 = vst [vmem:[%s7192_s30 + $0xd0] sm:$0xff] %v3467_v9  ;;  %v2950_v40 = vsel %vm7320_vm10, %v2947_v12, %v2944_v42  ;;  %v2956_v34 = vmul.f32 %v4993_v28, %v2955_v1 }
 0x329   : > { %v3648_v17 = vmul.f32 1.442695, %v3291_v62  ;;  %v4997_v32 = vpop.eup %4996  ;;  %v3650_v8 = vmul.f32 1.442695, %v3380_v38  ;;  %v2716_v6 = vmul.f32 1.442695, %v2657_v60  ;;  %v3038_v30 = vadd.f32 %v2950_v40, %v2590_v2 }
 0x32a   : > { %v4999_v55 = vpop.eup %4998  ;;  %3760 = vst [vmem:[%s7192_s30 + $0xc0] sm:$0xff] %v4997_v32  ;;  %v2556_v54 = vpop.f32.mrf.mxu3 }
 0x32b   : > { %5004 = vpow2.f32 %v3648_v17  ;;  %v7318_v16 = vpop.eup %5000  ;;  %3761 = vst [vmem:[%s7192_s30 + $0xc8] sm:$0xff] %v4999_v55  ;;  %v7329_v4 = vadd.f32 %v7133_v57, %v2556_v54 }
 0x32c   : > { %5006 = vpow2.f32 %v3650_v8  ;;  %v5003_v33 = vpop.eup %5002  ;;  %v2960_v56 = vadd.f32 1.0, %v7318_v16  ;;  %v2963_v27 = vmul.f32 -0.5, %v7318_v16  ;;  %v2966_v38 = vand.u32 2147483647, %v7318_v16 }
 0x32d   : > { %v3468_v47 = vpop.f32.mrf.mxu2  ;;  %v2953_v46 = vmul.f32 0.6931472, %v5003_v33  ;;  %5008 = vpow2.f32 %v2716_v6  ;;  %v2626_v37 = vand.u32 2147483647, %v7329_v4 }
 0x32e   : > { %v3469_v3 = vadd.f32 %v3468_v47, %v7181_v11  ;;  %v3293_v52 = vpop.f32.mrf.mxu0  ;;  %v3382_v44 = vpop.f32.mrf.mxu1  ;;  %5010 = vlog2.f32 %v2960_v56  ;;  %v2964_v0 = vadd.f32 1.0, %v2963_v27  ;;  %vm7361_vm12 = vcmp.lt.f32.partialorder %v2966_v38, 0.0004427343 }
 0x32f   : > { %v3294_v53 = vadd.f32 %v3293_v52, %v7161_v59  ;;  %v2959_v58 = vsel %vm2958_vm11, %v2956_v34, %v2953_v46  ;;  %v3383_v29 = vadd.f32 %v3382_v44, %v7164_v13  ;;  %v2658_v41 = vsub.f32 0.0, %v2626_v37 }
 0x330   : > { %3826 = vst [vmem:[%s7192_s30 + $0xf0] sm:$0xff] %v3469_v3  ;;  %v3039_v18 = vadd.f32 %v2959_v58, %v2591_v22  ;;  %v2965_v51 = vmul.f32 %v7318_v16, %v2964_v0  ;;  %v2593_v58 = vmax.f32 %v7307_v49, 0.0 }
 0x331   : > { %v5005_v24 = vpop.eup %5004  ;;  %v3652_v14 = vmul.f32 1.442695, %v3294_v53  ;;  %v3654_v25 = vmul.f32 1.442695, %v3383_v29  ;;  %v2718_v19 = vmul.f32 1.442695, %v2658_v41 }
 0x332   : > { %v5007_v5 = vpop.eup %5006  ;;  %3762 = vst [vmem:[%s7192_s30 + $0xe0] sm:$0xff] %v5005_v24  ;;  %v7341_v28 = vpack.c.bf16 %v3039_v18, %v3038_v30  ;;  %v2558_v63 = vpop.f32.mrf.mxu3  ;;  %v2592_v53 = vmax.f32 %v7291_v39, 0.0 }
 0x333   : > { %3763 = vst [vmem:[%s7192_s30 + $0xe8] sm:$0xff] %v5007_v5  ;;  %5012 = vpow2.f32 %v3652_v14  ;;  %v5009_v26 = vpop.eup %5008  ;;  %v7346_v7 = vadd.f32 %v7133_v57, %v2558_v63 }
 0x334   : > { %5014 = vpow2.f32 %v3654_v25  ;;  %v2969_v31 = vadd.f32 1.0, %v5009_v26  ;;  %v2972_v21 = vmul.f32 -0.5, %v5009_v26  ;;  %3332 = vmatmul.bf16.gmra.mxu0 %v7341_v28  ;;  %3421 = vmatmul.bf16.gmra.mxu1 %v7341_v28  ;;  %v5011_v9 = vpop.eup %5010  ;;  %v2975_v6 = vand.u32 2147483647, %v5009_v26 }
 0x335   : > { %v3471_v43 = vpop.f32.mrf.mxu2  ;;  %5016 = vpow2.f32 %v2718_v19  ;;  %3510 = vmatmul.bf16.gmra.mxu2 %v7341_v28  ;;  %v2627_v42 = vand.u32 2147483647, %v7346_v7  ;;  %v2962_v32 = vmul.f32 0.6931472, %v5011_v9 }
 0x336   : > { %v3472_v23 = vadd.f32 %v3471_v43, %v7181_v11  ;;  %v3295_v10 = vpop.f32.mrf.mxu0  ;;  %v3384_v62 = vpop.f32.mrf.mxu1  ;;  %5018 = vlog2.f32 %v2969_v31  ;;  %v2973_v60 = vadd.f32 1.0, %v2972_v21  ;;  %vm2976_vm5 = vcmp.lt.f32.partialorder %v2975_v6, 0.0004427343 }
 0x337   : > { %v3296_v36 = vadd.f32 %v3295_v10, %v7161_v59  ;;  %v3385_v1 = vadd.f32 %v3384_v62, %v7164_v13  ;;  %v2659_v12 = vsub.f32 0.0, %v2627_v42  ;;  %3574 = vmatmul.bf16.gmra.mxu3 %v7142_v15  ;;  %v2968_v54 = vsel %vm7361_vm12, %v2965_v51, %v2962_v32 }
 0x338   : > { %3828 = vst [vmem:[%s7192_s30 + $0x110] sm:$0xff] %v3472_v23  ;;  %v2974_v47 = vmul.f32 %v5009_v26, %v2973_v60  ;;  %v3040_v14 = vadd.f32 %v2968_v54, %v2592_v53  ;;  %v7398_v6 = vperm.slane %v7154_v48, 3 }
 0x339   : > { %v5013_v17 = vpop.eup %5012  ;;  %v3656_v8 = vmul.f32 1.442695, %v3296_v36  ;;  %v3658_v50 = vmul.f32 1.442695, %v3385_v1  ;;  %v2720_v34 = vmul.f32 1.442695, %v2659_v12 }
 0x33a   : > { %v5015_v55 = vpop.eup %5014  ;;  %3764 = vst [vmem:[%s7192_s30 + $0x100] sm:$0xff] %v5013_v17  ;;  %v2561_v16 = vpop.f32.mrf.mxu3 }
 0x33b   : > { %3765 = vst [vmem:[%s7192_s30 + $0x108] sm:$0xff] %v5015_v55  ;;  %5020 = vpow2.f32 %v3656_v8  ;;  %v7359_v33 = vpop.eup %5016  ;;  %v7369_v52 = vadd.f32 %v7133_v57, %v2561_v16 }
 0x33c   : > { %5022 = vpow2.f32 %v3658_v50  ;;  %v5019_v56 = vpop.eup %5018  ;;  %v2978_v15 = vadd.f32 1.0, %v7359_v33  ;;  %v2981_v49 = vmul.f32 -0.5, %v7359_v33  ;;  %v2984_v1 = vand.u32 2147483647, %v7359_v33 }
 0x33d   : > { %v3473_v46 = vpop.f32.mrf.mxu2  ;;  %v2971_v3 = vmul.f32 0.6931472, %v5019_v56  ;;  %5024 = vpow2.f32 %v2720_v34  ;;  %v2628_v24 = vand.u32 2147483647, %v7369_v52 }
 0x33e   : > { %v3474_v44 = vadd.f32 %v3473_v46, %v7181_v11  ;;  %v3298_v2 = vpop.f32.mrf.mxu0  ;;  %v3387_v22 = vpop.f32.mrf.mxu1  ;;  %5026 = vlog2.f32 %v2978_v15  ;;  %v2982_v38 = vadd.f32 1.0, %v2981_v49  ;;  %vm7404_vm13 = vcmp.lt.f32.partialorder %v2984_v1, 0.0004427343 }
 0x33f   : > { %v3299_v37 = vadd.f32 %v3298_v2, %v7161_v59  ;;  %v2977_v29 = vsel %vm2976_vm5, %v2974_v47, %v2971_v3  ;;  %v3388_v30 = vadd.f32 %v3387_v22, %v7164_v13  ;;  %v2660_v39 = vsub.f32 0.0, %v2628_v24 }
 0x340   : > { %3830 = vst [vmem:[%s7192_s30 + $0x130] sm:$0xff] %v3474_v44  ;;  %v3041_v5 = vadd.f32 %v2977_v29, %v2593_v58  ;;  %v2983_v40 = vmul.f32 %v7359_v33, %v2982_v38  ;;  %v2594_v58 = vmax.f32 %v7329_v4, 0.0 }
 0x341   : > { %v5021_v18 = vpop.eup %5020  ;;  %v3660_v41 = vmul.f32 1.442695, %v3299_v37  ;;  %v3662_v27 = vmul.f32 1.442695, %v3388_v30  ;;  %v2722_v31 = vmul.f32 1.442695, %v2660_v39 }
 0x342   : > { %v5023_v25 = vpop.eup %5022  ;;  %3766 = vst [vmem:[%s7192_s30 + $0x120] sm:$0xff] %v5021_v18  ;;  %v7381_v26 = vpack.c.bf16 %v3041_v5, %v3040_v14  ;;  %v2563_v43 = vpop.f32.mrf.mxu3  ;;  %v2595_v37 = vmax.f32 %v7346_v7, 0.0 }
 0x343   : > { %3767 = vst [vmem:[%s7192_s30 + $0x128] sm:$0xff] %v5023_v25  ;;  %5028 = vpow2.f32 %v3660_v41  ;;  %v5025_v19 = vpop.eup %5024  ;;  %v7386_v10 = vadd.f32 %v7133_v57, %v2563_v43 }
 0x344   : > { %5030 = vpow2.f32 %v3662_v27  ;;  %v2987_v21 = vadd.f32 1.0, %v5025_v19  ;;  %v2990_v63 = vmul.f32 -0.5, %v5025_v19  ;;  %3337 = vmatmul.bf16.gmra.mxu0 %v7381_v26  ;;  %3426 = vmatmul.bf16.gmra.mxu1 %v7381_v26  ;;  %v5027_v23 = vpop.eup %5026  ;;  %v2993_v34 = vand.u32 2147483647, %v5025_v19 }
 0x345   : > { %v3476_v9 = vpop.f32.mrf.mxu2  ;;  %5032 = vpow2.f32 %v2722_v31  ;;  %3515 = vmatmul.bf16.gmra.mxu2 %v7381_v26  ;;  %v2629_v17 = vand.u32 2147483647, %v7386_v10  ;;  %v2980_v60 = vmul.f32 0.6931472, %v5027_v23 }
 0x346   : > { %v3477_v62 = vadd.f32 %v3476_v9, %v7181_v11  ;;  %v3300_v0 = vpop.f32.mrf.mxu0  ;;  %v3389_v36 = vpop.f32.mrf.mxu1  ;;  %5034 = vlog2.f32 %v2987_v21  ;;  %v2991_v8 = vadd.f32 1.0, %v2990_v63  ;;  %vm2994_vm14 = vcmp.lt.f32.partialorder %v2993_v34, 0.0004427343 }
 0x347   : > { %v3301_v42 = vadd.f32 %v3300_v0, %v7161_v59  ;;  %v3390_v57 = vadd.f32 %v3389_v36, %v7164_v13  ;;  %v2661_v50 = vsub.f32 0.0, %v2629_v17  ;;  %3579 = vmatmul.bf16.gmra.mxu3 %v7174_v45  ;;  %v2986_v45 = vsel %vm7404_vm13, %v2983_v40, %v2980_v60 }
 0x348   : > { %3832 = vst [vmem:[%s7192_s30 + $0x150] sm:$0xff] %v3477_v62  ;;  %v2992_v16 = vmul.f32 %v5025_v19, %v2991_v8  ;;  %v3042_v14 = vadd.f32 %v2986_v45, %v2594_v58  ;;  %v2596_v40 = vmax.f32 %v7369_v52, 0.0 }
 0x349   : > { %v5029_v32 = vpop.eup %5028  ;;  %v3664_v55 = vmul.f32 1.442695, %v3301_v42  ;;  %v3666_v51 = vmul.f32 1.442695, %v3390_v57  ;;  %v2724_v47 = vmul.f32 1.442695, %v2661_v50 }
 0x34a   : > { %v5031_v12 = vpop.eup %5030  ;;  %3768 = vst [vmem:[%s7192_s30 + $0x140] sm:$0xff] %v5029_v32  ;;  %v3540_v33 = vpop.f32.mrf.mxu3 }
 0x34b   : > { %3769 = vst [vmem:[%s7192_s30 + $0x148] sm:$0xff] %v5031_v12  ;;  %5036 = vpow2.f32 %v3664_v55  ;;  %v7402_v56 = vpop.eup %5032  ;;  %v3541_v44 = vadd.f32 %v3540_v33, %v7398_v6  ;;  %v2597_v33 = vmax.f32 %v7386_v10, 0.0 }
 0x34c   : > { %5038 = vpow2.f32 %v3666_v51  ;;  %v5035_v15 = vpop.eup %5034  ;;  %v2996_v48 = vadd.f32 1.0, %v7402_v56  ;;  %v2999_v4 = vmul.f32 -0.5, %v7402_v56  ;;  %v3002_v38 = vand.u32 2147483647, %v7402_v56 }
 0x34d   : > { %v3478_v46 = vpop.f32.mrf.mxu2  ;;  %v2989_v3 = vmul.f32 0.6931472, %v5035_v15  ;;  %5040 = vpow2.f32 %v2724_v47  ;;  %3813 = vst [vmem:[%s7192_s30 + $0x18] sm:$0xff] %v3541_v44 }
 0x34e   : > { %v3479_v2 = vadd.f32 %v3478_v46, %v7181_v11  ;;  %v3303_v22 = vpop.f32.mrf.mxu0  ;;  %v3392_v53 = vpop.f32.mrf.mxu1  ;;  %5042 = vlog2.f32 %v2996_v48  ;;  %v3000_v0 = vadd.f32 1.0, %v2999_v4  ;;  %vm7438_vm15 = vcmp.lt.f32.partialorder %v3002_v38, 0.0004427343 }
 0x34f   : > { %v3304_v29 = vadd.f32 %v3303_v22, %v7161_v59  ;;  %v2995_v24 = vsel %vm2994_vm14, %v2992_v16, %v2989_v3  ;;  %v3393_v30 = vadd.f32 %v3392_v53, %v7164_v13 }
 0x350   : > { %v3043_v5 = vadd.f32 %v2995_v24, %v2595_v37  ;;  %3834 = vst [vmem:[%s7192_s30 + $0x170] sm:$0xff] %v3479_v2  ;;  %v3001_v55 = vmul.f32 %v7402_v56, %v3000_v0 }
 0x351   : > { %v5037_v18 = vpop.eup %5036  ;;  %v3668_v41 = vmul.f32 1.442695, %v3304_v29  ;;  %v3670_v39 = vmul.f32 1.442695, %v3393_v30 }
 0x352   : > { %v5039_v25 = vpop.eup %5038  ;;  %3770 = vst [vmem:[%s7192_s30 + $0x160] sm:$0xff] %v5037_v18  ;;  %v7422_v7 = vpack.c.bf16 %v3043_v5, %v3042_v14  ;;  %v3542_v19 = vpop.f32.mrf.mxu3 }
 0x353   : > { %3771 = vst [vmem:[%s7192_s30 + $0x168] sm:$0xff] %v5039_v25  ;;  %5044 = vpow2.f32 %v3668_v41  ;;  %v5041_v27 = vpop.eup %5040  ;;  %v3543_v43 = vadd.f32 %v3542_v19, %v7398_v6 }
 0x354   : > { %5046 = vpow2.f32 %v3670_v39  ;;  %v3005_v49 = vadd.f32 1.0, %v5041_v27  ;;  %3342 = vmatmul.bf16.gmra.mxu0 %v7422_v7  ;;  %3431 = vmatmul.bf16.gmra.mxu1 %v7422_v7  ;;  %v5043_v21 = vpop.eup %5042  ;;  %v3008_v63 = vmul.f32 -0.5, %v5041_v27  ;;  %v3011_v12 = vand.u32 2147483647, %v5041_v27 }
 0x355   : > { %v3481_v31 = vpop.f32.mrf.mxu2  ;;  %3520 = vmatmul.bf16.gmra.mxu2 %v7422_v7  ;;  %3815 = vst [vmem:[%s7192_s30 + $0x38] sm:$0xff] %v3543_v43  ;;  %v2998_v17 = vmul.f32 0.6931472, %v5043_v21 }
 0x356   : > { %v3482_v9 = vadd.f32 %v3481_v31, %v7181_v11  ;;  %v3305_v23 = vpop.f32.mrf.mxu0  ;;  %v3394_v62 = vpop.f32.mrf.mxu1  ;;  %5048 = vlog2.f32 %v3005_v49  ;;  %v3009_v60 = vadd.f32 1.0, %v3008_v63  ;;  %vm3012_vm0 = vcmp.lt.f32.partialorder %v3011_v12, 0.0004427343 }
 0x357   : > { %v3306_v36 = vadd.f32 %v3305_v23, %v7161_v59  ;;  %v3395_v42 = vadd.f32 %v3394_v62, %v7164_v13  ;;  %3584 = vmatmul.bf16.gmra.mxu3 %v7219_v35  ;;  %v3004_v34 = vsel %vm7438_vm15, %v3001_v55, %v2998_v17 }
 0x358   : > { %3836 = vst [vmem:[%s7192_s30 + $0x190] sm:$0xff] %v3482_v9  ;;  %v3010_v56 = vmul.f32 %v5041_v27, %v3009_v60  ;;  %v3044_v2 = vadd.f32 %v3004_v34, %v2596_v40 }
 0x359   : > { %v5045_v1 = vpop.eup %5044  ;;  %v3672_v57 = vmul.f32 1.442695, %v3306_v36  ;;  %v3674_v8 = vmul.f32 1.442695, %v3395_v42 }
 0x35a   : > { %v5047_v32 = vpop.eup %5046  ;;  %3772 = vst [vmem:[%s7192_s30 + $0x180] sm:$0xff] %v5045_v1  ;;  %v3545_v54 = vpop.f32.mrf.mxu3 }
 0x35b   : > { %3773 = vst [vmem:[%s7192_s30 + $0x188] sm:$0xff] %v5047_v32  ;;  %5050 = vpow2.f32 %v3672_v57  ;;  %v3546_v15 = vadd.f32 %v3545_v54, %v7398_v6 }
 0x35c   : > { %5052 = vpow2.f32 %v3674_v8  ;;  %v5049_v51 = vpop.eup %5048 }
 0x35d   : > { %v3483_v47 = vpop.f32.mrf.mxu2  ;;  %v3007_v35 = vmul.f32 0.6931472, %v5049_v51  ;;  %3817 = vst [vmem:[%s7192_s30 + $0x58] sm:$0xff] %v3546_v15 }
 0x35e   : > { %v3484_v45 = vadd.f32 %v3483_v47, %v7181_v11  ;;  %v3308_v16 = vpop.f32.mrf.mxu0  ;;  %v3397_v48 = vpop.f32.mrf.mxu1 }
 0x35f   : > { %v3309_v52 = vadd.f32 %v3308_v16, %v7161_v59  ;;  %v3398_v46 = vadd.f32 %v3397_v48, %v7164_v13  ;;  %v3013_v3 = vsel %vm3012_vm0, %v3010_v56, %v3007_v35 }
 0x360   : > { %v3045_v22 = vadd.f32 %v3013_v3, %v2597_v33  ;;  %3838 = vst [vmem:[%s7192_s30 + $0x1b0] sm:$0xff] %v3484_v45 }
 0x361   : > { %v5051_v44 = vpop.eup %5050  ;;  %v3676_v53 = vmul.f32 1.442695, %v3309_v52  ;;  %v3678_v58 = vmul.f32 1.442695, %v3398_v46 }
 0x362   : > { %v5053_v37 = vpop.eup %5052  ;;  %3774 = vst [vmem:[%s7192_s30 + $0x1a0] sm:$0xff] %v5051_v44  ;;  %v7454_v10 = vpack.c.bf16 %v3045_v22, %v3044_v2  ;;  %v3547_v29 = vpop.f32.mrf.mxu3 }
 0x363   : > { %3775 = vst [vmem:[%s7192_s30 + $0x1a8] sm:$0xff] %v5053_v37  ;;  %5054 = vpow2.f32 %v3676_v53  ;;  %v3548_v30 = vadd.f32 %v3547_v29, %v7398_v6 }
 0x364   : > { %5056 = vpow2.f32 %v3678_v58  ;;  %3347 = vmatmul.bf16.gmra.mxu0 %v7454_v10  ;;  %3436 = vmatmul.bf16.gmra.mxu1 %v7454_v10 }
 0x365   : > { %v3486_v24 = vpop.f32.mrf.mxu2  ;;  %3525 = vmatmul.bf16.gmra.mxu2 %v7454_v10  ;;  %3819 = vst [vmem:[%s7192_s30 + $0x78] sm:$0xff] %v3548_v30 }
 0x366   : > { %v3487_v18 = vadd.f32 %v3486_v24, %v7181_v11  ;;  %v3310_v14 = vpop.f32.mrf.mxu0  ;;  %v3399_v5 = vpop.f32.mrf.mxu1 }
 0x367   : > { %v3311_v41 = vadd.f32 %v3310_v14, %v7161_v59  ;;  %v3400_v25 = vadd.f32 %v3399_v5, %v7164_v13  ;;  %3589 = vmatmul.bf16.gmra.mxu3 %v7257_v20 }
 0x368   : > { %3840 = vst [vmem:[%s7192_s30 + $0x1d0] sm:$0xff] %v3487_v18 }
 0x369   : > { %v5055_v39 = vpop.eup %5054  ;;  %v3680_v4 = vmul.f32 1.442695, %v3311_v41  ;;  %v3682_v27 = vmul.f32 1.442695, %v3400_v25 }
 0x36a   : > { %v5057_v49 = vpop.eup %5056  ;;  %3776 = vst [vmem:[%s7192_s30 + $0x1c0] sm:$0xff] %v5055_v39  ;;  %v3550_v19 = vpop.f32.mrf.mxu3 }
 0x36b   : > { %3777 = vst [vmem:[%s7192_s30 + $0x1c8] sm:$0xff] %v5057_v49  ;;  %5058 = vpow2.f32 %v3680_v4  ;;  %v3551_v21 = vadd.f32 %v3550_v19, %v7398_v6 }
 0x36c   : > { %5060 = vpow2.f32 %v3682_v27 }
 0x36d   : > { %v3488_v31 = vpop.f32.mrf.mxu2  ;;  %3821 = vst [vmem:[%s7192_s30 + $0x98] sm:$0xff] %v3551_v21 }
 0x36e   : > { %v3489_v63 = vadd.f32 %v3488_v31, %v7181_v11  ;;  %v3313_v43 = vpop.f32.mrf.mxu0  ;;  %v3402_v9 = vpop.f32.mrf.mxu1 }
 0x36f   : > { %v3314_v23 = vadd.f32 %v3313_v43, %v7161_v59  ;;  %v3403_v62 = vadd.f32 %v3402_v9, %v7164_v13 }
 0x370   : > { %3842 = vst [vmem:[%s7192_s30 + $0x1f0] sm:$0xff] %v3489_v63 }
 0x371   : > { %v5059_v0 = vpop.eup %5058  ;;  %v3684_v20 = vmul.f32 1.442695, %v3314_v23  ;;  %v3686_v36 = vmul.f32 1.442695, %v3403_v62 }
 0x372   : > { %v5061_v38 = vpop.eup %5060  ;;  %3778 = vst [vmem:[%s7192_s30 + $0x1e0] sm:$0xff] %v5059_v0  ;;  %v3552_v42 = vpop.f32.mrf.mxu3 }
 0x373   : > { %3779 = vst [vmem:[%s7192_s30 + $0x1e8] sm:$0xff] %v5061_v38  ;;  %5062 = vpow2.f32 %v3684_v20  ;;  %v3553_v17 = vadd.f32 %v3552_v42, %v7398_v6 }
 0x374   : > { %5064 = vpow2.f32 %v3686_v36 }
 0x375   : > { %v3491_v1 = vpop.f32.mrf.mxu2  ;;  %3823 = vst [vmem:[%s7192_s30 + $0xb8] sm:$0xff] %v3553_v17 }
 0x376   : > { %v3492_v57 = vadd.f32 %v3491_v1, %v7181_v11  ;;  %v3315_v32 = vpop.f32.mrf.mxu0  ;;  %v3404_v60 = vpop.f32.mrf.mxu1 }
 0x377   : > { %v3316_v8 = vadd.f32 %v3315_v32, %v7161_v59  ;;  %v3405_v55 = vadd.f32 %v3404_v60, %v7164_v13  ;;  %3594 = vmatmul.bf16.gmra.mxu3 %v7298_v61 }
 0x378   : > { %3844 = vst [vmem:[%s7192_s30 + $0x210] sm:$0xff] %v3492_v57 }
 0x379   : > { %v5063_v12 = vpop.eup %5062  ;;  %v3688_v50 = vmul.f32 1.442695, %v3316_v8  ;;  %v3690_v51 = vmul.f32 1.442695, %v3405_v55 }
 0x37a   : > { %v5065_v40 = vpop.eup %5064  ;;  %3780 = vst [vmem:[%s7192_s30 + $0x200] sm:$0xff] %v5063_v12  ;;  %v3555_v34 = vpop.f32.mrf.mxu3 }
 0x37b   : > { %3781 = vst [vmem:[%s7192_s30 + $0x208] sm:$0xff] %v5065_v40  ;;  %5066 = vpow2.f32 %v3688_v50  ;;  %v3556_v47 = vadd.f32 %v3555_v34, %v7398_v6 }
 0x37c   : > { %5068 = vpow2.f32 %v3690_v51 }
 0x37d   : > { %v3493_v54 = vpop.f32.mrf.mxu2  ;;  %3825 = vst [vmem:[%s7192_s30 + $0xd8] sm:$0xff] %v3556_v47 }
 0x37e   : > { %v3494_v35 = vadd.f32 %v3493_v54, %v7181_v11 }
 0x37f   : > { %v3318_v56 = vpop.f32.mrf.mxu0  ;;  %v3407_v15 = vpop.f32.mrf.mxu1 }
 0x380   : > { %v3319_v45 = vadd.f32 %v3318_v56, %v7161_v59  ;;  %v3408_v16 = vadd.f32 %v3407_v15, %v7164_v13  ;;  %3846 = vst [vmem:[%s7192_s30 + $0x230] sm:$0xff] %v3494_v35 }
 0x381   : > { %v5067_v48 = vpop.eup %5066 }
 0x382   : > { %v3692_v61 = vmul.f32 1.442695, %v3319_v45  ;;  %v3694_v33 = vmul.f32 1.442695, %v3408_v16  ;;  %v5069_v52 = vpop.eup %5068  ;;  %3782 = vst [vmem:[%s7192_s30 + $0x220] sm:$0xff] %v5067_v48  ;;  %v3557_v46 = vpop.f32.mrf.mxu3 }
 0x383   : > { %3783 = vst [vmem:[%s7192_s30 + $0x228] sm:$0xff] %v5069_v52  ;;  %v3558_v44 = vadd.f32 %v3557_v46, %v7398_v6 }
 0x384   : > { %5070 = vpow2.f32 %v3692_v61 }
 0x385   : > { %5072 = vpow2.f32 %v3694_v33  ;;  %3827 = vst [vmem:[%s7192_s30 + $0xf8] sm:$0xff] %v3558_v44 }
 0x386   : > { %v3496_v3 = vpop.f32.mrf.mxu2 }
 0x387   : > { %v3497_v2 = vadd.f32 %v3496_v3, %v7181_v11  ;;  %v3320_v22 = vpop.f32.mrf.mxu0  ;;  %v3409_v53 = vpop.f32.mrf.mxu1  ;;  %3599 = vmatmul.bf16.gmra.mxu3 %v7341_v28 }
 0x388   : > { %v3321_v58 = vadd.f32 %v3320_v22, %v7161_v59  ;;  %v3410_v37 = vadd.f32 %v3409_v53, %v7164_v13 }
 0x389   : > { %3848 = vst [vmem:[%s7192_s30 + $0x250] sm:$0xff] %v3497_v2 }
 0x38a   : > { %v5071_v29 = vpop.eup %5070  ;;  %v3696_v24 = vmul.f32 1.442695, %v3321_v58  ;;  %v3698_v30 = vmul.f32 1.442695, %v3410_v37  ;;  %v3560_v14 = vpop.f32.mrf.mxu3 }
 0x38b   : > { %v5073_v18 = vpop.eup %5072  ;;  %3784 = vst [vmem:[%s7192_s30 + $0x240] sm:$0xff] %v5071_v29  ;;  %v3561_v41 = vadd.f32 %v3560_v14, %v7398_v6 }
 0x38c   : > { %3785 = vst [vmem:[%s7192_s30 + $0x248] sm:$0xff] %v5073_v18  ;;  %5074 = vpow2.f32 %v3696_v24 }
 0x38d   : > { %5076 = vpow2.f32 %v3698_v30  ;;  %3829 = vst [vmem:[%s7192_s30 + $0x118] sm:$0xff] %v3561_v41 }
 0x38e   : > { %v3498_v5 = vpop.f32.mrf.mxu2 }
 0x38f   : > { %v3499_v25 = vadd.f32 %v3498_v5, %v7181_v11  ;;  %v3323_v39 = vpop.f32.mrf.mxu0  ;;  %v3412_v4 = vpop.f32.mrf.mxu1 }
 0x390   : > { %v3324_v27 = vadd.f32 %v3323_v39, %v7161_v59  ;;  %v3413_v49 = vadd.f32 %v3412_v4, %v7164_v13 }
 0x391   : > { %3850 = vst [vmem:[%s7192_s30 + $0x270] sm:$0xff] %v3499_v25 }
 0x392   : > { %v5075_v19 = vpop.eup %5074  ;;  %v3700_v28 = vmul.f32 1.442695, %v3324_v27  ;;  %v3702_v31 = vmul.f32 1.442695, %v3413_v49  ;;  %v3562_v63 = vpop.f32.mrf.mxu3 }
 0x393   : > { %v5077_v21 = vpop.eup %5076  ;;  %3786 = vst [vmem:[%s7192_s30 + $0x260] sm:$0xff] %v5075_v19  ;;  %v3563_v9 = vadd.f32 %v3562_v63, %v7398_v6 }
 0x394   : > { %3787 = vst [vmem:[%s7192_s30 + $0x268] sm:$0xff] %v5077_v21  ;;  %5078 = vpow2.f32 %v3700_v28 }
 0x395   : > { %5080 = vpow2.f32 %v3702_v31  ;;  %3831 = vst [vmem:[%s7192_s30 + $0x138] sm:$0xff] %v3563_v9 }
 0x396   : > { %v3501_v43 = vpop.f32.mrf.mxu2 }
 0x397   : > { %v3502_v23 = vadd.f32 %v3501_v43, %v7181_v11  ;;  %v3325_v62 = vpop.f32.mrf.mxu0  ;;  %v3414_v0 = vpop.f32.mrf.mxu1  ;;  %3604 = vmatmul.bf16.gmra.mxu3 %v7381_v26 }
 0x398   : > { %v3326_v20 = vadd.f32 %v3325_v62, %v7161_v59  ;;  %v3415_v36 = vadd.f32 %v3414_v0, %v7164_v13 }
 0x399   : > { %3852 = vst [vmem:[%s7192_s30 + $0x290] sm:$0xff] %v3502_v23 }
 0x39a   : > { %v5079_v38 = vpop.eup %5078  ;;  %v3704_v42 = vmul.f32 1.442695, %v3326_v20  ;;  %v3706_v1 = vmul.f32 1.442695, %v3415_v36  ;;  %v3565_v57 = vpop.f32.mrf.mxu3 }
 0x39b   : > { %v5081_v17 = vpop.eup %5080  ;;  %3788 = vst [vmem:[%s7192_s30 + $0x280] sm:$0xff] %v5079_v38  ;;  %v3566_v60 = vadd.f32 %v3565_v57, %v7398_v6 }
 0x39c   : > { %3789 = vst [vmem:[%s7192_s30 + $0x288] sm:$0xff] %v5081_v17  ;;  %5082 = vpow2.f32 %v3704_v42 }
 0x39d   : > { %5084 = vpow2.f32 %v3706_v1  ;;  %3833 = vst [vmem:[%s7192_s30 + $0x158] sm:$0xff] %v3566_v60 }
 0x39e   : > { %v3503_v32 = vpop.f32.mrf.mxu2 }
 0x39f   : > { %v3504_v8 = vadd.f32 %v3503_v32, %v7181_v11 }
 0x3a0   : > { %v3328_v55 = vpop.f32.mrf.mxu0  ;;  %v3417_v12 = vpop.f32.mrf.mxu1 }
 0x3a1   : > { %3854 = vst [vmem:[%s7192_s30 + $0x2b0] sm:$0xff] %v3504_v8  ;;  %v3329_v51 = vadd.f32 %v3328_v55, %v7161_v59  ;;  %v3418_v26 = vadd.f32 %v3417_v12, %v7164_v13 }
 0x3a2   : > { %v5083_v50 = vpop.eup %5082  ;;  %v3567_v47 = vpop.f32.mrf.mxu3 }
 0x3a3   : > { %v5085_v40 = vpop.eup %5084  ;;  %3790 = vst [vmem:[%s7192_s30 + $0x2a0] sm:$0xff] %v5083_v50  ;;  %v3708_v34 = vmul.f32 1.442695, %v3329_v51  ;;  %v3710_v54 = vmul.f32 1.442695, %v3418_v26  ;;  %v3568_v35 = vadd.f32 %v3567_v47, %v7398_v6 }
 0x3a4   : > { %3791 = vst [vmem:[%s7192_s30 + $0x2a8] sm:$0xff] %v5085_v40 }
 0x3a5   : > { %5086 = vpow2.f32 %v3708_v34  ;;  %3835 = vst [vmem:[%s7192_s30 + $0x178] sm:$0xff] %v3568_v35 }
 0x3a6   : > { %5088 = vpow2.f32 %v3710_v54 }
 0x3a7   : > { %v3506_v56 = vpop.f32.mrf.mxu2  ;;  %3609 = vmatmul.bf16.gmra.mxu3 %v7422_v7 }
 0x3a8   : > { %v3507_v15 = vadd.f32 %v3506_v56, %v7181_v11  ;;  %v3330_v45 = vpop.f32.mrf.mxu0  ;;  %v3419_v16 = vpop.f32.mrf.mxu1 }
 0x3a9   : > { %v3331_v48 = vadd.f32 %v3330_v45, %v7161_v59  ;;  %v3420_v61 = vadd.f32 %v3419_v16, %v7164_v13 }
 0x3aa   : > { %3856 = vst [vmem:[%s7192_s30 + $0x2d0] sm:$0xff] %v3507_v15  ;;  %v3570_v44 = vpop.f32.mrf.mxu3 }
 0x3ab   : > { %v5087_v33 = vpop.eup %5086  ;;  %v3712_v52 = vmul.f32 1.442695, %v3331_v48  ;;  %v3714_v46 = vmul.f32 1.442695, %v3420_v61  ;;  %v3571_v2 = vadd.f32 %v3570_v44, %v7398_v6 }
 0x3ac   : > { %v5089_v3 = vpop.eup %5088  ;;  %3792 = vst [vmem:[%s7192_s30 + $0x2c0] sm:$0xff] %v5087_v33 }
 0x3ad   : > { %3793 = vst [vmem:[%s7192_s30 + $0x2c8] sm:$0xff] %v5089_v3  ;;  %5090 = vpow2.f32 %v3712_v52 }
 0x3ae   : > { %5092 = vpow2.f32 %v3714_v46  ;;  %3837 = vst [vmem:[%s7192_s30 + $0x198] sm:$0xff] %v3571_v2 }
 0x3af   : > { %v3508_v22 = vpop.f32.mrf.mxu2 }
 0x3b0   : > { %v3509_v53 = vadd.f32 %v3508_v22, %v7181_v11 }
 0x3b1   : > { %v3333_v7 = vpop.f32.mrf.mxu0  ;;  %v3422_v58 = vpop.f32.mrf.mxu1 }
 0x3b2   : > { %3858 = vst [vmem:[%s7192_s30 + $0x2f0] sm:$0xff] %v3509_v53  ;;  %v3334_v29 = vadd.f32 %v3333_v7, %v7161_v59  ;;  %v3423_v24 = vadd.f32 %v3422_v58, %v7164_v13  ;;  %v3572_v5 = vpop.f32.mrf.mxu3 }
 0x3b3   : > { %v5091_v37 = vpop.eup %5090  ;;  %v3573_v41 = vadd.f32 %v3572_v5, %v7398_v6 }
 0x3b4   : > { %v5093_v30 = vpop.eup %5092  ;;  %3794 = vst [vmem:[%s7192_s30 + $0x2e0] sm:$0xff] %v5091_v37  ;;  %v3716_v18 = vmul.f32 1.442695, %v3334_v29  ;;  %v3718_v14 = vmul.f32 1.442695, %v3423_v24 }
 0x3b5   : > { %3795 = vst [vmem:[%s7192_s30 + $0x2e8] sm:$0xff] %v5093_v30 }
 0x3b6   : > { %5094 = vpow2.f32 %v3716_v18  ;;  %3839 = vst [vmem:[%s7192_s30 + $0x1b8] sm:$0xff] %v3573_v41 }
 0x3b7   : > { %5096 = vpow2.f32 %v3718_v14  ;;  %3614 = vmatmul.bf16.gmra.mxu3 %v7454_v10 }
 0x3b8   : > { %v3511_v25 = vpop.f32.mrf.mxu2 }
 0x3b9   : > { %v3512_v39 = vadd.f32 %v3511_v25, %v7181_v11  ;;  %v3335_v4 = vpop.f32.mrf.mxu0  ;;  %v3424_v27 = vpop.f32.mrf.mxu1 }
 0x3ba   : > { %v3336_v49 = vadd.f32 %v3335_v4, %v7161_v59  ;;  %v3425_v19 = vadd.f32 %v3424_v27, %v7164_v13  ;;  %v3575_v63 = vpop.f32.mrf.mxu3 }
 0x3bb   : > { %3860 = vst [vmem:[%s7192_s30 + $0x310] sm:$0xff] %v3512_v39  ;;  %v3576_v9 = vadd.f32 %v3575_v63, %v7398_v6 }
 0x3bc   : > { %v5095_v28 = vpop.eup %5094  ;;  %v3720_v31 = vmul.f32 1.442695, %v3336_v49  ;;  %v3722_v21 = vmul.f32 1.442695, %v3425_v19 }
 0x3bd   : > { %v5097_v43 = vpop.eup %5096  ;;  %3796 = vst [vmem:[%s7192_s30 + $0x300] sm:$0xff] %v5095_v28 }
 0x3be   : > { %3797 = vst [vmem:[%s7192_s30 + $0x308] sm:$0xff] %v5097_v43  ;;  %5098 = vpow2.f32 %v3720_v31 }
 0x3bf   : > { %5100 = vpow2.f32 %v3722_v21  ;;  %3841 = vst [vmem:[%s7192_s30 + $0x1d8] sm:$0xff] %v3576_v9 }
 0x3c0   : > { %v3513_v10 = vpop.f32.mrf.mxu2 }
 0x3c1   : > { %v3514_v23 = vadd.f32 %v3513_v10, %v7181_v11  ;;  %v3338_v62 = vpop.f32.mrf.mxu0  ;;  %v3427_v0 = vpop.f32.mrf.mxu1 }
 0x3c2   : > { %v3339_v20 = vadd.f32 %v3338_v62, %v7161_v59  ;;  %v3428_v36 = vadd.f32 %v3427_v0, %v7164_v13  ;;  %v3577_v17 = vpop.f32.mrf.mxu3 }
 0x3c3   : > { %3862 = vst [vmem:[%s7192_s30 + $0x330] sm:$0xff] %v3514_v23  ;;  %v3578_v32 = vadd.f32 %v3577_v17, %v7398_v6 }
 0x3c4   : > { %v5099_v38 = vpop.eup %5098  ;;  %v3724_v42 = vmul.f32 1.442695, %v3339_v20  ;;  %v3726_v1 = vmul.f32 1.442695, %v3428_v36 }
 0x3c5   : > { %v5101_v57 = vpop.eup %5100  ;;  %3798 = vst [vmem:[%s7192_s30 + $0x320] sm:$0xff] %v5099_v38 }
 0x3c6   : > { %3799 = vst [vmem:[%s7192_s30 + $0x328] sm:$0xff] %v5101_v57  ;;  %5102 = vpow2.f32 %v3724_v42 }
 0x3c7   : > { %5104 = vpow2.f32 %v3726_v1  ;;  %3843 = vst [vmem:[%s7192_s30 + $0x1f8] sm:$0xff] %v3578_v32 }
 0x3c8   : > { %v3516_v60 = vpop.f32.mrf.mxu2 }
 0x3c9   : > { %v3517_v8 = vadd.f32 %v3516_v60, %v7181_v11  ;;  %v3340_v55 = vpop.f32.mrf.mxu0  ;;  %v3429_v12 = vpop.f32.mrf.mxu1 }
 0x3ca   : > { %v3341_v50 = vadd.f32 %v3340_v55, %v7161_v59  ;;  %v3430_v51 = vadd.f32 %v3429_v12, %v7164_v13  ;;  %v3580_v54 = vpop.f32.mrf.mxu3 }
 0x3cb   : > { %3864 = vst [vmem:[%s7192_s30 + $0x350] sm:$0xff] %v3517_v8  ;;  %v3581_v35 = vadd.f32 %v3580_v54, %v7398_v6 }
 0x3cc   : > { %v5103_v26 = vpop.eup %5102  ;;  %v3728_v40 = vmul.f32 1.442695, %v3341_v50  ;;  %v3730_v34 = vmul.f32 1.442695, %v3430_v51 }
 0x3cd   : > { %v5105_v47 = vpop.eup %5104  ;;  %3800 = vst [vmem:[%s7192_s30 + $0x340] sm:$0xff] %v5103_v26 }
 0x3ce   : > { %3801 = vst [vmem:[%s7192_s30 + $0x348] sm:$0xff] %v5105_v47  ;;  %5106 = vpow2.f32 %v3728_v40 }
 0x3cf   : > { %5108 = vpow2.f32 %v3730_v34  ;;  %3845 = vst [vmem:[%s7192_s30 + $0x218] sm:$0xff] %v3581_v35 }
 0x3d0   : > { %v3518_v56 = vpop.f32.mrf.mxu2 }
 0x3d1   : > { %5337 = shalt.err (!%p5334_p9)
}
 0x3d2   : > { %s5436_s4 = smov 128   ;;  %s5437_s28 = smov 8   ;;  %v3519_v15 = vadd.f32 %v3518_v56, %v7181_v11  ;;  %v3343_v45 = vpop.f32.mrf.mxu0  ;;  %v3432_v16 = vpop.f32.mrf.mxu1 }
 0x3d3   : > { %4461 = dma.vmem_to_hbm [thread:$0]  (%p5590_p5), %s7572_s2, 4096, %s3915_s8, %s3882_s13, %s5436_s4, %s5436_s4, %s5437_s28   ;;  %v3344_v48 = vadd.f32 %v3343_v45, %v7161_v59  ;;  %v3433_v61 = vadd.f32 %v3432_v16, %v7164_v13  ;;  %v3582_v3 = vpop.f32.mrf.mxu3 }
 0x3d4   : > { %3866 = vst [vmem:[%s7192_s30 + $0x370] sm:$0xff] %v3519_v15  ;;  %v5107_v33 = vpop.eup %5106  ;;  %v3583_v2 = vadd.f32 %v3582_v3, %v7398_v6  ;;  %s4438_s25 = sshll.u32 %s5521_s21, 10  ;;  %s7880_s24 = sld [smem:[#allocation32_spill]] }
 0x3d5   : > { %v3732_v52 = vmul.f32 1.442695, %v3344_v48  ;;  %v3734_v46 = vmul.f32 1.442695, %v3433_v61  ;;  %v5109_v44 = vpop.eup %5108  ;;  %3802 = vst [vmem:[%s7192_s30 + $0x360] sm:$0xff] %v5107_v33  ;;  %s3895_s27 = sshll.u32 %s7192_s30, 4  ;;  %s3896_s27 = int_to_ptr.vmem [resolvable:$true] %s3895_s27 }
 0x3d6   : > { %3803 = vst [vmem:[%s7192_s30 + $0x368] sm:$0xff] %v5109_v44  ;;  %s3877_s8 = scalar_lea.sflag [#allocation4], %s5644_s26 }
 0x3d7   : > { %5110 = vpow2.f32 %v3732_v52  ;;  %3847 = vst [vmem:[%s7192_s30 + $0x238] sm:$0xff] %v3583_v2 }
 0x3d8   : > { %5112 = vpow2.f32 %v3734_v46  ;;  %v3521_v22 = vpop.f32.mrf.mxu2 }
 0x3d9   : > { %v3522_v53 = vadd.f32 %v3521_v22, %v7181_v11 }
 0x3da   : > { %v3345_v7 = vpop.f32.mrf.mxu0  ;;  %v3434_v58 = vpop.f32.mrf.mxu1  ;;  %s3894_s19 = scalar_lea.hbm %s7880_s24, %s4438_s25  ;;  %s5358_s29 = scalar_lea.hbm %s7880_s24, 2048 }
 0x3db   : > { %v3346_v37 = vadd.f32 %v3345_v7, %v7161_v59  ;;  %v3435_v29 = vadd.f32 %v3434_v58, %v7164_v13  ;;  %3868 = vst [vmem:[%s7192_s30 + $0x390] sm:$0xff] %v3522_v53  ;;  %v3585_v14 = vpop.f32.mrf.mxu3  ;;  %s3897_s2 = sshll.u32 %s3894_s19, 4  ;;  %s3898_s2 = int_to_ptr.hbm [resolvable:$true] %s3897_s2 }
 0x3dc   : > { %v3586_v41 = vadd.f32 %v3585_v14, %v7398_v6  ;;  %s5352_s13 = sshra.s32 %s3898_s2, 4  ;;  %s5353_s13 = int_to_ptr.hbm [resolvable:$true] %s5352_s13 }
 0x3dd   : > { %v5111_v24 = vpop.eup %5110  ;;  %v3736_v30 = vmul.f32 1.442695, %v3346_v37  ;;  %v3738_v18 = vmul.f32 1.442695, %v3435_v29  ;;  %s5354_s21 = scalar_lea.hbm %s5353_s13, 1024  ;;  %p5359_p3 = scmp.lt.s32.totalorder %s5353_s13, %s7880_s24 }
 0x3de   : > { %v5113_v5 = vpop.eup %5112  ;;  %3804 = vst [vmem:[%s7192_s30 + $0x380] sm:$0xff] %v5111_v24  ;;  %p5355_p12 = scmp.ne.s32.totalorder %s5353_s13, %s5354_s21  ;;  %p5360_p7 = scmp.lt.s32.totalorder %s5358_s29, %s5354_s21 }
 0x3df   : > { %3805 = vst [vmem:[%s7192_s30 + $0x388] sm:$0xff] %v5113_v5  ;;  %5114 = vpow2.f32 %v3736_v30 }
 0x3e0   : > { %5116 = vpow2.f32 %v3738_v18  ;;  %3849 = vst [vmem:[%s7192_s30 + $0x258] sm:$0xff] %v3586_v41  ;;  %v3523_v25 = vpop.f32.mrf.mxu2  ;;  %p5356_p13 = pnand %p5355_p12, %p5590_p5  ;;  %p5361_p1 = por %p5360_p7, %p5359_p3 }
 0x3e1   : > { %v3524_v39 = vadd.f32 %v3523_v25, %v7181_v11 }
 0x3e2   : > { %v3348_v4 = vpop.f32.mrf.mxu0  ;;  %v3437_v27 = vpop.f32.mrf.mxu1  ;;  %p5357_p0 = pneg %p5356_p13 }
 0x3e3   : > { %v3349_v49 = vadd.f32 %v3348_v4, %v7161_v59  ;;  %v3438_v19 = vadd.f32 %v3437_v27, %v7164_v13  ;;  %3870 = vst [vmem:[%s7192_s30 + $0x3b0] sm:$0xff] %v3524_v39  ;;  %v3587_v63 = vpop.f32.mrf.mxu3 }
 0x3e4   : > { %v3588_v9 = vadd.f32 %v3587_v63, %v7398_v6  ;;  %p5362_p4 = pnand %p5361_p1, %p5357_p0 }
 0x3e5   : > { %v5115_v28 = vpop.eup %5114  ;;  %v3740_v31 = vmul.f32 1.442695, %v3349_v49  ;;  %v3742_v21 = vmul.f32 1.442695, %v3438_v19 }
 0x3e6   : > { %v5117_v43 = vpop.eup %5116  ;;  %3806 = vst [vmem:[%s7192_s30 + $0x3a0] sm:$0xff] %v5115_v28 }
 0x3e7   : > { %3807 = vst [vmem:[%s7192_s30 + $0x3a8] sm:$0xff] %v5117_v43  ;;  %5118 = vpow2.f32 %v3740_v31 }
 0x3e8   : > { %5120 = vpow2.f32 %v3742_v21  ;;  %3851 = vst [vmem:[%s7192_s30 + $0x278] sm:$0xff] %v3588_v9  ;;  %v3526_v10 = vpop.f32.mrf.mxu2 }
 0x3e9   : > { %v3527_v23 = vadd.f32 %v3526_v10, %v7181_v11 }
 0x3ea   : > { %v3350_v62 = vpop.f32.mrf.mxu0  ;;  %v3439_v0 = vpop.f32.mrf.mxu1 }
 0x3eb   : > { %v3351_v20 = vadd.f32 %v3350_v62, %v7161_v59  ;;  %v3440_v36 = vadd.f32 %v3439_v0, %v7164_v13  ;;  %3872 = vst [vmem:[%s7192_s30 + $0x3d0] sm:$0xff] %v3527_v23  ;;  %v3590_v17 = vpop.f32.mrf.mxu3 }
 0x3ec   : > { %v3591_v32 = vadd.f32 %v3590_v17, %v7398_v6 }
 0x3ed   : > { %v5119_v38 = vpop.eup %5118  ;;  %v3744_v42 = vmul.f32 1.442695, %v3351_v20  ;;  %v3746_v1 = vmul.f32 1.442695, %v3440_v36 }
 0x3ee   : > { %v5121_v57 = vpop.eup %5120  ;;  %3808 = vst [vmem:[%s7192_s30 + $0x3c0] sm:$0xff] %v5119_v38 }
 0x3ef   : > { %3809 = vst [vmem:[%s7192_s30 + $0x3c8] sm:$0xff] %v5121_v57  ;;  %5122 = vpow2.f32 %v3744_v42 }
 0x3f0   : > { %5124 = vpow2.f32 %v3746_v1  ;;  %3853 = vst [vmem:[%s7192_s30 + $0x298] sm:$0xff] %v3591_v32  ;;  %v3528_v59 = vpop.f32.mrf.mxu2 }
 0x3f1   : > { %v3529_v13 = vadd.f32 %v3528_v59, %v7181_v11 }
 0x3f3   : > { %3874 = vst [vmem:[%s7192_s30 + $0x3f0] sm:$0xff] %v3529_v13  ;;  %v3592_v8 = vpop.f32.mrf.mxu3 }
 0x3f4   : > { %v3593_v12 = vadd.f32 %v3592_v8, %v7398_v6 }
 0x3f5   : > { %v5123_v60 = vpop.eup %5122 }
 0x3f6   : > { %v5125_v55 = vpop.eup %5124  ;;  %3810 = vst [vmem:[%s7192_s30 + $0x3e0] sm:$0xff] %v5123_v60 }
 0x3f7   : > { %3811 = vst [vmem:[%s7192_s30 + $0x3e8] sm:$0xff] %v5125_v55 }
 0x3f8   : > { %3855 = vst [vmem:[%s7192_s30 + $0x2b8] sm:$0xff] %v3593_v12 }
 0x3fb   : > { %v3595_v50 = vpop.f32.mrf.mxu3 }
 0x3fc   : > { %v3596_v51 = vadd.f32 %v3595_v50, %v7398_v6 }
 0x3fe   : > { %3857 = vst [vmem:[%s7192_s30 + $0x2d8] sm:$0xff] %v3596_v51 }
 0x403   : > { %v3597_v26 = vpop.f32.mrf.mxu3 }
 0x404   : > { %v3598_v11 = vadd.f32 %v3597_v26, %v7398_v6 }
 0x406   : > { %3859 = vst [vmem:[%s7192_s30 + $0x2f8] sm:$0xff] %v3598_v11 }
 0x40b   : > { %v3600_v40 = vpop.f32.mrf.mxu3 }
 0x40c   : > { %v3601_v34 = vadd.f32 %v3600_v40, %v7398_v6 }
 0x40e   : > { %3861 = vst [vmem:[%s7192_s30 + $0x318] sm:$0xff] %v3601_v34 }
 0x413   : > { %v3602_v54 = vpop.f32.mrf.mxu3 }
 0x414   : > { %v3603_v47 = vadd.f32 %v3602_v54, %v7398_v6 }
 0x416   : > { %3863 = vst [vmem:[%s7192_s30 + $0x338] sm:$0xff] %v3603_v47 }
 0x41b   : > { %v3605_v35 = vpop.f32.mrf.mxu3 }
 0x41c   : > { %v3606_v56 = vadd.f32 %v3605_v35, %v7398_v6 }
 0x41e   : > { %3865 = vst [vmem:[%s7192_s30 + $0x358] sm:$0xff] %v3606_v56 }
 0x423   : > { %v3607_v15 = vpop.f32.mrf.mxu3 }
 0x424   : > { %v3608_v45 = vadd.f32 %v3607_v15, %v7398_v6 }
 0x426   : > { %3867 = vst [vmem:[%s7192_s30 + $0x378] sm:$0xff] %v3608_v45 }
 0x42b   : > { %v3610_v16 = vpop.f32.mrf.mxu3 }
 0x42c   : > { %v3611_v48 = vadd.f32 %v3610_v16, %v7398_v6 }
 0x42e   : > { %3869 = vst [vmem:[%s7192_s30 + $0x398] sm:$0xff] %v3611_v48 }
 0x433   : > { %v3612_v61 = vpop.f32.mrf.mxu3 }
 0x434   : > { %v3613_v33 = vadd.f32 %v3612_v61, %v7398_v6 }
 0x436   : > { %3871 = vst [vmem:[%s7192_s30 + $0x3b8] sm:$0xff] %v3613_v33 }
 0x43b   : > { %v3615_v52 = vpop.f32.mrf.mxu3 }
 0x43c   : > { %v3616_v46 = vadd.f32 %v3615_v52, %v7398_v6 }
 0x43e   : > { %3873 = vst [vmem:[%s7192_s30 + $0x3d8] sm:$0xff] %v3616_v46 }
 0x443   : > { %v3617_v3 = vpop.f32.mrf.mxu3 }
 0x444   : > { %v3618_v44 = vadd.f32 %v3617_v3, %v7398_v6 }
 0x446   : > { %3875 = vst [vmem:[%s7192_s30 + $0x3f8] sm:$0xff] %v3618_v44 }
 0x447   : > { %5365 = shalt.err (!%p5362_p4)
}
 0x448   : > { %s5438_s26 = smov 512   ;;  %s5439_s30 = smov 32  }
 0x449   : > { %4460 = dma.vmem_to_hbm [thread:$0]  (%p5590_p5), %s3896_s27, 16384, %s3898_s2, %s3877_s8, %s5438_s26, %s5438_s26, %s5439_s30  }
 0x44a PF: > { %s7881_s12 = sld [smem:[#allocation23_spill]]  ;;  %p7883_p8 = scmp.ge.s32.totalorder %s5424_s20, 2 }
 0x44c   : > { %p4485_p2 = pnand %p7883_p8, %p5535_p6 }
 0x44e   : > { %p4486_p10 = pneg %p4485_p2 }
 0x450   : > { %s3929_s4 = sand.u32 1, %s7881_s12  }
 0x451   : > { %s3930_s28 = scalar_lea.sflag [#allocation4], %s3929_s4 }
 0x452   : > { %5403 = dma.done.wait (%p4486_p10), %s3930_s28, 16384  }
 0x453   : > { %5405 = vsyncadd (%p4486_p10), %s3930_s28, 4294950912  ;;  %s3940_s25 = scalar_lea.sflag [#allocation15], %s3929_s4 }
 0x454   : > { %5407 = dma.done.wait (%p4486_p10), %s3940_s25, 4096  }
 0x455   : > { %5409 = vsyncadd (%p4486_p10), %s3940_s25, 4294963200  ;;  %s7884_s20 = sld [smem:[#allocation26_spill]]  ;;  %s7887_s17 = smov %s5416_s18 }
 0x456   : > { %s7885_s22 = sld [smem:[#allocation24_spill]] }
 0x457   : > { %s7886_s19 = sld [smem:[#allocation27_spill]] }
 0x45b   : > { %p33_p5 = scmp.ge.s32.totalorder %s7884_s20, 4  }
 0x45c   : > { %s7888_s18 = smov %s7885_s22 }
 0x45d   :  { %35 = sbr.rel (!%p33_p5) target bundleno = 17 (0x11), region = 151 }
 0x462   :  { %3946 = vsyncpa [#allocation3], 1 }
 0x463   :  { %3948 = vsyncpa [#allocation3 + $0x1], 1 }
 0x464   :  { %3949 = vsyncpa [#allocation6], 1 }
 0x465   :  { %3951 = vsyncpa [#allocation6 + $0x1], 1 }
 0x466   :  { %3952 = vsyncpa [#allocation9], 1 }
 0x467   :  { %3953 = vsyncpa [#allocation12], 1 }
 0x468   :  { %3954 = vsyncpa [#allocation4], 1 }
 0x469   :  { %3956 = vsyncpa [#allocation4 + $0x1], 1 }
 0x46a   :  { %3957 = vsyncpa [#allocation15], 1 }
 0x46b   :  { %3959 = vsyncpa [#allocation15 + $0x1], 1 }

</bundles_post_ra>
